<compile_context>
chip_gen: v7x
topology: tpu7x:2x2x1
jax: 0.10.0
libtpu: 0.0.40
codegen_flags: <defaults>
</compile_context>

<pallas_src>
import functools

import jax
import jax.numpy as jnp
from jax.experimental import pallas as pl
from jax.experimental.pallas import tpu as pltpu


# ---------------------------------------------------------------------------
# Fused embedding + 3-layer LSTM kernel (single invocation, grid=(1,)).
# args = [ids_ref, emb_ref, (w_ih, w_hh, b) * num_layers, out_ref]
#   ids_ref: (T*Bp, 1) int32   time-major token ids, batch padded to Bp (mult of 8)
#   emb_ref: (Vp, E)           embedding table, vocab zero-padded to Vp (mult of 128)
#   w_ih:    (Din, 4H)  w_hh: (H, 4H)  b: (1, 4H)   [b = b_ih + b_hh]
#   out_ref: (Bp, T*H)         last-layer h_t at lanes [t*H,(t+1)*H)  (lane-dense)
# Gate order matches PyTorch: i, f, g, o.
# ---------------------------------------------------------------------------
def _encoder_kernel(*args, T, Bp, H, Vp, num_layers):
    ids_ref, emb_ref = args[0], args[1]
    w_refs = args[2:2 + 3 * num_layers]
    out_ref = args[2 + 3 * num_layers]
    G = 4 * H

    # Hoisted per-lane gate constants (one vreg each).  tanh(x) = 2*sigmoid(2x)-1,
    # so a single sigmoid pass covers all four gates; g lanes get a *2 pre-scale
    # and a (*2, -1) affine fixup afterwards (pure VPU work).
    lane = jax.lax.broadcasted_iota(jnp.int32, (1, G), 1)
    is_g = (lane >= 2 * H) & (lane < 3 * H)
    pre_scale = jnp.where(is_g, 2.0, 1.0).astype(jnp.float32)
    post_shift = jnp.where(is_g, -1.0, 0.0).astype(jnp.float32)

    def gate_act(gates):
        s = 1.0 / (1.0 + jnp.exp(-(gates * pre_scale)))   # one EUP pass (exp)
        return s * pre_scale + post_shift                 # i,f,o: sigmoid; g: tanh

    # Embedding gather + layer-0 input projection, hoisted out of the recurrence
    # and expressed as two MXU matmuls (padded vocab rows/cols are exact zeros).
    w_ih0 = w_refs[0][...]
    w_hh0 = w_refs[1][...]
    b0 = w_refs[2][...]
    ids = ids_ref[...]                                              # (T*Bp, 1) i32
    vocab_iota = jax.lax.broadcasted_iota(jnp.int32, (T * Bp, Vp), 1)
    onehot = jnp.where(vocab_iota == ids, 1.0, 0.0).astype(jnp.float32)
    ew = jnp.dot(emb_ref[...], w_ih0, preferred_element_type=jnp.float32)   # (Vp, 4H)
    gx0 = jnp.dot(onehot, ew, preferred_element_type=jnp.float32) + b0      # (T*Bp, 4H)
    # NOTE: at T=8 gx0 is only 8 vregs; for much larger T spill gx0 to a VMEM
    # scratch and reload per wave to bound live ranges.

    w_ih = [None] + [w_refs[3 * l + 0][...] for l in range(1, num_layers)]
    w_hh = [w_hh0] + [w_refs[3 * l + 1][...] for l in range(1, num_layers)]
    b = [None] + [w_refs[3 * l + 2][...] for l in range(1, num_layers)]

    h = [jnp.zeros((Bp, H), jnp.float32) for _ in range(num_layers)]
    c = [jnp.zeros((Bp, H), jnp.float32) for _ in range(num_layers)]

    # Wavefront over (layer, time): wave wv runs (l, t = wv - l) for all active l.
    # Every read in wave wv depends only on wave wv-1 results, so the per-wave
    # matmuls / epilogues of the different layers are independent and overlap.
    for wv in range(T + num_layers - 1):
        h_prev = list(h)   # snapshot of previous-wave outputs
        for l in range(num_layers):
            t = wv - l
            if not (0 <= t < T):
                continue
            if l == 0:
                gates = gx0[t * Bp:(t + 1) * Bp, :] + jnp.dot(
                    h_prev[0], w_hh[0], preferred_element_type=jnp.float32)
            else:
                gates = (jnp.dot(h_prev[l - 1], w_ih[l],
                                 preferred_element_type=jnp.float32)
                         + jnp.dot(h_prev[l], w_hh[l],
                                   preferred_element_type=jnp.float32)
                         + b[l])
            act = gate_act(gates)                          # (Bp, 4H)
            i_g = act[:, 0 * H:1 * H]
            f_g = act[:, 1 * H:2 * H]
            g_g = act[:, 2 * H:3 * H]
            o_g = act[:, 3 * H:4 * H]
            c[l] = f_g * c[l] + i_g * g_g
            h[l] = o_g * jnp.tanh(c[l])
            if l == num_layers - 1:
                out_ref[:, t * H:(t + 1) * H] = h[l]       # lane-dense output slab


def _encoder_pallas(ids_col, emb_padded, layer_params, T, Bp):
    Vp, E = emb_padded.shape
    H = layer_params[0][1].shape[0]
    G = 4 * H
    L = len(layer_params)

    inputs = [ids_col, emb_padded]
    in_specs = [
        pl.BlockSpec((T * Bp, 1), lambda i: (0, 0)),
        pl.BlockSpec((Vp, E), lambda i: (0, 0)),
    ]
    for (w_ih_t, w_hh_t, bias) in layer_params:
        din = w_ih_t.shape[0]
        inputs += [w_ih_t, w_hh_t, bias]
        in_specs += [
            pl.BlockSpec((din, G), lambda i: (0, 0)),
            pl.BlockSpec((H, G), lambda i: (0, 0)),
            pl.BlockSpec((1, G), lambda i: (0, 0)),
        ]

    kernel = functools.partial(_encoder_kernel, T=T, Bp=Bp, H=H, Vp=Vp, num_layers=L)
    out = pl.pallas_call(
        kernel,
        out_shape=jax.ShapeDtypeStruct((Bp, T * H), jnp.float32),
        grid_spec=pltpu.PrefetchScalarGridSpec(
            num_scalar_prefetch=0,
            grid=(1,),                       # single invocation; recurrence in-kernel
            in_specs=in_specs,
            out_specs=pl.BlockSpec((Bp, T * H), lambda i: (0, 0)),
            scratch_shapes=[],
        ),
        compiler_params=pltpu.CompilerParams(
            dimension_semantics=("arbitrary",)),
    )(*inputs)
    return out   # (Bp, T*H)


# ---------------------------------------------------------------------------
# Full EncoderModel forward (inference), jitted end-to-end.
# TODO(synk): nn.Dropout(p=0.3) is stochastic only in training mode; identity in eval.
# TODO(synk): the module stores (detached) hidden state between calls; we implement
# the zero-initialized-hidden forward (first call after init_hidden()).
# ---------------------------------------------------------------------------
@jax.jit
def encoder_forward(token_ids, emb_table, layer_params):
    B, T = token_ids.shape
    Bp = ((B + 7) // 8) * 8
    V, _ = emb_table.shape
    Vp = ((V + 127) // 128) * 128
    H = layer_params[0][1].shape[0]
    # Time-major ids, batch zero-padded; token 0 is padding_idx (zero embedding row),
    # so padded rows never affect real rows (LSTM math is row-independent).
    ids_tm = jnp.transpose(token_ids)                       # (T, B)
    if Bp != B:
        ids_tm = jnp.pad(ids_tm, ((0, 0), (0, Bp - B)))     # (T, Bp)
    ids_col = ids_tm.reshape(T * Bp, 1).astype(jnp.int32)
    emb_padded = jnp.pad(emb_table, ((0, Vp - V), (0, 0)))  # zero rows for padding
    out = _encoder_pallas(ids_col, emb_padded, layer_params, T, Bp)  # (Bp, T*H)
    return out.reshape(Bp, T, H)[:B]                        # (B, T, H) batch_first


# ---------------------------------------------------------------------------
# Pure-JAX reference for correctness checking.
# ---------------------------------------------------------------------------
def lstm_layer_ref(x_tm, w_ih_t, w_hh_t, b):
    T, B, _ = x_tm.shape
    H = w_hh_t.shape[0]

    def step(carry, x_t):
        h, c = carry
        gates = (jnp.dot(x_t, w_ih_t, precision=jax.lax.Precision.HIGHEST)
                 + jnp.dot(h, w_hh_t, precision=jax.lax.Precision.HIGHEST) + b)
        i = jax.nn.sigmoid(gates[:, 0 * H:1 * H])
        f = jax.nn.sigmoid(gates[:, 1 * H:2 * H])
        g = jnp.tanh(gates[:, 2 * H:3 * H])
        o = jax.nn.sigmoid(gates[:, 3 * H:4 * H])
        c = f * c + i * g
        h = o * jnp.tanh(c)
        return (h, c), h

    init = (jnp.zeros((B, H), jnp.float32), jnp.zeros((B, H), jnp.float32))
    _, hs = jax.lax.scan(step, init, x_tm)
    return hs  # (T, B, H)


def encoder_forward_ref(token_ids, emb_table, layer_params):
    x = jnp.take(emb_table, token_ids, axis=0)
    x = jnp.transpose(x, (1, 0, 2))
    for (w_ih_t, w_hh_t, b) in layer_params:
        x = lstm_layer_ref(x, w_ih_t, w_hh_t, b)
    return jnp.transpose(x, (1, 0, 2))


# ---------------------------------------------------------------------------
if __name__ == "__main__":
    # Shapes consistent with the module: vocab=50, embedding_size=32,
    # hidden_size=32, num_layers=3, bidirectional=False, tie_weights=False,
    # batch=2, seq=8.
    V, E, H, L = 50, 32, 32, 3
    B, T = 2, 8

    key = jax.random.PRNGKey(0)
    k_emb, k_tok, *k_layers = jax.random.split(key, 2 + 2 * L)

    # Embedding table with padding_idx=0 row zeroed (nn.Embedding(padding_idx=0)).
    emb_table = 0.1 * jax.random.normal(k_emb, (V, E), jnp.float32)
    emb_table = emb_table.at[0].set(0.0)

    # LSTM parameters: layer 0 input E, layers 1..2 input H (tie_weights=False).
    layer_params = []
    for l in range(L):
        din = E if l == 0 else H
        kw, kb = k_layers[2 * l], k_layers[2 * l + 1]
        kw1, kw2 = jax.random.split(kw)
        w_ih_t = 0.1 * jax.random.normal(kw1, (din, 4 * H), jnp.float32)
        w_hh_t = 0.1 * jax.random.normal(kw2, (H, 4 * H), jnp.float32)
        b = 0.1 * jax.random.normal(kb, (1, 4 * H), jnp.float32)  # b_ih + b_hh
        layer_params.append((w_ih_t, w_hh_t, b))

    token_ids = jax.random.randint(k_tok, (B, T), 0, V, dtype=jnp.int32)

    out = encoder_forward(token_ids, emb_table, layer_params)
    out = jax.block_until_ready(out)

    ref = encoder_forward_ref(token_ids, emb_table, layer_params)
    assert out.shape == (B, T, H), out.shape
    assert jnp.allclose(out, ref, atol=1e-4, rtol=1e-4), "mismatch vs reference"

    print("KERNEL_OK")
</pallas_src>

<mosaic_0001>
module attributes {stable_mosaic.version = 11 : i64} {
  func.func @_encoder_kernel(%arg0: i32, %arg1: memref<64x1xi32, #tpu.memory_space<vmem>>, %arg2: memref<128x32xf32, #tpu.memory_space<vmem>>, %arg3: memref<32x128xf32, #tpu.memory_space<vmem>>, %arg4: memref<32x128xf32, #tpu.memory_space<vmem>>, %arg5: memref<1x128xf32, #tpu.memory_space<vmem>>, %arg6: memref<32x128xf32, #tpu.memory_space<vmem>>, %arg7: memref<32x128xf32, #tpu.memory_space<vmem>>, %arg8: memref<1x128xf32, #tpu.memory_space<vmem>>, %arg9: memref<32x128xf32, #tpu.memory_space<vmem>>, %arg10: memref<32x128xf32, #tpu.memory_space<vmem>>, %arg11: memref<1x128xf32, #tpu.memory_space<vmem>>, %arg12: memref<8x256xf32, #tpu.memory_space<vmem>>) attributes {dimension_semantics = [#tpu.dimension_semantics<arbitrary>], iteration_bounds = array<i64: 1>, scalar_prefetch = 0 : i64, scratch_operands = 0 : i64, tpu.core_type = #tpu.core_type<tc>, window_params = [{pipeline_mode = #tpu.pipeline_mode<synchronous>, transform_indices = @transform_0, window_bounds = array<i64: 64, 1>}, {pipeline_mode = #tpu.pipeline_mode<synchronous>, transform_indices = @transform_1, window_bounds = array<i64: 128, 32>}, {pipeline_mode = #tpu.pipeline_mode<synchronous>, transform_indices = @transform_2, window_bounds = array<i64: 32, 128>}, {pipeline_mode = #tpu.pipeline_mode<synchronous>, transform_indices = @transform_3, window_bounds = array<i64: 32, 128>}, {pipeline_mode = #tpu.pipeline_mode<synchronous>, transform_indices = @transform_4, window_bounds = array<i64: 1, 128>}, {pipeline_mode = #tpu.pipeline_mode<synchronous>, transform_indices = @transform_5, window_bounds = array<i64: 32, 128>}, {pipeline_mode = #tpu.pipeline_mode<synchronous>, transform_indices = @transform_6, window_bounds = array<i64: 32, 128>}, {pipeline_mode = #tpu.pipeline_mode<synchronous>, transform_indices = @transform_7, window_bounds = array<i64: 1, 128>}, {pipeline_mode = #tpu.pipeline_mode<synchronous>, transform_indices = @transform_8, window_bounds = array<i64: 32, 128>}, {pipeline_mode = #tpu.pipeline_mode<synchronous>, transform_indices = @transform_9, window_bounds = array<i64: 32, 128>}, {pipeline_mode = #tpu.pipeline_mode<synchronous>, transform_indices = @transform_10, window_bounds = array<i64: 1, 128>}, {pipeline_mode = #tpu.pipeline_mode<synchronous>, transform_indices = @transform_11, window_bounds = array<i64: 8, 256>}]} {
    %0 = tpu.iota {dimensions = array<i32: 1>} : vector<1x128xi32>
    %c64_i32 = arith.constant 64 : i32
    %1 = vector.broadcast %c64_i32 : i32 to vector<1x128xi32>
    %2 = arith.cmpi sge, %0, %1 : vector<1x128xi32>
    %c96_i32 = arith.constant 96 : i32
    %3 = vector.broadcast %c96_i32 : i32 to vector<1x128xi32>
    %4 = arith.cmpi slt, %0, %3 : vector<1x128xi32>
    %5 = arith.andi %2, %4 : vector<1x128xi1>
    %cst = arith.constant 2.000000e+00 : f32
    %cst_0 = arith.constant 1.000000e+00 : f32
    %6 = vector.broadcast %cst : f32 to vector<1x128xf32>
    %7 = vector.broadcast %cst_0 : f32 to vector<1x128xf32>
    %8 = arith.select %5, %6, %7 : vector<1x128xi1>, vector<1x128xf32>
    %cst_1 = arith.constant -1.000000e+00 : f32
    %cst_2 = arith.constant 0.000000e+00 : f32
    %9 = vector.broadcast %cst_1 : f32 to vector<1x128xf32>
    %10 = vector.broadcast %cst_2 : f32 to vector<1x128xf32>
    %11 = arith.select %5, %9, %10 : vector<1x128xi1>, vector<1x128xf32>
    %c0 = arith.constant 0 : index
    %c0_3 = arith.constant 0 : index
    %12 = vector.load %arg3[%c0, %c0_3] : memref<32x128xf32, #tpu.memory_space<vmem>>, vector<32x128xf32>
    %c0_4 = arith.constant 0 : index
    %c0_5 = arith.constant 0 : index
    %13 = vector.load %arg4[%c0_4, %c0_5] : memref<32x128xf32, #tpu.memory_space<vmem>>, vector<32x128xf32>
    %c0_6 = arith.constant 0 : index
    %c0_7 = arith.constant 0 : index
    %14 = vector.load %arg5[%c0_6, %c0_7] : memref<1x128xf32, #tpu.memory_space<vmem>>, vector<1x128xf32>
    %c0_8 = arith.constant 0 : index
    %c0_9 = arith.constant 0 : index
    %15 = vector.load %arg1[%c0_8, %c0_9] : memref<64x1xi32, #tpu.memory_space<vmem>>, vector<64x1xi32>
    %16 = tpu.iota {dimensions = array<i32: 1>} : vector<64x128xi32>
    %17 = vector.broadcast %15 : vector<64x1xi32> to vector<64x128xi32>
    %18 = arith.cmpi eq, %16, %17 : vector<64x128xi32>
    %cst_10 = arith.constant 1.000000e+00 : f32
    %cst_11 = arith.constant 0.000000e+00 : f32
    %19 = vector.broadcast %cst_10 : f32 to vector<64x128xf32>
    %20 = vector.broadcast %cst_11 : f32 to vector<64x128xf32>
    %21 = arith.select %18, %19, %20 : vector<64x128xi1>, vector<64x128xf32>
    %c0_12 = arith.constant 0 : index
    %c0_13 = arith.constant 0 : index
    %22 = vector.load %arg2[%c0_12, %c0_13] : memref<128x32xf32, #tpu.memory_space<vmem>>, vector<128x32xf32>
    %cst_14 = arith.constant dense<0.000000e+00> : vector<128x128xf32>
    %23 = tpu.matmul %22, %12, %cst_14 {dimension_numbers = #tpu.dot_dimension_numbers<[1], [0], [0], [1], [0, 0, 1, 1], [], []>} : vector<128x32xf32>, vector<32x128xf32>, vector<128x128xf32> -> vector<128x128xf32>
    %cst_15 = arith.constant dense<0.000000e+00> : vector<64x128xf32>
    %24 = tpu.matmul %21, %23, %cst_15 {dimension_numbers = #tpu.dot_dimension_numbers<[1], [0], [0], [1], [0, 0, 1, 1], [], []>} : vector<64x128xf32>, vector<128x128xf32>, vector<64x128xf32> -> vector<64x128xf32>
    %25 = vector.broadcast %14 : vector<1x128xf32> to vector<64x128xf32>
    %26 = arith.addf %24, %25 : vector<64x128xf32>
    %c0_16 = arith.constant 0 : index
    %c0_17 = arith.constant 0 : index
    %27 = vector.load %arg6[%c0_16, %c0_17] : memref<32x128xf32, #tpu.memory_space<vmem>>, vector<32x128xf32>
    %c0_18 = arith.constant 0 : index
    %c0_19 = arith.constant 0 : index
    %28 = vector.load %arg9[%c0_18, %c0_19] : memref<32x128xf32, #tpu.memory_space<vmem>>, vector<32x128xf32>
    %c0_20 = arith.constant 0 : index
    %c0_21 = arith.constant 0 : index
    %29 = vector.load %arg7[%c0_20, %c0_21] : memref<32x128xf32, #tpu.memory_space<vmem>>, vector<32x128xf32>
    %c0_22 = arith.constant 0 : index
    %c0_23 = arith.constant 0 : index
    %30 = vector.load %arg10[%c0_22, %c0_23] : memref<32x128xf32, #tpu.memory_space<vmem>>, vector<32x128xf32>
    %c0_24 = arith.constant 0 : index
    %c0_25 = arith.constant 0 : index
    %31 = vector.load %arg8[%c0_24, %c0_25] : memref<1x128xf32, #tpu.memory_space<vmem>>, vector<1x128xf32>
    %c0_26 = arith.constant 0 : index
    %c0_27 = arith.constant 0 : index
    %32 = vector.load %arg11[%c0_26, %c0_27] : memref<1x128xf32, #tpu.memory_space<vmem>>, vector<1x128xf32>
    %cst_28 = arith.constant 0.000000e+00 : f32
    %33 = vector.broadcast %cst_28 : f32 to vector<8x32xf32>
    %cst_29 = arith.constant 0.000000e+00 : f32
    %34 = vector.broadcast %cst_29 : f32 to vector<8x32xf32>
    %cst_30 = arith.constant 0.000000e+00 : f32
    %35 = vector.broadcast %cst_30 : f32 to vector<8x32xf32>
    %cst_31 = arith.constant 0.000000e+00 : f32
    %36 = vector.broadcast %cst_31 : f32 to vector<8x32xf32>
    %cst_32 = arith.constant 0.000000e+00 : f32
    %37 = vector.broadcast %cst_32 : f32 to vector<8x32xf32>
    %cst_33 = arith.constant 0.000000e+00 : f32
    %38 = vector.broadcast %cst_33 : f32 to vector<8x32xf32>
    %39 = vector.extract_strided_slice %26 {offsets = [0, 0], sizes = [8, 128], strides = [1, 1]} : vector<64x128xf32> to vector<8x128xf32>
    %cst_34 = arith.constant dense<0.000000e+00> : vector<8x128xf32>
    %40 = tpu.matmul %33, %13, %cst_34 {dimension_numbers = #tpu.dot_dimension_numbers<[1], [0], [0], [1], [0, 0, 1, 1], [], []>} : vector<8x32xf32>, vector<32x128xf32>, vector<8x128xf32> -> vector<8x128xf32>
    %41 = arith.addf %39, %40 : vector<8x128xf32>
    %42 = vector.broadcast %8 : vector<1x128xf32> to vector<8x128xf32>
    %43 = arith.mulf %41, %42 : vector<8x128xf32>
    %cst_35 = arith.constant 0.000000e+00 : f32
    %44 = vector.broadcast %cst_35 : f32 to vector<8x128xf32>
    %45 = arith.subf %44, %43 : vector<8x128xf32>
    %46 = math.exp %45 : vector<8x128xf32>
    %cst_36 = arith.constant 1.000000e+00 : f32
    %47 = vector.broadcast %cst_36 : f32 to vector<8x128xf32>
    %48 = arith.addf %47, %46 : vector<8x128xf32>
    %cst_37 = arith.constant 1.000000e+00 : f32
    %49 = vector.broadcast %cst_37 : f32 to vector<8x128xf32>
    %50 = arith.divf %49, %48 : vector<8x128xf32>
    %51 = vector.broadcast %8 : vector<1x128xf32> to vector<8x128xf32>
    %52 = arith.mulf %50, %51 : vector<8x128xf32>
    %53 = vector.broadcast %11 : vector<1x128xf32> to vector<8x128xf32>
    %54 = arith.addf %52, %53 : vector<8x128xf32>
    %55 = vector.extract_strided_slice %54 {offsets = [0, 0], sizes = [8, 32], strides = [1, 1]} : vector<8x128xf32> to vector<8x32xf32>
    %56 = vector.extract_strided_slice %54 {offsets = [0, 32], sizes = [8, 32], strides = [1, 1]} : vector<8x128xf32> to vector<8x32xf32>
    %57 = vector.extract_strided_slice %54 {offsets = [0, 64], sizes = [8, 32], strides = [1, 1]} : vector<8x128xf32> to vector<8x32xf32>
    %58 = vector.extract_strided_slice %54 {offsets = [0, 96], sizes = [8, 32], strides = [1, 1]} : vector<8x128xf32> to vector<8x32xf32>
    %59 = arith.mulf %56, %36 : vector<8x32xf32>
    %60 = arith.mulf %55, %57 : vector<8x32xf32>
    %61 = arith.addf %59, %60 : vector<8x32xf32>
    %62 = math.tanh %61 : vector<8x32xf32>
    %63 = arith.mulf %58, %62 : vector<8x32xf32>
    %64 = vector.extract_strided_slice %26 {offsets = [8, 0], sizes = [8, 128], strides = [1, 1]} : vector<64x128xf32> to vector<8x128xf32>
    %cst_38 = arith.constant dense<0.000000e+00> : vector<8x128xf32>
    %65 = tpu.matmul %63, %13, %cst_38 {dimension_numbers = #tpu.dot_dimension_numbers<[1], [0], [0], [1], [0, 0, 1, 1], [], []>} : vector<8x32xf32>, vector<32x128xf32>, vector<8x128xf32> -> vector<8x128xf32>
    %66 = arith.addf %64, %65 : vector<8x128xf32>
    %67 = vector.broadcast %8 : vector<1x128xf32> to vector<8x128xf32>
    %68 = arith.mulf %66, %67 : vector<8x128xf32>
    %cst_39 = arith.constant 0.000000e+00 : f32
    %69 = vector.broadcast %cst_39 : f32 to vector<8x128xf32>
    %70 = arith.subf %69, %68 : vector<8x128xf32>
    %71 = math.exp %70 : vector<8x128xf32>
    %cst_40 = arith.constant 1.000000e+00 : f32
    %72 = vector.broadcast %cst_40 : f32 to vector<8x128xf32>
    %73 = arith.addf %72, %71 : vector<8x128xf32>
    %cst_41 = arith.constant 1.000000e+00 : f32
    %74 = vector.broadcast %cst_41 : f32 to vector<8x128xf32>
    %75 = arith.divf %74, %73 : vector<8x128xf32>
    %76 = vector.broadcast %8 : vector<1x128xf32> to vector<8x128xf32>
    %77 = arith.mulf %75, %76 : vector<8x128xf32>
    %78 = vector.broadcast %11 : vector<1x128xf32> to vector<8x128xf32>
    %79 = arith.addf %77, %78 : vector<8x128xf32>
    %80 = vector.extract_strided_slice %79 {offsets = [0, 0], sizes = [8, 32], strides = [1, 1]} : vector<8x128xf32> to vector<8x32xf32>
    %81 = vector.extract_strided_slice %79 {offsets = [0, 32], sizes = [8, 32], strides = [1, 1]} : vector<8x128xf32> to vector<8x32xf32>
    %82 = vector.extract_strided_slice %79 {offsets = [0, 64], sizes = [8, 32], strides = [1, 1]} : vector<8x128xf32> to vector<8x32xf32>
    %83 = vector.extract_strided_slice %79 {offsets = [0, 96], sizes = [8, 32], strides = [1, 1]} : vector<8x128xf32> to vector<8x32xf32>
    %84 = arith.mulf %81, %61 : vector<8x32xf32>
    %85 = arith.mulf %80, %82 : vector<8x32xf32>
    %86 = arith.addf %84, %85 : vector<8x32xf32>
    %87 = math.tanh %86 : vector<8x32xf32>
    %88 = arith.mulf %83, %87 : vector<8x32xf32>
    %cst_42 = arith.constant dense<0.000000e+00> : vector<8x128xf32>
    %89 = tpu.matmul %63, %27, %cst_42 {dimension_numbers = #tpu.dot_dimension_numbers<[1], [0], [0], [1], [0, 0, 1, 1], [], []>} : vector<8x32xf32>, vector<32x128xf32>, vector<8x128xf32> -> vector<8x128xf32>
    %cst_43 = arith.constant dense<0.000000e+00> : vector<8x128xf32>
    %90 = tpu.matmul %34, %29, %cst_43 {dimension_numbers = #tpu.dot_dimension_numbers<[1], [0], [0], [1], [0, 0, 1, 1], [], []>} : vector<8x32xf32>, vector<32x128xf32>, vector<8x128xf32> -> vector<8x128xf32>
    %91 = arith.addf %89, %90 : vector<8x128xf32>
    %92 = vector.broadcast %31 : vector<1x128xf32> to vector<8x128xf32>
    %93 = arith.addf %91, %92 : vector<8x128xf32>
    %94 = vector.broadcast %8 : vector<1x128xf32> to vector<8x128xf32>
    %95 = arith.mulf %93, %94 : vector<8x128xf32>
    %cst_44 = arith.constant 0.000000e+00 : f32
    %96 = vector.broadcast %cst_44 : f32 to vector<8x128xf32>
    %97 = arith.subf %96, %95 : vector<8x128xf32>
    %98 = math.exp %97 : vector<8x128xf32>
    %cst_45 = arith.constant 1.000000e+00 : f32
    %99 = vector.broadcast %cst_45 : f32 to vector<8x128xf32>
    %100 = arith.addf %99, %98 : vector<8x128xf32>
    %cst_46 = arith.constant 1.000000e+00 : f32
    %101 = vector.broadcast %cst_46 : f32 to vector<8x128xf32>
    %102 = arith.divf %101, %100 : vector<8x128xf32>
    %103 = vector.broadcast %8 : vector<1x128xf32> to vector<8x128xf32>
    %104 = arith.mulf %102, %103 : vector<8x128xf32>
    %105 = vector.broadcast %11 : vector<1x128xf32> to vector<8x128xf32>
    %106 = arith.addf %104, %105 : vector<8x128xf32>
    %107 = vector.extract_strided_slice %106 {offsets = [0, 0], sizes = [8, 32], strides = [1, 1]} : vector<8x128xf32> to vector<8x32xf32>
    %108 = vector.extract_strided_slice %106 {offsets = [0, 32], sizes = [8, 32], strides = [1, 1]} : vector<8x128xf32> to vector<8x32xf32>
    %109 = vector.extract_strided_slice %106 {offsets = [0, 64], sizes = [8, 32], strides = [1, 1]} : vector<8x128xf32> to vector<8x32xf32>
    %110 = vector.extract_strided_slice %106 {offsets = [0, 96], sizes = [8, 32], strides = [1, 1]} : vector<8x128xf32> to vector<8x32xf32>
    %111 = arith.mulf %108, %37 : vector<8x32xf32>
    %112 = arith.mulf %107, %109 : vector<8x32xf32>
    %113 = arith.addf %111, %112 : vector<8x32xf32>
    %114 = math.tanh %113 : vector<8x32xf32>
    %115 = arith.mulf %110, %114 : vector<8x32xf32>
    %116 = vector.extract_strided_slice %26 {offsets = [16, 0], sizes = [8, 128], strides = [1, 1]} : vector<64x128xf32> to vector<8x128xf32>
    %cst_47 = arith.constant dense<0.000000e+00> : vector<8x128xf32>
    %117 = tpu.matmul %88, %13, %cst_47 {dimension_numbers = #tpu.dot_dimension_numbers<[1], [0], [0], [1], [0, 0, 1, 1], [], []>} : vector<8x32xf32>, vector<32x128xf32>, vector<8x128xf32> -> vector<8x128xf32>
    %118 = arith.addf %116, %117 : vector<8x128xf32>
    %119 = vector.broadcast %8 : vector<1x128xf32> to vector<8x128xf32>
    %120 = arith.mulf %118, %119 : vector<8x128xf32>
    %cst_48 = arith.constant 0.000000e+00 : f32
    %121 = vector.broadcast %cst_48 : f32 to vector<8x128xf32>
    %122 = arith.subf %121, %120 : vector<8x128xf32>
    %123 = math.exp %122 : vector<8x128xf32>
    %cst_49 = arith.constant 1.000000e+00 : f32
    %124 = vector.broadcast %cst_49 : f32 to vector<8x128xf32>
    %125 = arith.addf %124, %123 : vector<8x128xf32>
    %cst_50 = arith.constant 1.000000e+00 : f32
    %126 = vector.broadcast %cst_50 : f32 to vector<8x128xf32>
    %127 = arith.divf %126, %125 : vector<8x128xf32>
    %128 = vector.broadcast %8 : vector<1x128xf32> to vector<8x128xf32>
    %129 = arith.mulf %127, %128 : vector<8x128xf32>
    %130 = vector.broadcast %11 : vector<1x128xf32> to vector<8x128xf32>
    %131 = arith.addf %129, %130 : vector<8x128xf32>
    %132 = vector.extract_strided_slice %131 {offsets = [0, 0], sizes = [8, 32], strides = [1, 1]} : vector<8x128xf32> to vector<8x32xf32>
    %133 = vector.extract_strided_slice %131 {offsets = [0, 32], sizes = [8, 32], strides = [1, 1]} : vector<8x128xf32> to vector<8x32xf32>
    %134 = vector.extract_strided_slice %131 {offsets = [0, 64], sizes = [8, 32], strides = [1, 1]} : vector<8x128xf32> to vector<8x32xf32>
    %135 = vector.extract_strided_slice %131 {offsets = [0, 96], sizes = [8, 32], strides = [1, 1]} : vector<8x128xf32> to vector<8x32xf32>
    %136 = arith.mulf %133, %86 : vector<8x32xf32>
    %137 = arith.mulf %132, %134 : vector<8x32xf32>
    %138 = arith.addf %136, %137 : vector<8x32xf32>
    %139 = math.tanh %138 : vector<8x32xf32>
    %140 = arith.mulf %135, %139 : vector<8x32xf32>
    %cst_51 = arith.constant dense<0.000000e+00> : vector<8x128xf32>
    %141 = tpu.matmul %88, %27, %cst_51 {dimension_numbers = #tpu.dot_dimension_numbers<[1], [0], [0], [1], [0, 0, 1, 1], [], []>} : vector<8x32xf32>, vector<32x128xf32>, vector<8x128xf32> -> vector<8x128xf32>
    %cst_52 = arith.constant dense<0.000000e+00> : vector<8x128xf32>
    %142 = tpu.matmul %115, %29, %cst_52 {dimension_numbers = #tpu.dot_dimension_numbers<[1], [0], [0], [1], [0, 0, 1, 1], [], []>} : vector<8x32xf32>, vector<32x128xf32>, vector<8x128xf32> -> vector<8x128xf32>
    %143 = arith.addf %141, %142 : vector<8x128xf32>
    %144 = vector.broadcast %31 : vector<1x128xf32> to vector<8x128xf32>
    %145 = arith.addf %143, %144 : vector<8x128xf32>
    %146 = vector.broadcast %8 : vector<1x128xf32> to vector<8x128xf32>
    %147 = arith.mulf %145, %146 : vector<8x128xf32>
    %cst_53 = arith.constant 0.000000e+00 : f32
    %148 = vector.broadcast %cst_53 : f32 to vector<8x128xf32>
    %149 = arith.subf %148, %147 : vector<8x128xf32>
    %150 = math.exp %149 : vector<8x128xf32>
    %cst_54 = arith.constant 1.000000e+00 : f32
    %151 = vector.broadcast %cst_54 : f32 to vector<8x128xf32>
    %152 = arith.addf %151, %150 : vector<8x128xf32>
    %cst_55 = arith.constant 1.000000e+00 : f32
    %153 = vector.broadcast %cst_55 : f32 to vector<8x128xf32>
    %154 = arith.divf %153, %152 : vector<8x128xf32>
    %155 = vector.broadcast %8 : vector<1x128xf32> to vector<8x128xf32>
    %156 = arith.mulf %154, %155 : vector<8x128xf32>
    %157 = vector.broadcast %11 : vector<1x128xf32> to vector<8x128xf32>
    %158 = arith.addf %156, %157 : vector<8x128xf32>
    %159 = vector.extract_strided_slice %158 {offsets = [0, 0], sizes = [8, 32], strides = [1, 1]} : vector<8x128xf32> to vector<8x32xf32>
    %160 = vector.extract_strided_slice %158 {offsets = [0, 32], sizes = [8, 32], strides = [1, 1]} : vector<8x128xf32> to vector<8x32xf32>
    %161 = vector.extract_strided_slice %158 {offsets = [0, 64], sizes = [8, 32], strides = [1, 1]} : vector<8x128xf32> to vector<8x32xf32>
    %162 = vector.extract_strided_slice %158 {offsets = [0, 96], sizes = [8, 32], strides = [1, 1]} : vector<8x128xf32> to vector<8x32xf32>
    %163 = arith.mulf %160, %113 : vector<8x32xf32>
    %164 = arith.mulf %159, %161 : vector<8x32xf32>
    %165 = arith.addf %163, %164 : vector<8x32xf32>
    %166 = math.tanh %165 : vector<8x32xf32>
    %167 = arith.mulf %162, %166 : vector<8x32xf32>
    %cst_56 = arith.constant dense<0.000000e+00> : vector<8x128xf32>
    %168 = tpu.matmul %115, %28, %cst_56 {dimension_numbers = #tpu.dot_dimension_numbers<[1], [0], [0], [1], [0, 0, 1, 1], [], []>} : vector<8x32xf32>, vector<32x128xf32>, vector<8x128xf32> -> vector<8x128xf32>
    %cst_57 = arith.constant dense<0.000000e+00> : vector<8x128xf32>
    %169 = tpu.matmul %35, %30, %cst_57 {dimension_numbers = #tpu.dot_dimension_numbers<[1], [0], [0], [1], [0, 0, 1, 1], [], []>} : vector<8x32xf32>, vector<32x128xf32>, vector<8x128xf32> -> vector<8x128xf32>
    %170 = arith.addf %168, %169 : vector<8x128xf32>
    %171 = vector.broadcast %32 : vector<1x128xf32> to vector<8x128xf32>
    %172 = arith.addf %170, %171 : vector<8x128xf32>
    %173 = vector.broadcast %8 : vector<1x128xf32> to vector<8x128xf32>
    %174 = arith.mulf %172, %173 : vector<8x128xf32>
    %cst_58 = arith.constant 0.000000e+00 : f32
    %175 = vector.broadcast %cst_58 : f32 to vector<8x128xf32>
    %176 = arith.subf %175, %174 : vector<8x128xf32>
    %177 = math.exp %176 : vector<8x128xf32>
    %cst_59 = arith.constant 1.000000e+00 : f32
    %178 = vector.broadcast %cst_59 : f32 to vector<8x128xf32>
    %179 = arith.addf %178, %177 : vector<8x128xf32>
    %cst_60 = arith.constant 1.000000e+00 : f32
    %180 = vector.broadcast %cst_60 : f32 to vector<8x128xf32>
    %181 = arith.divf %180, %179 : vector<8x128xf32>
    %182 = vector.broadcast %8 : vector<1x128xf32> to vector<8x128xf32>
    %183 = arith.mulf %181, %182 : vector<8x128xf32>
    %184 = vector.broadcast %11 : vector<1x128xf32> to vector<8x128xf32>
    %185 = arith.addf %183, %184 : vector<8x128xf32>
    %186 = vector.extract_strided_slice %185 {offsets = [0, 0], sizes = [8, 32], strides = [1, 1]} : vector<8x128xf32> to vector<8x32xf32>
    %187 = vector.extract_strided_slice %185 {offsets = [0, 32], sizes = [8, 32], strides = [1, 1]} : vector<8x128xf32> to vector<8x32xf32>
    %188 = vector.extract_strided_slice %185 {offsets = [0, 64], sizes = [8, 32], strides = [1, 1]} : vector<8x128xf32> to vector<8x32xf32>
    %189 = vector.extract_strided_slice %185 {offsets = [0, 96], sizes = [8, 32], strides = [1, 1]} : vector<8x128xf32> to vector<8x32xf32>
    %190 = arith.mulf %187, %38 : vector<8x32xf32>
    %191 = arith.mulf %186, %188 : vector<8x32xf32>
    %192 = arith.addf %190, %191 : vector<8x32xf32>
    %193 = math.tanh %192 : vector<8x32xf32>
    %194 = arith.mulf %189, %193 : vector<8x32xf32>
    %c0_61 = arith.constant 0 : index
    %c0_62 = arith.constant 0 : index
    %195 = vector.load %arg12[%c0_61, %c0_62] : memref<8x256xf32, #tpu.memory_space<vmem>>, vector<8x32xf32>
    tpu.vector_store %arg12[%c0_61, %c0_62], %194 {strides = array<i32>} : memref<8x256xf32, #tpu.memory_space<vmem>>, vector<8x32xf32>,
    %196 = vector.extract_strided_slice %26 {offsets = [24, 0], sizes = [8, 128], strides = [1, 1]} : vector<64x128xf32> to vector<8x128xf32>
    %cst_63 = arith.constant dense<0.000000e+00> : vector<8x128xf32>
    %197 = tpu.matmul %140, %13, %cst_63 {dimension_numbers = #tpu.dot_dimension_numbers<[1], [0], [0], [1], [0, 0, 1, 1], [], []>} : vector<8x32xf32>, vector<32x128xf32>, vector<8x128xf32> -> vector<8x128xf32>
    %198 = arith.addf %196, %197 : vector<8x128xf32>
    %199 = vector.broadcast %8 : vector<1x128xf32> to vector<8x128xf32>
    %200 = arith.mulf %198, %199 : vector<8x128xf32>
    %cst_64 = arith.constant 0.000000e+00 : f32
    %201 = vector.broadcast %cst_64 : f32 to vector<8x128xf32>
    %202 = arith.subf %201, %200 : vector<8x128xf32>
    %203 = math.exp %202 : vector<8x128xf32>
    %cst_65 = arith.constant 1.000000e+00 : f32
    %204 = vector.broadcast %cst_65 : f32 to vector<8x128xf32>
    %205 = arith.addf %204, %203 : vector<8x128xf32>
    %cst_66 = arith.constant 1.000000e+00 : f32
    %206 = vector.broadcast %cst_66 : f32 to vector<8x128xf32>
    %207 = arith.divf %206, %205 : vector<8x128xf32>
    %208 = vector.broadcast %8 : vector<1x128xf32> to vector<8x128xf32>
    %209 = arith.mulf %207, %208 : vector<8x128xf32>
    %210 = vector.broadcast %11 : vector<1x128xf32> to vector<8x128xf32>
    %211 = arith.addf %209, %210 : vector<8x128xf32>
    %212 = vector.extract_strided_slice %211 {offsets = [0, 0], sizes = [8, 32], strides = [1, 1]} : vector<8x128xf32> to vector<8x32xf32>
    %213 = vector.extract_strided_slice %211 {offsets = [0, 32], sizes = [8, 32], strides = [1, 1]} : vector<8x128xf32> to vector<8x32xf32>
    %214 = vector.extract_strided_slice %211 {offsets = [0, 64], sizes = [8, 32], strides = [1, 1]} : vector<8x128xf32> to vector<8x32xf32>
    %215 = vector.extract_strided_slice %211 {offsets = [0, 96], sizes = [8, 32], strides = [1, 1]} : vector<8x128xf32> to vector<8x32xf32>
    %216 = arith.mulf %213, %138 : vector<8x32xf32>
    %217 = arith.mulf %212, %214 : vector<8x32xf32>
    %218 = arith.addf %216, %217 : vector<8x32xf32>
    %219 = math.tanh %218 : vector<8x32xf32>
    %220 = arith.mulf %215, %219 : vector<8x32xf32>
    %cst_67 = arith.constant dense<0.000000e+00> : vector<8x128xf32>
    %221 = tpu.matmul %140, %27, %cst_67 {dimension_numbers = #tpu.dot_dimension_numbers<[1], [0], [0], [1], [0, 0, 1, 1], [], []>} : vector<8x32xf32>, vector<32x128xf32>, vector<8x128xf32> -> vector<8x128xf32>
    %cst_68 = arith.constant dense<0.000000e+00> : vector<8x128xf32>
    %222 = tpu.matmul %167, %29, %cst_68 {dimension_numbers = #tpu.dot_dimension_numbers<[1], [0], [0], [1], [0, 0, 1, 1], [], []>} : vector<8x32xf32>, vector<32x128xf32>, vector<8x128xf32> -> vector<8x128xf32>
    %223 = arith.addf %221, %222 : vector<8x128xf32>
    %224 = vector.broadcast %31 : vector<1x128xf32> to vector<8x128xf32>
    %225 = arith.addf %223, %224 : vector<8x128xf32>
    %226 = vector.broadcast %8 : vector<1x128xf32> to vector<8x128xf32>
    %227 = arith.mulf %225, %226 : vector<8x128xf32>
    %cst_69 = arith.constant 0.000000e+00 : f32
    %228 = vector.broadcast %cst_69 : f32 to vector<8x128xf32>
    %229 = arith.subf %228, %227 : vector<8x128xf32>
    %230 = math.exp %229 : vector<8x128xf32>
    %cst_70 = arith.constant 1.000000e+00 : f32
    %231 = vector.broadcast %cst_70 : f32 to vector<8x128xf32>
    %232 = arith.addf %231, %230 : vector<8x128xf32>
    %cst_71 = arith.constant 1.000000e+00 : f32
    %233 = vector.broadcast %cst_71 : f32 to vector<8x128xf32>
    %234 = arith.divf %233, %232 : vector<8x128xf32>
    %235 = vector.broadcast %8 : vector<1x128xf32> to vector<8x128xf32>
    %236 = arith.mulf %234, %235 : vector<8x128xf32>
    %237 = vector.broadcast %11 : vector<1x128xf32> to vector<8x128xf32>
    %238 = arith.addf %236, %237 : vector<8x128xf32>
    %239 = vector.extract_strided_slice %238 {offsets = [0, 0], sizes = [8, 32], strides = [1, 1]} : vector<8x128xf32> to vector<8x32xf32>
    %240 = vector.extract_strided_slice %238 {offsets = [0, 32], sizes = [8, 32], strides = [1, 1]} : vector<8x128xf32> to vector<8x32xf32>
    %241 = vector.extract_strided_slice %238 {offsets = [0, 64], sizes = [8, 32], strides = [1, 1]} : vector<8x128xf32> to vector<8x32xf32>
    %242 = vector.extract_strided_slice %238 {offsets = [0, 96], sizes = [8, 32], strides = [1, 1]} : vector<8x128xf32> to vector<8x32xf32>
    %243 = arith.mulf %240, %165 : vector<8x32xf32>
    %244 = arith.mulf %239, %241 : vector<8x32xf32>
    %245 = arith.addf %243, %244 : vector<8x32xf32>
    %246 = math.tanh %245 : vector<8x32xf32>
    %247 = arith.mulf %242, %246 : vector<8x32xf32>
    %cst_72 = arith.constant dense<0.000000e+00> : vector<8x128xf32>
    %248 = tpu.matmul %167, %28, %cst_72 {dimension_numbers = #tpu.dot_dimension_numbers<[1], [0], [0], [1], [0, 0, 1, 1], [], []>} : vector<8x32xf32>, vector<32x128xf32>, vector<8x128xf32> -> vector<8x128xf32>
    %cst_73 = arith.constant dense<0.000000e+00> : vector<8x128xf32>
    %249 = tpu.matmul %194, %30, %cst_73 {dimension_numbers = #tpu.dot_dimension_numbers<[1], [0], [0], [1], [0, 0, 1, 1], [], []>} : vector<8x32xf32>, vector<32x128xf32>, vector<8x128xf32> -> vector<8x128xf32>
    %250 = arith.addf %248, %249 : vector<8x128xf32>
    %251 = vector.broadcast %32 : vector<1x128xf32> to vector<8x128xf32>
    %252 = arith.addf %250, %251 : vector<8x128xf32>
    %253 = vector.broadcast %8 : vector<1x128xf32> to vector<8x128xf32>
    %254 = arith.mulf %252, %253 : vector<8x128xf32>
    %cst_74 = arith.constant 0.000000e+00 : f32
    %255 = vector.broadcast %cst_74 : f32 to vector<8x128xf32>
    %256 = arith.subf %255, %254 : vector<8x128xf32>
    %257 = math.exp %256 : vector<8x128xf32>
    %cst_75 = arith.constant 1.000000e+00 : f32
    %258 = vector.broadcast %cst_75 : f32 to vector<8x128xf32>
    %259 = arith.addf %258, %257 : vector<8x128xf32>
    %cst_76 = arith.constant 1.000000e+00 : f32
    %260 = vector.broadcast %cst_76 : f32 to vector<8x128xf32>
    %261 = arith.divf %260, %259 : vector<8x128xf32>
    %262 = vector.broadcast %8 : vector<1x128xf32> to vector<8x128xf32>
    %263 = arith.mulf %261, %262 : vector<8x128xf32>
    %264 = vector.broadcast %11 : vector<1x128xf32> to vector<8x128xf32>
    %265 = arith.addf %263, %264 : vector<8x128xf32>
    %266 = vector.extract_strided_slice %265 {offsets = [0, 0], sizes = [8, 32], strides = [1, 1]} : vector<8x128xf32> to vector<8x32xf32>
    %267 = vector.extract_strided_slice %265 {offsets = [0, 32], sizes = [8, 32], strides = [1, 1]} : vector<8x128xf32> to vector<8x32xf32>
    %268 = vector.extract_strided_slice %265 {offsets = [0, 64], sizes = [8, 32], strides = [1, 1]} : vector<8x128xf32> to vector<8x32xf32>
    %269 = vector.extract_strided_slice %265 {offsets = [0, 96], sizes = [8, 32], strides = [1, 1]} : vector<8x128xf32> to vector<8x32xf32>
    %270 = arith.mulf %267, %192 : vector<8x32xf32>
    %271 = arith.mulf %266, %268 : vector<8x32xf32>
    %272 = arith.addf %270, %271 : vector<8x32xf32>
    %273 = math.tanh %272 : vector<8x32xf32>
    %274 = arith.mulf %269, %273 : vector<8x32xf32>
    %c0_77 = arith.constant 0 : index
    %c32 = arith.constant 32 : index
    %275 = vector.load %arg12[%c0_77, %c32] : memref<8x256xf32, #tpu.memory_space<vmem>>, vector<8x32xf32>
    tpu.vector_store %arg12[%c0_77, %c32], %274 {strides = array<i32>} : memref<8x256xf32, #tpu.memory_space<vmem>>, vector<8x32xf32>,
    %276 = vector.extract_strided_slice %26 {offsets = [32, 0], sizes = [8, 128], strides = [1, 1]} : vector<64x128xf32> to vector<8x128xf32>
    %cst_78 = arith.constant dense<0.000000e+00> : vector<8x128xf32>
    %277 = tpu.matmul %220, %13, %cst_78 {dimension_numbers = #tpu.dot_dimension_numbers<[1], [0], [0], [1], [0, 0, 1, 1], [], []>} : vector<8x32xf32>, vector<32x128xf32>, vector<8x128xf32> -> vector<8x128xf32>
    %278 = arith.addf %276, %277 : vector<8x128xf32>
    %279 = vector.broadcast %8 : vector<1x128xf32> to vector<8x128xf32>
    %280 = arith.mulf %278, %279 : vector<8x128xf32>
    %cst_79 = arith.constant 0.000000e+00 : f32
    %281 = vector.broadcast %cst_79 : f32 to vector<8x128xf32>
    %282 = arith.subf %281, %280 : vector<8x128xf32>
    %283 = math.exp %282 : vector<8x128xf32>
    %cst_80 = arith.constant 1.000000e+00 : f32
    %284 = vector.broadcast %cst_80 : f32 to vector<8x128xf32>
    %285 = arith.addf %284, %283 : vector<8x128xf32>
    %cst_81 = arith.constant 1.000000e+00 : f32
    %286 = vector.broadcast %cst_81 : f32 to vector<8x128xf32>
    %287 = arith.divf %286, %285 : vector<8x128xf32>
    %288 = vector.broadcast %8 : vector<1x128xf32> to vector<8x128xf32>
    %289 = arith.mulf %287, %288 : vector<8x128xf32>
    %290 = vector.broadcast %11 : vector<1x128xf32> to vector<8x128xf32>
    %291 = arith.addf %289, %290 : vector<8x128xf32>
    %292 = vector.extract_strided_slice %291 {offsets = [0, 0], sizes = [8, 32], strides = [1, 1]} : vector<8x128xf32> to vector<8x32xf32>
    %293 = vector.extract_strided_slice %291 {offsets = [0, 32], sizes = [8, 32], strides = [1, 1]} : vector<8x128xf32> to vector<8x32xf32>
    %294 = vector.extract_strided_slice %291 {offsets = [0, 64], sizes = [8, 32], strides = [1, 1]} : vector<8x128xf32> to vector<8x32xf32>
    %295 = vector.extract_strided_slice %291 {offsets = [0, 96], sizes = [8, 32], strides = [1, 1]} : vector<8x128xf32> to vector<8x32xf32>
    %296 = arith.mulf %293, %218 : vector<8x32xf32>
    %297 = arith.mulf %292, %294 : vector<8x32xf32>
    %298 = arith.addf %296, %297 : vector<8x32xf32>
    %299 = math.tanh %298 : vector<8x32xf32>
    %300 = arith.mulf %295, %299 : vector<8x32xf32>
    %cst_82 = arith.constant dense<0.000000e+00> : vector<8x128xf32>
    %301 = tpu.matmul %220, %27, %cst_82 {dimension_numbers = #tpu.dot_dimension_numbers<[1], [0], [0], [1], [0, 0, 1, 1], [], []>} : vector<8x32xf32>, vector<32x128xf32>, vector<8x128xf32> -> vector<8x128xf32>
    %cst_83 = arith.constant dense<0.000000e+00> : vector<8x128xf32>
    %302 = tpu.matmul %247, %29, %cst_83 {dimension_numbers = #tpu.dot_dimension_numbers<[1], [0], [0], [1], [0, 0, 1, 1], [], []>} : vector<8x32xf32>, vector<32x128xf32>, vector<8x128xf32> -> vector<8x128xf32>
    %303 = arith.addf %301, %302 : vector<8x128xf32>
    %304 = vector.broadcast %31 : vector<1x128xf32> to vector<8x128xf32>
    %305 = arith.addf %303, %304 : vector<8x128xf32>
    %306 = vector.broadcast %8 : vector<1x128xf32> to vector<8x128xf32>
    %307 = arith.mulf %305, %306 : vector<8x128xf32>
    %cst_84 = arith.constant 0.000000e+00 : f32
    %308 = vector.broadcast %cst_84 : f32 to vector<8x128xf32>
    %309 = arith.subf %308, %307 : vector<8x128xf32>
    %310 = math.exp %309 : vector<8x128xf32>
    %cst_85 = arith.constant 1.000000e+00 : f32
    %311 = vector.broadcast %cst_85 : f32 to vector<8x128xf32>
    %312 = arith.addf %311, %310 : vector<8x128xf32>
    %cst_86 = arith.constant 1.000000e+00 : f32
    %313 = vector.broadcast %cst_86 : f32 to vector<8x128xf32>
    %314 = arith.divf %313, %312 : vector<8x128xf32>
    %315 = vector.broadcast %8 : vector<1x128xf32> to vector<8x128xf32>
    %316 = arith.mulf %314, %315 : vector<8x128xf32>
    %317 = vector.broadcast %11 : vector<1x128xf32> to vector<8x128xf32>
    %318 = arith.addf %316, %317 : vector<8x128xf32>
    %319 = vector.extract_strided_slice %318 {offsets = [0, 0], sizes = [8, 32], strides = [1, 1]} : vector<8x128xf32> to vector<8x32xf32>
    %320 = vector.extract_strided_slice %318 {offsets = [0, 32], sizes = [8, 32], strides = [1, 1]} : vector<8x128xf32> to vector<8x32xf32>
    %321 = vector.extract_strided_slice %318 {offsets = [0, 64], sizes = [8, 32], strides = [1, 1]} : vector<8x128xf32> to vector<8x32xf32>
    %322 = vector.extract_strided_slice %318 {offsets = [0, 96], sizes = [8, 32], strides = [1, 1]} : vector<8x128xf32> to vector<8x32xf32>
    %323 = arith.mulf %320, %245 : vector<8x32xf32>
    %324 = arith.mulf %319, %321 : vector<8x32xf32>
    %325 = arith.addf %323, %324 : vector<8x32xf32>
    %326 = math.tanh %325 : vector<8x32xf32>
    %327 = arith.mulf %322, %326 : vector<8x32xf32>
    %cst_87 = arith.constant dense<0.000000e+00> : vector<8x128xf32>
    %328 = tpu.matmul %247, %28, %cst_87 {dimension_numbers = #tpu.dot_dimension_numbers<[1], [0], [0], [1], [0, 0, 1, 1], [], []>} : vector<8x32xf32>, vector<32x128xf32>, vector<8x128xf32> -> vector<8x128xf32>
    %cst_88 = arith.constant dense<0.000000e+00> : vector<8x128xf32>
    %329 = tpu.matmul %274, %30, %cst_88 {dimension_numbers = #tpu.dot_dimension_numbers<[1], [0], [0], [1], [0, 0, 1, 1], [], []>} : vector<8x32xf32>, vector<32x128xf32>, vector<8x128xf32> -> vector<8x128xf32>
    %330 = arith.addf %328, %329 : vector<8x128xf32>
    %331 = vector.broadcast %32 : vector<1x128xf32> to vector<8x128xf32>
    %332 = arith.addf %330, %331 : vector<8x128xf32>
    %333 = vector.broadcast %8 : vector<1x128xf32> to vector<8x128xf32>
    %334 = arith.mulf %332, %333 : vector<8x128xf32>
    %cst_89 = arith.constant 0.000000e+00 : f32
    %335 = vector.broadcast %cst_89 : f32 to vector<8x128xf32>
    %336 = arith.subf %335, %334 : vector<8x128xf32>
    %337 = math.exp %336 : vector<8x128xf32>
    %cst_90 = arith.constant 1.000000e+00 : f32
    %338 = vector.broadcast %cst_90 : f32 to vector<8x128xf32>
    %339 = arith.addf %338, %337 : vector<8x128xf32>
    %cst_91 = arith.constant 1.000000e+00 : f32
    %340 = vector.broadcast %cst_91 : f32 to vector<8x128xf32>
    %341 = arith.divf %340, %339 : vector<8x128xf32>
    %342 = vector.broadcast %8 : vector<1x128xf32> to vector<8x128xf32>
    %343 = arith.mulf %341, %342 : vector<8x128xf32>
    %344 = vector.broadcast %11 : vector<1x128xf32> to vector<8x128xf32>
    %345 = arith.addf %343, %344 : vector<8x128xf32>
    %346 = vector.extract_strided_slice %345 {offsets = [0, 0], sizes = [8, 32], strides = [1, 1]} : vector<8x128xf32> to vector<8x32xf32>
    %347 = vector.extract_strided_slice %345 {offsets = [0, 32], sizes = [8, 32], strides = [1, 1]} : vector<8x128xf32> to vector<8x32xf32>
    %348 = vector.extract_strided_slice %345 {offsets = [0, 64], sizes = [8, 32], strides = [1, 1]} : vector<8x128xf32> to vector<8x32xf32>
    %349 = vector.extract_strided_slice %345 {offsets = [0, 96], sizes = [8, 32], strides = [1, 1]} : vector<8x128xf32> to vector<8x32xf32>
    %350 = arith.mulf %347, %272 : vector<8x32xf32>
    %351 = arith.mulf %346, %348 : vector<8x32xf32>
    %352 = arith.addf %350, %351 : vector<8x32xf32>
    %353 = math.tanh %352 : vector<8x32xf32>
    %354 = arith.mulf %349, %353 : vector<8x32xf32>
    %c0_92 = arith.constant 0 : index
    %c64 = arith.constant 64 : index
    %355 = vector.load %arg12[%c0_92, %c64] : memref<8x256xf32, #tpu.memory_space<vmem>>, vector<8x32xf32>
    tpu.vector_store %arg12[%c0_92, %c64], %354 {strides = array<i32>} : memref<8x256xf32, #tpu.memory_space<vmem>>, vector<8x32xf32>,
    %356 = vector.extract_strided_slice %26 {offsets = [40, 0], sizes = [8, 128], strides = [1, 1]} : vector<64x128xf32> to vector<8x128xf32>
    %cst_93 = arith.constant dense<0.000000e+00> : vector<8x128xf32>
    %357 = tpu.matmul %300, %13, %cst_93 {dimension_numbers = #tpu.dot_dimension_numbers<[1], [0], [0], [1], [0, 0, 1, 1], [], []>} : vector<8x32xf32>, vector<32x128xf32>, vector<8x128xf32> -> vector<8x128xf32>
    %358 = arith.addf %356, %357 : vector<8x128xf32>
    %359 = vector.broadcast %8 : vector<1x128xf32> to vector<8x128xf32>
    %360 = arith.mulf %358, %359 : vector<8x128xf32>
    %cst_94 = arith.constant 0.000000e+00 : f32
    %361 = vector.broadcast %cst_94 : f32 to vector<8x128xf32>
    %362 = arith.subf %361, %360 : vector<8x128xf32>
    %363 = math.exp %362 : vector<8x128xf32>
    %cst_95 = arith.constant 1.000000e+00 : f32
    %364 = vector.broadcast %cst_95 : f32 to vector<8x128xf32>
    %365 = arith.addf %364, %363 : vector<8x128xf32>
    %cst_96 = arith.constant 1.000000e+00 : f32
    %366 = vector.broadcast %cst_96 : f32 to vector<8x128xf32>
    %367 = arith.divf %366, %365 : vector<8x128xf32>
    %368 = vector.broadcast %8 : vector<1x128xf32> to vector<8x128xf32>
    %369 = arith.mulf %367, %368 : vector<8x128xf32>
    %370 = vector.broadcast %11 : vector<1x128xf32> to vector<8x128xf32>
    %371 = arith.addf %369, %370 : vector<8x128xf32>
    %372 = vector.extract_strided_slice %371 {offsets = [0, 0], sizes = [8, 32], strides = [1, 1]} : vector<8x128xf32> to vector<8x32xf32>
    %373 = vector.extract_strided_slice %371 {offsets = [0, 32], sizes = [8, 32], strides = [1, 1]} : vector<8x128xf32> to vector<8x32xf32>
    %374 = vector.extract_strided_slice %371 {offsets = [0, 64], sizes = [8, 32], strides = [1, 1]} : vector<8x128xf32> to vector<8x32xf32>
    %375 = vector.extract_strided_slice %371 {offsets = [0, 96], sizes = [8, 32], strides = [1, 1]} : vector<8x128xf32> to vector<8x32xf32>
    %376 = arith.mulf %373, %298 : vector<8x32xf32>
    %377 = arith.mulf %372, %374 : vector<8x32xf32>
    %378 = arith.addf %376, %377 : vector<8x32xf32>
    %379 = math.tanh %378 : vector<8x32xf32>
    %380 = arith.mulf %375, %379 : vector<8x32xf32>
    %cst_97 = arith.constant dense<0.000000e+00> : vector<8x128xf32>
    %381 = tpu.matmul %300, %27, %cst_97 {dimension_numbers = #tpu.dot_dimension_numbers<[1], [0], [0], [1], [0, 0, 1, 1], [], []>} : vector<8x32xf32>, vector<32x128xf32>, vector<8x128xf32> -> vector<8x128xf32>
    %cst_98 = arith.constant dense<0.000000e+00> : vector<8x128xf32>
    %382 = tpu.matmul %327, %29, %cst_98 {dimension_numbers = #tpu.dot_dimension_numbers<[1], [0], [0], [1], [0, 0, 1, 1], [], []>} : vector<8x32xf32>, vector<32x128xf32>, vector<8x128xf32> -> vector<8x128xf32>
    %383 = arith.addf %381, %382 : vector<8x128xf32>
    %384 = vector.broadcast %31 : vector<1x128xf32> to vector<8x128xf32>
    %385 = arith.addf %383, %384 : vector<8x128xf32>
    %386 = vector.broadcast %8 : vector<1x128xf32> to vector<8x128xf32>
    %387 = arith.mulf %385, %386 : vector<8x128xf32>
    %cst_99 = arith.constant 0.000000e+00 : f32
    %388 = vector.broadcast %cst_99 : f32 to vector<8x128xf32>
    %389 = arith.subf %388, %387 : vector<8x128xf32>
    %390 = math.exp %389 : vector<8x128xf32>
    %cst_100 = arith.constant 1.000000e+00 : f32
    %391 = vector.broadcast %cst_100 : f32 to vector<8x128xf32>
    %392 = arith.addf %391, %390 : vector<8x128xf32>
    %cst_101 = arith.constant 1.000000e+00 : f32
    %393 = vector.broadcast %cst_101 : f32 to vector<8x128xf32>
    %394 = arith.divf %393, %392 : vector<8x128xf32>
    %395 = vector.broadcast %8 : vector<1x128xf32> to vector<8x128xf32>
    %396 = arith.mulf %394, %395 : vector<8x128xf32>
    %397 = vector.broadcast %11 : vector<1x128xf32> to vector<8x128xf32>
    %398 = arith.addf %396, %397 : vector<8x128xf32>
    %399 = vector.extract_strided_slice %398 {offsets = [0, 0], sizes = [8, 32], strides = [1, 1]} : vector<8x128xf32> to vector<8x32xf32>
    %400 = vector.extract_strided_slice %398 {offsets = [0, 32], sizes = [8, 32], strides = [1, 1]} : vector<8x128xf32> to vector<8x32xf32>
    %401 = vector.extract_strided_slice %398 {offsets = [0, 64], sizes = [8, 32], strides = [1, 1]} : vector<8x128xf32> to vector<8x32xf32>
    %402 = vector.extract_strided_slice %398 {offsets = [0, 96], sizes = [8, 32], strides = [1, 1]} : vector<8x128xf32> to vector<8x32xf32>
    %403 = arith.mulf %400, %325 : vector<8x32xf32>
    %404 = arith.mulf %399, %401 : vector<8x32xf32>
    %405 = arith.addf %403, %404 : vector<8x32xf32>
    %406 = math.tanh %405 : vector<8x32xf32>
    %407 = arith.mulf %402, %406 : vector<8x32xf32>
    %cst_102 = arith.constant dense<0.000000e+00> : vector<8x128xf32>
    %408 = tpu.matmul %327, %28, %cst_102 {dimension_numbers = #tpu.dot_dimension_numbers<[1], [0], [0], [1], [0, 0, 1, 1], [], []>} : vector<8x32xf32>, vector<32x128xf32>, vector<8x128xf32> -> vector<8x128xf32>
    %cst_103 = arith.constant dense<0.000000e+00> : vector<8x128xf32>
    %409 = tpu.matmul %354, %30, %cst_103 {dimension_numbers = #tpu.dot_dimension_numbers<[1], [0], [0], [1], [0, 0, 1, 1], [], []>} : vector<8x32xf32>, vector<32x128xf32>, vector<8x128xf32> -> vector<8x128xf32>
    %410 = arith.addf %408, %409 : vector<8x128xf32>
    %411 = vector.broadcast %32 : vector<1x128xf32> to vector<8x128xf32>
    %412 = arith.addf %410, %411 : vector<8x128xf32>
    %413 = vector.broadcast %8 : vector<1x128xf32> to vector<8x128xf32>
    %414 = arith.mulf %412, %413 : vector<8x128xf32>
    %cst_104 = arith.constant 0.000000e+00 : f32
    %415 = vector.broadcast %cst_104 : f32 to vector<8x128xf32>
    %416 = arith.subf %415, %414 : vector<8x128xf32>
    %417 = math.exp %416 : vector<8x128xf32>
    %cst_105 = arith.constant 1.000000e+00 : f32
    %418 = vector.broadcast %cst_105 : f32 to vector<8x128xf32>
    %419 = arith.addf %418, %417 : vector<8x128xf32>
    %cst_106 = arith.constant 1.000000e+00 : f32
    %420 = vector.broadcast %cst_106 : f32 to vector<8x128xf32>
    %421 = arith.divf %420, %419 : vector<8x128xf32>
    %422 = vector.broadcast %8 : vector<1x128xf32> to vector<8x128xf32>
    %423 = arith.mulf %421, %422 : vector<8x128xf32>
    %424 = vector.broadcast %11 : vector<1x128xf32> to vector<8x128xf32>
    %425 = arith.addf %423, %424 : vector<8x128xf32>
    %426 = vector.extract_strided_slice %425 {offsets = [0, 0], sizes = [8, 32], strides = [1, 1]} : vector<8x128xf32> to vector<8x32xf32>
    %427 = vector.extract_strided_slice %425 {offsets = [0, 32], sizes = [8, 32], strides = [1, 1]} : vector<8x128xf32> to vector<8x32xf32>
    %428 = vector.extract_strided_slice %425 {offsets = [0, 64], sizes = [8, 32], strides = [1, 1]} : vector<8x128xf32> to vector<8x32xf32>
    %429 = vector.extract_strided_slice %425 {offsets = [0, 96], sizes = [8, 32], strides = [1, 1]} : vector<8x128xf32> to vector<8x32xf32>
    %430 = arith.mulf %427, %352 : vector<8x32xf32>
    %431 = arith.mulf %426, %428 : vector<8x32xf32>
    %432 = arith.addf %430, %431 : vector<8x32xf32>
    %433 = math.tanh %432 : vector<8x32xf32>
    %434 = arith.mulf %429, %433 : vector<8x32xf32>
    %c0_107 = arith.constant 0 : index
    %c96 = arith.constant 96 : index
    %435 = vector.load %arg12[%c0_107, %c96] : memref<8x256xf32, #tpu.memory_space<vmem>>, vector<8x32xf32>
    tpu.vector_store %arg12[%c0_107, %c96], %434 {strides = array<i32>} : memref<8x256xf32, #tpu.memory_space<vmem>>, vector<8x32xf32>,
    %436 = vector.extract_strided_slice %26 {offsets = [48, 0], sizes = [8, 128], strides = [1, 1]} : vector<64x128xf32> to vector<8x128xf32>
    %cst_108 = arith.constant dense<0.000000e+00> : vector<8x128xf32>
    %437 = tpu.matmul %380, %13, %cst_108 {dimension_numbers = #tpu.dot_dimension_numbers<[1], [0], [0], [1], [0, 0, 1, 1], [], []>} : vector<8x32xf32>, vector<32x128xf32>, vector<8x128xf32> -> vector<8x128xf32>
    %438 = arith.addf %436, %437 : vector<8x128xf32>
    %439 = vector.broadcast %8 : vector<1x128xf32> to vector<8x128xf32>
    %440 = arith.mulf %438, %439 : vector<8x128xf32>
    %cst_109 = arith.constant 0.000000e+00 : f32
    %441 = vector.broadcast %cst_109 : f32 to vector<8x128xf32>
    %442 = arith.subf %441, %440 : vector<8x128xf32>
    %443 = math.exp %442 : vector<8x128xf32>
    %cst_110 = arith.constant 1.000000e+00 : f32
    %444 = vector.broadcast %cst_110 : f32 to vector<8x128xf32>
    %445 = arith.addf %444, %443 : vector<8x128xf32>
    %cst_111 = arith.constant 1.000000e+00 : f32
    %446 = vector.broadcast %cst_111 : f32 to vector<8x128xf32>
    %447 = arith.divf %446, %445 : vector<8x128xf32>
    %448 = vector.broadcast %8 : vector<1x128xf32> to vector<8x128xf32>
    %449 = arith.mulf %447, %448 : vector<8x128xf32>
    %450 = vector.broadcast %11 : vector<1x128xf32> to vector<8x128xf32>
    %451 = arith.addf %449, %450 : vector<8x128xf32>
    %452 = vector.extract_strided_slice %451 {offsets = [0, 0], sizes = [8, 32], strides = [1, 1]} : vector<8x128xf32> to vector<8x32xf32>
    %453 = vector.extract_strided_slice %451 {offsets = [0, 32], sizes = [8, 32], strides = [1, 1]} : vector<8x128xf32> to vector<8x32xf32>
    %454 = vector.extract_strided_slice %451 {offsets = [0, 64], sizes = [8, 32], strides = [1, 1]} : vector<8x128xf32> to vector<8x32xf32>
    %455 = vector.extract_strided_slice %451 {offsets = [0, 96], sizes = [8, 32], strides = [1, 1]} : vector<8x128xf32> to vector<8x32xf32>
    %456 = arith.mulf %453, %378 : vector<8x32xf32>
    %457 = arith.mulf %452, %454 : vector<8x32xf32>
    %458 = arith.addf %456, %457 : vector<8x32xf32>
    %459 = math.tanh %458 : vector<8x32xf32>
    %460 = arith.mulf %455, %459 : vector<8x32xf32>
    %cst_112 = arith.constant dense<0.000000e+00> : vector<8x128xf32>
    %461 = tpu.matmul %380, %27, %cst_112 {dimension_numbers = #tpu.dot_dimension_numbers<[1], [0], [0], [1], [0, 0, 1, 1], [], []>} : vector<8x32xf32>, vector<32x128xf32>, vector<8x128xf32> -> vector<8x128xf32>
    %cst_113 = arith.constant dense<0.000000e+00> : vector<8x128xf32>
    %462 = tpu.matmul %407, %29, %cst_113 {dimension_numbers = #tpu.dot_dimension_numbers<[1], [0], [0], [1], [0, 0, 1, 1], [], []>} : vector<8x32xf32>, vector<32x128xf32>, vector<8x128xf32> -> vector<8x128xf32>
    %463 = arith.addf %461, %462 : vector<8x128xf32>
    %464 = vector.broadcast %31 : vector<1x128xf32> to vector<8x128xf32>
    %465 = arith.addf %463, %464 : vector<8x128xf32>
    %466 = vector.broadcast %8 : vector<1x128xf32> to vector<8x128xf32>
    %467 = arith.mulf %465, %466 : vector<8x128xf32>
    %cst_114 = arith.constant 0.000000e+00 : f32
    %468 = vector.broadcast %cst_114 : f32 to vector<8x128xf32>
    %469 = arith.subf %468, %467 : vector<8x128xf32>
    %470 = math.exp %469 : vector<8x128xf32>
    %cst_115 = arith.constant 1.000000e+00 : f32
    %471 = vector.broadcast %cst_115 : f32 to vector<8x128xf32>
    %472 = arith.addf %471, %470 : vector<8x128xf32>
    %cst_116 = arith.constant 1.000000e+00 : f32
    %473 = vector.broadcast %cst_116 : f32 to vector<8x128xf32>
    %474 = arith.divf %473, %472 : vector<8x128xf32>
    %475 = vector.broadcast %8 : vector<1x128xf32> to vector<8x128xf32>
    %476 = arith.mulf %474, %475 : vector<8x128xf32>
    %477 = vector.broadcast %11 : vector<1x128xf32> to vector<8x128xf32>
    %478 = arith.addf %476, %477 : vector<8x128xf32>
    %479 = vector.extract_strided_slice %478 {offsets = [0, 0], sizes = [8, 32], strides = [1, 1]} : vector<8x128xf32> to vector<8x32xf32>
    %480 = vector.extract_strided_slice %478 {offsets = [0, 32], sizes = [8, 32], strides = [1, 1]} : vector<8x128xf32> to vector<8x32xf32>
    %481 = vector.extract_strided_slice %478 {offsets = [0, 64], sizes = [8, 32], strides = [1, 1]} : vector<8x128xf32> to vector<8x32xf32>
    %482 = vector.extract_strided_slice %478 {offsets = [0, 96], sizes = [8, 32], strides = [1, 1]} : vector<8x128xf32> to vector<8x32xf32>
    %483 = arith.mulf %480, %405 : vector<8x32xf32>
    %484 = arith.mulf %479, %481 : vector<8x32xf32>
    %485 = arith.addf %483, %484 : vector<8x32xf32>
    %486 = math.tanh %485 : vector<8x32xf32>
    %487 = arith.mulf %482, %486 : vector<8x32xf32>
    %cst_117 = arith.constant dense<0.000000e+00> : vector<8x128xf32>
    %488 = tpu.matmul %407, %28, %cst_117 {dimension_numbers = #tpu.dot_dimension_numbers<[1], [0], [0], [1], [0, 0, 1, 1], [], []>} : vector<8x32xf32>, vector<32x128xf32>, vector<8x128xf32> -> vector<8x128xf32>
    %cst_118 = arith.constant dense<0.000000e+00> : vector<8x128xf32>
    %489 = tpu.matmul %434, %30, %cst_118 {dimension_numbers = #tpu.dot_dimension_numbers<[1], [0], [0], [1], [0, 0, 1, 1], [], []>} : vector<8x32xf32>, vector<32x128xf32>, vector<8x128xf32> -> vector<8x128xf32>
    %490 = arith.addf %488, %489 : vector<8x128xf32>
    %491 = vector.broadcast %32 : vector<1x128xf32> to vector<8x128xf32>
    %492 = arith.addf %490, %491 : vector<8x128xf32>
    %493 = vector.broadcast %8 : vector<1x128xf32> to vector<8x128xf32>
    %494 = arith.mulf %492, %493 : vector<8x128xf32>
    %cst_119 = arith.constant 0.000000e+00 : f32
    %495 = vector.broadcast %cst_119 : f32 to vector<8x128xf32>
    %496 = arith.subf %495, %494 : vector<8x128xf32>
    %497 = math.exp %496 : vector<8x128xf32>
    %cst_120 = arith.constant 1.000000e+00 : f32
    %498 = vector.broadcast %cst_120 : f32 to vector<8x128xf32>
    %499 = arith.addf %498, %497 : vector<8x128xf32>
    %cst_121 = arith.constant 1.000000e+00 : f32
    %500 = vector.broadcast %cst_121 : f32 to vector<8x128xf32>
    %501 = arith.divf %500, %499 : vector<8x128xf32>
    %502 = vector.broadcast %8 : vector<1x128xf32> to vector<8x128xf32>
    %503 = arith.mulf %501, %502 : vector<8x128xf32>
    %504 = vector.broadcast %11 : vector<1x128xf32> to vector<8x128xf32>
    %505 = arith.addf %503, %504 : vector<8x128xf32>
    %506 = vector.extract_strided_slice %505 {offsets = [0, 0], sizes = [8, 32], strides = [1, 1]} : vector<8x128xf32> to vector<8x32xf32>
    %507 = vector.extract_strided_slice %505 {offsets = [0, 32], sizes = [8, 32], strides = [1, 1]} : vector<8x128xf32> to vector<8x32xf32>
    %508 = vector.extract_strided_slice %505 {offsets = [0, 64], sizes = [8, 32], strides = [1, 1]} : vector<8x128xf32> to vector<8x32xf32>
    %509 = vector.extract_strided_slice %505 {offsets = [0, 96], sizes = [8, 32], strides = [1, 1]} : vector<8x128xf32> to vector<8x32xf32>
    %510 = arith.mulf %507, %432 : vector<8x32xf32>
    %511 = arith.mulf %506, %508 : vector<8x32xf32>
    %512 = arith.addf %510, %511 : vector<8x32xf32>
    %513 = math.tanh %512 : vector<8x32xf32>
    %514 = arith.mulf %509, %513 : vector<8x32xf32>
    %c0_122 = arith.constant 0 : index
    %c128 = arith.constant 128 : index
    %515 = vector.load %arg12[%c0_122, %c128] : memref<8x256xf32, #tpu.memory_space<vmem>>, vector<8x32xf32>
    tpu.vector_store %arg12[%c0_122, %c128], %514 {strides = array<i32>} : memref<8x256xf32, #tpu.memory_space<vmem>>, vector<8x32xf32>,
    %516 = vector.extract_strided_slice %26 {offsets = [56, 0], sizes = [8, 128], strides = [1, 1]} : vector<64x128xf32> to vector<8x128xf32>
    %cst_123 = arith.constant dense<0.000000e+00> : vector<8x128xf32>
    %517 = tpu.matmul %460, %13, %cst_123 {dimension_numbers = #tpu.dot_dimension_numbers<[1], [0], [0], [1], [0, 0, 1, 1], [], []>} : vector<8x32xf32>, vector<32x128xf32>, vector<8x128xf32> -> vector<8x128xf32>
    %518 = arith.addf %516, %517 : vector<8x128xf32>
    %519 = vector.broadcast %8 : vector<1x128xf32> to vector<8x128xf32>
    %520 = arith.mulf %518, %519 : vector<8x128xf32>
    %cst_124 = arith.constant 0.000000e+00 : f32
    %521 = vector.broadcast %cst_124 : f32 to vector<8x128xf32>
    %522 = arith.subf %521, %520 : vector<8x128xf32>
    %523 = math.exp %522 : vector<8x128xf32>
    %cst_125 = arith.constant 1.000000e+00 : f32
    %524 = vector.broadcast %cst_125 : f32 to vector<8x128xf32>
    %525 = arith.addf %524, %523 : vector<8x128xf32>
    %cst_126 = arith.constant 1.000000e+00 : f32
    %526 = vector.broadcast %cst_126 : f32 to vector<8x128xf32>
    %527 = arith.divf %526, %525 : vector<8x128xf32>
    %528 = vector.broadcast %8 : vector<1x128xf32> to vector<8x128xf32>
    %529 = arith.mulf %527, %528 : vector<8x128xf32>
    %530 = vector.broadcast %11 : vector<1x128xf32> to vector<8x128xf32>
    %531 = arith.addf %529, %530 : vector<8x128xf32>
    %532 = vector.extract_strided_slice %531 {offsets = [0, 0], sizes = [8, 32], strides = [1, 1]} : vector<8x128xf32> to vector<8x32xf32>
    %533 = vector.extract_strided_slice %531 {offsets = [0, 32], sizes = [8, 32], strides = [1, 1]} : vector<8x128xf32> to vector<8x32xf32>
    %534 = vector.extract_strided_slice %531 {offsets = [0, 64], sizes = [8, 32], strides = [1, 1]} : vector<8x128xf32> to vector<8x32xf32>
    %535 = vector.extract_strided_slice %531 {offsets = [0, 96], sizes = [8, 32], strides = [1, 1]} : vector<8x128xf32> to vector<8x32xf32>
    %536 = arith.mulf %533, %458 : vector<8x32xf32>
    %537 = arith.mulf %532, %534 : vector<8x32xf32>
    %538 = arith.addf %536, %537 : vector<8x32xf32>
    %539 = math.tanh %538 : vector<8x32xf32>
    %540 = arith.mulf %535, %539 : vector<8x32xf32>
    %cst_127 = arith.constant dense<0.000000e+00> : vector<8x128xf32>
    %541 = tpu.matmul %460, %27, %cst_127 {dimension_numbers = #tpu.dot_dimension_numbers<[1], [0], [0], [1], [0, 0, 1, 1], [], []>} : vector<8x32xf32>, vector<32x128xf32>, vector<8x128xf32> -> vector<8x128xf32>
    %cst_128 = arith.constant dense<0.000000e+00> : vector<8x128xf32>
    %542 = tpu.matmul %487, %29, %cst_128 {dimension_numbers = #tpu.dot_dimension_numbers<[1], [0], [0], [1], [0, 0, 1, 1], [], []>} : vector<8x32xf32>, vector<32x128xf32>, vector<8x128xf32> -> vector<8x128xf32>
    %543 = arith.addf %541, %542 : vector<8x128xf32>
    %544 = vector.broadcast %31 : vector<1x128xf32> to vector<8x128xf32>
    %545 = arith.addf %543, %544 : vector<8x128xf32>
    %546 = vector.broadcast %8 : vector<1x128xf32> to vector<8x128xf32>
    %547 = arith.mulf %545, %546 : vector<8x128xf32>
    %cst_129 = arith.constant 0.000000e+00 : f32
    %548 = vector.broadcast %cst_129 : f32 to vector<8x128xf32>
    %549 = arith.subf %548, %547 : vector<8x128xf32>
    %550 = math.exp %549 : vector<8x128xf32>
    %cst_130 = arith.constant 1.000000e+00 : f32
    %551 = vector.broadcast %cst_130 : f32 to vector<8x128xf32>
    %552 = arith.addf %551, %550 : vector<8x128xf32>
    %cst_131 = arith.constant 1.000000e+00 : f32
    %553 = vector.broadcast %cst_131 : f32 to vector<8x128xf32>
    %554 = arith.divf %553, %552 : vector<8x128xf32>
    %555 = vector.broadcast %8 : vector<1x128xf32> to vector<8x128xf32>
    %556 = arith.mulf %554, %555 : vector<8x128xf32>
    %557 = vector.broadcast %11 : vector<1x128xf32> to vector<8x128xf32>
    %558 = arith.addf %556, %557 : vector<8x128xf32>
    %559 = vector.extract_strided_slice %558 {offsets = [0, 0], sizes = [8, 32], strides = [1, 1]} : vector<8x128xf32> to vector<8x32xf32>
    %560 = vector.extract_strided_slice %558 {offsets = [0, 32], sizes = [8, 32], strides = [1, 1]} : vector<8x128xf32> to vector<8x32xf32>
    %561 = vector.extract_strided_slice %558 {offsets = [0, 64], sizes = [8, 32], strides = [1, 1]} : vector<8x128xf32> to vector<8x32xf32>
    %562 = vector.extract_strided_slice %558 {offsets = [0, 96], sizes = [8, 32], strides = [1, 1]} : vector<8x128xf32> to vector<8x32xf32>
    %563 = arith.mulf %560, %485 : vector<8x32xf32>
    %564 = arith.mulf %559, %561 : vector<8x32xf32>
    %565 = arith.addf %563, %564 : vector<8x32xf32>
    %566 = math.tanh %565 : vector<8x32xf32>
    %567 = arith.mulf %562, %566 : vector<8x32xf32>
    %cst_132 = arith.constant dense<0.000000e+00> : vector<8x128xf32>
    %568 = tpu.matmul %487, %28, %cst_132 {dimension_numbers = #tpu.dot_dimension_numbers<[1], [0], [0], [1], [0, 0, 1, 1], [], []>} : vector<8x32xf32>, vector<32x128xf32>, vector<8x128xf32> -> vector<8x128xf32>
    %cst_133 = arith.constant dense<0.000000e+00> : vector<8x128xf32>
    %569 = tpu.matmul %514, %30, %cst_133 {dimension_numbers = #tpu.dot_dimension_numbers<[1], [0], [0], [1], [0, 0, 1, 1], [], []>} : vector<8x32xf32>, vector<32x128xf32>, vector<8x128xf32> -> vector<8x128xf32>
    %570 = arith.addf %568, %569 : vector<8x128xf32>
    %571 = vector.broadcast %32 : vector<1x128xf32> to vector<8x128xf32>
    %572 = arith.addf %570, %571 : vector<8x128xf32>
    %573 = vector.broadcast %8 : vector<1x128xf32> to vector<8x128xf32>
    %574 = arith.mulf %572, %573 : vector<8x128xf32>
    %cst_134 = arith.constant 0.000000e+00 : f32
    %575 = vector.broadcast %cst_134 : f32 to vector<8x128xf32>
    %576 = arith.subf %575, %574 : vector<8x128xf32>
    %577 = math.exp %576 : vector<8x128xf32>
    %cst_135 = arith.constant 1.000000e+00 : f32
    %578 = vector.broadcast %cst_135 : f32 to vector<8x128xf32>
    %579 = arith.addf %578, %577 : vector<8x128xf32>
    %cst_136 = arith.constant 1.000000e+00 : f32
    %580 = vector.broadcast %cst_136 : f32 to vector<8x128xf32>
    %581 = arith.divf %580, %579 : vector<8x128xf32>
    %582 = vector.broadcast %8 : vector<1x128xf32> to vector<8x128xf32>
    %583 = arith.mulf %581, %582 : vector<8x128xf32>
    %584 = vector.broadcast %11 : vector<1x128xf32> to vector<8x128xf32>
    %585 = arith.addf %583, %584 : vector<8x128xf32>
    %586 = vector.extract_strided_slice %585 {offsets = [0, 0], sizes = [8, 32], strides = [1, 1]} : vector<8x128xf32> to vector<8x32xf32>
    %587 = vector.extract_strided_slice %585 {offsets = [0, 32], sizes = [8, 32], strides = [1, 1]} : vector<8x128xf32> to vector<8x32xf32>
    %588 = vector.extract_strided_slice %585 {offsets = [0, 64], sizes = [8, 32], strides = [1, 1]} : vector<8x128xf32> to vector<8x32xf32>
    %589 = vector.extract_strided_slice %585 {offsets = [0, 96], sizes = [8, 32], strides = [1, 1]} : vector<8x128xf32> to vector<8x32xf32>
    %590 = arith.mulf %587, %512 : vector<8x32xf32>
    %591 = arith.mulf %586, %588 : vector<8x32xf32>
    %592 = arith.addf %590, %591 : vector<8x32xf32>
    %593 = math.tanh %592 : vector<8x32xf32>
    %594 = arith.mulf %589, %593 : vector<8x32xf32>
    %c0_137 = arith.constant 0 : index
    %c160 = arith.constant 160 : index
    %595 = vector.load %arg12[%c0_137, %c160] : memref<8x256xf32, #tpu.memory_space<vmem>>, vector<8x32xf32>
    tpu.vector_store %arg12[%c0_137, %c160], %594 {strides = array<i32>} : memref<8x256xf32, #tpu.memory_space<vmem>>, vector<8x32xf32>,
    %cst_138 = arith.constant dense<0.000000e+00> : vector<8x128xf32>
    %596 = tpu.matmul %540, %27, %cst_138 {dimension_numbers = #tpu.dot_dimension_numbers<[1], [0], [0], [1], [0, 0, 1, 1], [], []>} : vector<8x32xf32>, vector<32x128xf32>, vector<8x128xf32> -> vector<8x128xf32>
    %cst_139 = arith.constant dense<0.000000e+00> : vector<8x128xf32>
    %597 = tpu.matmul %567, %29, %cst_139 {dimension_numbers = #tpu.dot_dimension_numbers<[1], [0], [0], [1], [0, 0, 1, 1], [], []>} : vector<8x32xf32>, vector<32x128xf32>, vector<8x128xf32> -> vector<8x128xf32>
    %598 = arith.addf %596, %597 : vector<8x128xf32>
    %599 = vector.broadcast %31 : vector<1x128xf32> to vector<8x128xf32>
    %600 = arith.addf %598, %599 : vector<8x128xf32>
    %601 = vector.broadcast %8 : vector<1x128xf32> to vector<8x128xf32>
    %602 = arith.mulf %600, %601 : vector<8x128xf32>
    %cst_140 = arith.constant 0.000000e+00 : f32
    %603 = vector.broadcast %cst_140 : f32 to vector<8x128xf32>
    %604 = arith.subf %603, %602 : vector<8x128xf32>
    %605 = math.exp %604 : vector<8x128xf32>
    %cst_141 = arith.constant 1.000000e+00 : f32
    %606 = vector.broadcast %cst_141 : f32 to vector<8x128xf32>
    %607 = arith.addf %606, %605 : vector<8x128xf32>
    %cst_142 = arith.constant 1.000000e+00 : f32
    %608 = vector.broadcast %cst_142 : f32 to vector<8x128xf32>
    %609 = arith.divf %608, %607 : vector<8x128xf32>
    %610 = vector.broadcast %8 : vector<1x128xf32> to vector<8x128xf32>
    %611 = arith.mulf %609, %610 : vector<8x128xf32>
    %612 = vector.broadcast %11 : vector<1x128xf32> to vector<8x128xf32>
    %613 = arith.addf %611, %612 : vector<8x128xf32>
    %614 = vector.extract_strided_slice %613 {offsets = [0, 0], sizes = [8, 32], strides = [1, 1]} : vector<8x128xf32> to vector<8x32xf32>
    %615 = vector.extract_strided_slice %613 {offsets = [0, 32], sizes = [8, 32], strides = [1, 1]} : vector<8x128xf32> to vector<8x32xf32>
    %616 = vector.extract_strided_slice %613 {offsets = [0, 64], sizes = [8, 32], strides = [1, 1]} : vector<8x128xf32> to vector<8x32xf32>
    %617 = vector.extract_strided_slice %613 {offsets = [0, 96], sizes = [8, 32], strides = [1, 1]} : vector<8x128xf32> to vector<8x32xf32>
    %618 = arith.mulf %615, %565 : vector<8x32xf32>
    %619 = arith.mulf %614, %616 : vector<8x32xf32>
    %620 = arith.addf %618, %619 : vector<8x32xf32>
    %621 = math.tanh %620 : vector<8x32xf32>
    %622 = arith.mulf %617, %621 : vector<8x32xf32>
    %cst_143 = arith.constant dense<0.000000e+00> : vector<8x128xf32>
    %623 = tpu.matmul %567, %28, %cst_143 {dimension_numbers = #tpu.dot_dimension_numbers<[1], [0], [0], [1], [0, 0, 1, 1], [], []>} : vector<8x32xf32>, vector<32x128xf32>, vector<8x128xf32> -> vector<8x128xf32>
    %cst_144 = arith.constant dense<0.000000e+00> : vector<8x128xf32>
    %624 = tpu.matmul %594, %30, %cst_144 {dimension_numbers = #tpu.dot_dimension_numbers<[1], [0], [0], [1], [0, 0, 1, 1], [], []>} : vector<8x32xf32>, vector<32x128xf32>, vector<8x128xf32> -> vector<8x128xf32>
    %625 = arith.addf %623, %624 : vector<8x128xf32>
    %626 = vector.broadcast %32 : vector<1x128xf32> to vector<8x128xf32>
    %627 = arith.addf %625, %626 : vector<8x128xf32>
    %628 = vector.broadcast %8 : vector<1x128xf32> to vector<8x128xf32>
    %629 = arith.mulf %627, %628 : vector<8x128xf32>
    %cst_145 = arith.constant 0.000000e+00 : f32
    %630 = vector.broadcast %cst_145 : f32 to vector<8x128xf32>
    %631 = arith.subf %630, %629 : vector<8x128xf32>
    %632 = math.exp %631 : vector<8x128xf32>
    %cst_146 = arith.constant 1.000000e+00 : f32
    %633 = vector.broadcast %cst_146 : f32 to vector<8x128xf32>
    %634 = arith.addf %633, %632 : vector<8x128xf32>
    %cst_147 = arith.constant 1.000000e+00 : f32
    %635 = vector.broadcast %cst_147 : f32 to vector<8x128xf32>
    %636 = arith.divf %635, %634 : vector<8x128xf32>
    %637 = vector.broadcast %8 : vector<1x128xf32> to vector<8x128xf32>
    %638 = arith.mulf %636, %637 : vector<8x128xf32>
    %639 = vector.broadcast %11 : vector<1x128xf32> to vector<8x128xf32>
    %640 = arith.addf %638, %639 : vector<8x128xf32>
    %641 = vector.extract_strided_slice %640 {offsets = [0, 0], sizes = [8, 32], strides = [1, 1]} : vector<8x128xf32> to vector<8x32xf32>
    %642 = vector.extract_strided_slice %640 {offsets = [0, 32], sizes = [8, 32], strides = [1, 1]} : vector<8x128xf32> to vector<8x32xf32>
    %643 = vector.extract_strided_slice %640 {offsets = [0, 64], sizes = [8, 32], strides = [1, 1]} : vector<8x128xf32> to vector<8x32xf32>
    %644 = vector.extract_strided_slice %640 {offsets = [0, 96], sizes = [8, 32], strides = [1, 1]} : vector<8x128xf32> to vector<8x32xf32>
    %645 = arith.mulf %642, %592 : vector<8x32xf32>
    %646 = arith.mulf %641, %643 : vector<8x32xf32>
    %647 = arith.addf %645, %646 : vector<8x32xf32>
    %648 = math.tanh %647 : vector<8x32xf32>
    %649 = arith.mulf %644, %648 : vector<8x32xf32>
    %c0_148 = arith.constant 0 : index
    %c192 = arith.constant 192 : index
    %650 = vector.load %arg12[%c0_148, %c192] : memref<8x256xf32, #tpu.memory_space<vmem>>, vector<8x32xf32>
    tpu.vector_store %arg12[%c0_148, %c192], %649 {strides = array<i32>} : memref<8x256xf32, #tpu.memory_space<vmem>>, vector<8x32xf32>,
    %cst_149 = arith.constant dense<0.000000e+00> : vector<8x128xf32>
    %651 = tpu.matmul %622, %28, %cst_149 {dimension_numbers = #tpu.dot_dimension_numbers<[1], [0], [0], [1], [0, 0, 1, 1], [], []>} : vector<8x32xf32>, vector<32x128xf32>, vector<8x128xf32> -> vector<8x128xf32>
    %cst_150 = arith.constant dense<0.000000e+00> : vector<8x128xf32>
    %652 = tpu.matmul %649, %30, %cst_150 {dimension_numbers = #tpu.dot_dimension_numbers<[1], [0], [0], [1], [0, 0, 1, 1], [], []>} : vector<8x32xf32>, vector<32x128xf32>, vector<8x128xf32> -> vector<8x128xf32>
    %653 = arith.addf %651, %652 : vector<8x128xf32>
    %654 = vector.broadcast %32 : vector<1x128xf32> to vector<8x128xf32>
    %655 = arith.addf %653, %654 : vector<8x128xf32>
    %656 = vector.broadcast %8 : vector<1x128xf32> to vector<8x128xf32>
    %657 = arith.mulf %655, %656 : vector<8x128xf32>
    %cst_151 = arith.constant 0.000000e+00 : f32
    %658 = vector.broadcast %cst_151 : f32 to vector<8x128xf32>
    %659 = arith.subf %658, %657 : vector<8x128xf32>
    %660 = math.exp %659 : vector<8x128xf32>
    %cst_152 = arith.constant 1.000000e+00 : f32
    %661 = vector.broadcast %cst_152 : f32 to vector<8x128xf32>
    %662 = arith.addf %661, %660 : vector<8x128xf32>
    %cst_153 = arith.constant 1.000000e+00 : f32
    %663 = vector.broadcast %cst_153 : f32 to vector<8x128xf32>
    %664 = arith.divf %663, %662 : vector<8x128xf32>
    %665 = vector.broadcast %8 : vector<1x128xf32> to vector<8x128xf32>
    %666 = arith.mulf %664, %665 : vector<8x128xf32>
    %667 = vector.broadcast %11 : vector<1x128xf32> to vector<8x128xf32>
    %668 = arith.addf %666, %667 : vector<8x128xf32>
    %669 = vector.extract_strided_slice %668 {offsets = [0, 0], sizes = [8, 32], strides = [1, 1]} : vector<8x128xf32> to vector<8x32xf32>
    %670 = vector.extract_strided_slice %668 {offsets = [0, 32], sizes = [8, 32], strides = [1, 1]} : vector<8x128xf32> to vector<8x32xf32>
    %671 = vector.extract_strided_slice %668 {offsets = [0, 64], sizes = [8, 32], strides = [1, 1]} : vector<8x128xf32> to vector<8x32xf32>
    %672 = vector.extract_strided_slice %668 {offsets = [0, 96], sizes = [8, 32], strides = [1, 1]} : vector<8x128xf32> to vector<8x32xf32>
    %673 = arith.mulf %670, %647 : vector<8x32xf32>
    %674 = arith.mulf %669, %671 : vector<8x32xf32>
    %675 = arith.addf %673, %674 : vector<8x32xf32>
    %676 = math.tanh %675 : vector<8x32xf32>
    %677 = arith.mulf %672, %676 : vector<8x32xf32>
    %c0_154 = arith.constant 0 : index
    %c224 = arith.constant 224 : index
    %678 = vector.load %arg12[%c0_154, %c224] : memref<8x256xf32, #tpu.memory_space<vmem>>, vector<8x32xf32>
    tpu.vector_store %arg12[%c0_154, %c224], %677 {strides = array<i32>} : memref<8x256xf32, #tpu.memory_space<vmem>>, vector<8x32xf32>,
    return
  }
  func.func @transform_0(%arg0: i32) -> (i32, i32) {
    %c0_i32 = arith.constant 0 : i32
    %c0_i32_0 = arith.constant 0 : i32
    %c0_i32_1 = arith.constant 0 : i32
    return %c0_i32, %c0_i32_0 : i32, i32
  }
  func.func @transform_1(%arg0: i32) -> (i32, i32) {
    %c0_i32 = arith.constant 0 : i32
    %c0_i32_0 = arith.constant 0 : i32
    %c0_i32_1 = arith.constant 0 : i32
    return %c0_i32, %c0_i32_0 : i32, i32
  }
  func.func @transform_2(%arg0: i32) -> (i32, i32) {
    %c0_i32 = arith.constant 0 : i32
    %c0_i32_0 = arith.constant 0 : i32
    %c0_i32_1 = arith.constant 0 : i32
    return %c0_i32, %c0_i32_0 : i32, i32
  }
  func.func @transform_3(%arg0: i32) -> (i32, i32) {
    %c0_i32 = arith.constant 0 : i32
    %c0_i32_0 = arith.constant 0 : i32
    %c0_i32_1 = arith.constant 0 : i32
    return %c0_i32, %c0_i32_0 : i32, i32
  }
  func.func @transform_4(%arg0: i32) -> (i32, i32) {
    %c0_i32 = arith.constant 0 : i32
    %c0_i32_0 = arith.constant 0 : i32
    %c0_i32_1 = arith.constant 0 : i32
    return %c0_i32, %c0_i32_0 : i32, i32
  }
  func.func @transform_5(%arg0: i32) -> (i32, i32) {
    %c0_i32 = arith.constant 0 : i32
    %c0_i32_0 = arith.constant 0 : i32
    %c0_i32_1 = arith.constant 0 : i32
    return %c0_i32, %c0_i32_0 : i32, i32
  }
  func.func @transform_6(%arg0: i32) -> (i32, i32) {
    %c0_i32 = arith.constant 0 : i32
    %c0_i32_0 = arith.constant 0 : i32
    %c0_i32_1 = arith.constant 0 : i32
    return %c0_i32, %c0_i32_0 : i32, i32
  }
  func.func @transform_7(%arg0: i32) -> (i32, i32) {
    %c0_i32 = arith.constant 0 : i32
    %c0_i32_0 = arith.constant 0 : i32
    %c0_i32_1 = arith.constant 0 : i32
    return %c0_i32, %c0_i32_0 : i32, i32
  }
  func.func @transform_8(%arg0: i32) -> (i32, i32) {
    %c0_i32 = arith.constant 0 : i32
    %c0_i32_0 = arith.constant 0 : i32
    %c0_i32_1 = arith.constant 0 : i32
    return %c0_i32, %c0_i32_0 : i32, i32
  }
  func.func @transform_9(%arg0: i32) -> (i32, i32) {
    %c0_i32 = arith.constant 0 : i32
    %c0_i32_0 = arith.constant 0 : i32
    %c0_i32_1 = arith.constant 0 : i32
    return %c0_i32, %c0_i32_0 : i32, i32
  }
  func.func @transform_10(%arg0: i32) -> (i32, i32) {
    %c0_i32 = arith.constant 0 : i32
    %c0_i32_0 = arith.constant 0 : i32
    %c0_i32_1 = arith.constant 0 : i32
    return %c0_i32, %c0_i32_0 : i32, i32
  }
  func.func @transform_11(%arg0: i32) -> (i32, i32) {
    %c0_i32 = arith.constant 0 : i32
    %c0_i32_0 = arith.constant 0 : i32
    %c0_i32_1 = arith.constant 0 : i32
    return %c0_i32, %c0_i32_0 : i32, i32
  }
}

</mosaic_0001>

<bundles_post_ra>
// kernel: encoder_forward.1
= control target key start
LH: loop header
LB: loop body
LE: loop exit
PB: predicated region body
PF: predicated region fallthrough
CT: control target
= control target key end

     0   :  { %vm118_vm0 = vcmask 261120   ;;  %v5309_v3 = vmov 0   ;;  %v5310_v25 = vmov 0.0|0.0   ;;  %v38_v32 = vlaneseq  ;;  %s5314_s29 = smov 64   ;;  %s5315_s30 = smov 32   ;;  %s6229_s2 = inlined_call_operand.vmem [shape: f32[32,128], index: 2, kind: input, shape index: {}]   ;;  %s6230_s1 = inlined_call_operand.vmem [shape: f32[128,32], index: 1, kind: input, shape index: {}]   ;;  %s6231_s0 = inlined_call_operand.vmem [shape: s32[64,1], index: 0, kind: input, shape index: {}]   ;;  %s6232_s3 = inlined_call_operand.vmem [shape: f32[32,128], index: 3, kind: input, shape index: {}]   ;;  %s6233_s4 = inlined_call_operand.vmem [shape: f32[1,128], index: 4, kind: input, shape index: {}]   ;;  %s6234_s6 = inlined_call_operand.vmem [shape: f32[32,128], index: 6, kind: input, shape index: {}]   ;;  %s6235_s5 = inlined_call_operand.vmem [shape: f32[32,128], index: 5, kind: input, shape index: {}]   ;;  %s6236_s7 = inlined_call_operand.vmem [shape: f32[1,128], index: 7, kind: input, shape index: {}]   ;;  %s6237_s8 = inlined_call_operand.vmem [shape: f32[32,128], index: 8, kind: input, shape index: {}]   ;;  %s6238_s9 = inlined_call_operand.vmem [shape: f32[32,128], index: 9, kind: input, shape index: {}]   ;;  %s6239_s10 = inlined_call_operand.vmem [shape: f32[1,128], index: 10, kind: input, shape index: {}]   ;;  %s6240_s11 = inlined_call_operand.vmem [shape: f32[8,256], index: 11, kind: output, shape index: {}]  }
   0x1   :  { %v45_v0 = vld [vmem:[%s6229_s2] sm:$0xff]  ;;  %v46_v1 = vld [vmem:[%s6229_s2 + $0x8] sm:$0xff]  ;;  %v47_v2 = vld [vmem:[%s6229_s2 + $0x10] sm:$0xff]  ;;  %5160 = vset.pattern.permute.xlu0 %v5309_v3  ;;  %5161 = vset.pattern.permute.xlu1 %v5309_v3  ;;  %vm5311_vm1 = vmmov 0   ;;  %v5312_v34 = vmov 0.0   ;;  %v5313_v36 = vmov 1.0  }
   0x2   :  { %v4872_v4 = vpack.c.bf16 %v46_v1, %v45_v0  ;;  %v48_v5 = vld [vmem:[%s6229_s2 + $0x18] sm:$0xff]  ;;  %v102_v6 = vld [vmem:[%s6230_s1] sm:$0xff]  ;;  %v103_v9 = vld [vmem:[%s6230_s1 + $0x8] sm:$0xff]  ;;  %v5480_v33 = vand.u32 127, %v38_v32  ;;  %vm1715_vm13 = vcmask 523520   ;;  %s5316_s20 = smov 96  }
   0x3   :  { %v4876_v7 = vpack.c.bf16 %v48_v5, %v47_v2  ;;  %4364 = vmatprep.mubr.msk.f32.mxu0 %vm118_vm0, %v102_v6  ;;  %v54_v8 = vld [vmem:[%s6231_s0] sm:$0xff]  ;;  %v55_v10 = vld [vmem:[%s6231_s0 + $0x8] sm:$0xff]  ;;  %v104_v11 = vld [vmem:[%s6230_s1 + $0x10] sm:$0xff]  ;;  %vm2166_vm14 = vcmask 785920   ;;  %vm2613_vm15 = vcmask 1048320  }
   0x4   :  { %4873 = vmatprep.subr.bf16.mxu0 %v4872_v4  ;;  %63 = vperm.xlu0 %5160, %v54_v8   ;;  %v105_v12 = vld [vmem:[%s6230_s1 + $0x18] sm:$0xff]  ;;  %v106_v13 = vld [vmem:[%s6230_s1 + $0x20] sm:$0xff]  ;;  %v107_v14 = vld [vmem:[%s6230_s1 + $0x28] sm:$0xff]  ;;  %vm40_vm4 = vcmp.ge.s32.totalorder %v5480_v33, 64  ;;  %vm41_vm5 = vcmp.lt.s32.totalorder %v5480_v33, 96 }
   0x5   :  { %4875 = vmatpush3.bf16.msra.mxu0 %v4872_v4  ;;  %v108_v15 = vld [vmem:[%s6230_s1 + $0x30] sm:$0xff]  ;;  %v109_v16 = vld [vmem:[%s6230_s1 + $0x38] sm:$0xff]  ;;  %v110_v17 = vld [vmem:[%s6230_s1 + $0x40] sm:$0xff] }
   0x6   :  { %4877 = vmatprep.subr.bf16.mxu0 %v4876_v7  ;;  %v111_v18 = vld [vmem:[%s6230_s1 + $0x48] sm:$0xff]  ;;  %v112_v19 = vld [vmem:[%s6230_s1 + $0x50] sm:$0xff]  ;;  %v113_v20 = vld [vmem:[%s6230_s1 + $0x58] sm:$0xff] }
   0x7   :  { %v114_v21 = vld [vmem:[%s6230_s1 + $0x60] sm:$0xff]  ;;  %v115_v22 = vld [vmem:[%s6230_s1 + $0x68] sm:$0xff]  ;;  %v116_v23 = vld [vmem:[%s6230_s1 + $0x70] sm:$0xff] }
   0x8   :  { %66 = vperm.xlu0 %5160, %v55_v10   ;;  %v117_v24 = vld [vmem:[%s6230_s1 + $0x78] sm:$0xff]  ;;  %v49_v26 = vld [vmem:[%s6232_s3] sm:$0xff]  ;;  %v50_v27 = vld [vmem:[%s6232_s3 + $0x8] sm:$0xff] }
   0x9   :  { %4879 = vmatpush3.bf16.msra.mxu0 %v4876_v7  ;;  %v5466_v28 = vpack.c.bf16 %v50_v27, %v49_v26  ;;  %v51_v29 = vld [vmem:[%s6232_s3 + $0x10] sm:$0xff]  ;;  %v52_v30 = vld [vmem:[%s6232_s3 + $0x18] sm:$0xff]  ;;  %v5501_v0 = vld [vmem:[%s6233_s4] ss:$0 sm:$0xff] }
   0xa   :  { %4912 = vmatprep.subr.bf16.mxu0 %v5310_v25  ;;  %v5476_v31 = vpack.c.bf16 %v52_v30, %v51_v29  ;;  %vm42_vm6 = vmand %vm40_vm4, %vm41_vm5  ;;  %v59_v27 = vld [vmem:[%s6231_s0 + $0x28] sm:$0xff]  ;;  %v61_v29 = vld [vmem:[%s6231_s0 + $0x38] sm:$0xff] }
   0xb   :  { %v5507_v4 = vsel %vm42_vm6, 2.0, %v5313_v36  ;;  %v431_v30 = vld [vmem:[%s6234_s6] sm:$0xff]  ;;  %v432_v32 = vld [vmem:[%s6234_s6 + $0x8] sm:$0xff] }
   0xc   :  { %4365 = vmatmul.mubr.msk.f32.vlgmr.msra.gmra.mrb[0].mxu0 %vm118_vm0, %v103_v9 }
   0xd   :  { %4367 = vmatprep.mubr.msk.f32.mxu0 %vm118_vm0, %v104_v11  ;;  %4914 = vmatpush3.bf16.msra.mxu0 %v5466_v28 }
   0xe   :  { %4915 = vmatprep.subr.bf16.mxu0 %v5310_v25 }
  0x10   :  { %4368 = vmatmul.mubr.msk.f32.gmra.mrb[2].mxu0 %vm118_vm0, %v105_v12  ;;  %v5511_v12 = vsel %vm42_vm6, -1.0, %v5312_v34 }
  0x11   :  { %4370 = vmatprep.mubr.msk.f32.mxu0 %vm118_vm0, %v106_v13  ;;  %4917 = vmatpush3.bf16.msra.mxu0 %v5476_v31 }
  0x12   :  { %4918 = vmatprep.subr.bf16.mxu0 %v5310_v25 }
  0x14   :  { %4371 = vmatmul.mubr.msk.f32.gmra.mrb[4].mxu0 %vm118_vm0, %v107_v14 }
  0x15   :  { %4373 = vmatprep.mubr.msk.f32.mxu0 %vm118_vm0, %v108_v15 }
  0x18   :  { %4374 = vmatmul.mubr.msk.f32.gmra.mrb[6].mxu0 %vm118_vm0, %v109_v16 }
  0x19   :  { %4376 = vmatprep.mubr.msk.f32.mxu0 %vm118_vm0, %v110_v17  ;;  %v56_v17 = vld [vmem:[%s6231_s0 + $0x10] sm:$0xff] }
  0x1c   :  { %4377 = vmatmul.mubr.msk.f32.gmra.mrb[8].mxu0 %vm118_vm0, %v111_v18  ;;  %v58_v18 = vld [vmem:[%s6231_s0 + $0x20] sm:$0xff] }
  0x1d   :  { %4379 = vmatprep.mubr.msk.f32.mxu0 %vm118_vm0, %v112_v19  ;;  %v60_v19 = vld [vmem:[%s6231_s0 + $0x30] sm:$0xff] }
  0x20   :  { %4380 = vmatmul.mubr.msk.f32.gmra.mrb[10].mxu0 %vm118_vm0, %v113_v20 }
  0x21   :  { %4382 = vmatprep.mubr.msk.f32.mxu0 %vm118_vm0, %v114_v21 }
  0x24   :  { %4383 = vmatmul.mubr.msk.f32.gmra.mrb[12].mxu0 %vm118_vm0, %v115_v22 }
  0x25   :  { %4385 = vmatprep.mubr.msk.f32.mxu0 %vm118_vm0, %v116_v23 }
  0x28   :  { %4386 = vmatmul.mubr.msk.f32.gmra.mrb[14].mxu0 %vm118_vm0, %v117_v24  ;;  %v57_v24 = vld [vmem:[%s6231_s0 + $0x18] sm:$0xff] }
  0x29   :  { %4440 = vmatprep.mubr.msk.f32.mxu0 %vm5311_vm1, %v5312_v34 }
  0x2c   :  { %4441 = vmatmul.mubr.f32.vlgmr.msra.gmra.mrb[16].mxu0 %v5312_v34 }
  0x2d   :  { %4920 = vmatpush3.bf16.msra.mxu0 %v5466_v28  ;;  %4451 = vmatprep.mubr.msk.f32.mxu0 %vm5311_vm1, %v5312_v34 }
  0x2e   :  { %4921 = vmatprep.subr.bf16.mxu0 %v5310_v25 }
  0x31   :  { %4923 = vmatpush3.bf16.msra.mxu0 %v5476_v31 }
  0x32   :  { %4930 = vmatprep.subr.bf16.mxu0 %v5310_v25 }
  0x83   :  { %v64_v35 = vpop.permute.xlu0 %63 }
  0x84   :  { %vm86_vm2 = vcmp.eq.s32.totalorder %v5480_v33, %v64_v35  ;;  %v433_v35 = vld [vmem:[%s6234_s6 + $0x10] sm:$0xff] }
  0x85   :  { %4420 = vmatprep.mubr.msk.f32.mxu1 %vm86_vm2, %v5313_v36 }
  0x87   :  { %v67_v61 = vpop.permute.xlu0 %66 }
  0x88   :  { %vm87_vm3 = vcmp.eq.s32.totalorder %v5480_v33, %v67_v61 }
  0xdf   :  { %v4366_v37 = vpop.f32.mrb[0].mxu0 }
  0xe0   :  { %v233_v38 = vpop.f32.mrb[1].mxu0 }
  0xe1   :  { %v4880_v39 = vpack.c.bf16 %v4366_v37, %v233_v38  ;;  %v5550_v37 = vpack.c.bf16 %v432_v32, %v431_v30  ;;  %v434_v38 = vld [vmem:[%s6234_s6 + $0x18] sm:$0xff] }
  0xe3   :  { %v4369_v40 = vpop.f32.mrb[2].mxu0  ;;  %4881 = vmatprep.subr.bf16.mxu1 %v4880_v39 }
  0xe4   :  { %v243_v41 = vpop.f32.mrb[3].mxu0  ;;  %4883 = vmatpush3.bf16.msra.mxu1 %v4880_v39  ;;  %v5556_v39 = vpack.c.bf16 %v434_v38, %v433_v35 }
  0xe5   :  { %v4884_v42 = vpack.c.bf16 %v4369_v40, %v243_v41 }
  0xe7   :  { %v4372_v43 = vpop.f32.mrb[4].mxu0  ;;  %4885 = vmatprep.subr.bf16.mxu1 %v4884_v42 }
  0xe8   :  { %v253_v44 = vpop.f32.mrb[5].mxu0  ;;  %4887 = vmatpush3.bf16.msra.mxu1 %v4884_v42 }
  0xe9   :  { %v4888_v45 = vpack.c.bf16 %v4372_v43, %v253_v44 }
  0xeb   :  { %v4375_v46 = vpop.f32.mrb[6].mxu0  ;;  %4889 = vmatprep.subr.bf16.mxu1 %v4888_v45 }
  0xec   :  { %v263_v47 = vpop.f32.mrb[7].mxu0  ;;  %4891 = vmatpush3.bf16.msra.mxu1 %v4888_v45 }
  0xed   :  { %v4892_v48 = vpack.c.bf16 %v4375_v46, %v263_v47 }
  0xef   :  { %v4378_v49 = vpop.f32.mrb[8].mxu0  ;;  %4893 = vmatprep.subr.bf16.mxu1 %v4892_v48 }
  0xf0   :  { %v273_v50 = vpop.f32.mrb[9].mxu0  ;;  %4895 = vmatpush3.bf16.msra.mxu1 %v4892_v48  ;;  %v425_v48 = vld [vmem:[%s6235_s5 + $0x10] sm:$0xff] }
  0xf1   :  { %v4896_v51 = vpack.c.bf16 %v4378_v49, %v273_v50  ;;  %v426_v49 = vld [vmem:[%s6235_s5 + $0x18] sm:$0xff] }
  0xf3   :  { %v4381_v52 = vpop.f32.mrb[10].mxu0  ;;  %4897 = vmatprep.subr.bf16.mxu1 %v4896_v51 }
  0xf4   :  { %v283_v53 = vpop.f32.mrb[11].mxu0  ;;  %4899 = vmatpush3.bf16.msra.mxu1 %v4896_v51  ;;  %v5597_v51 = vpack.c.bf16 %v426_v49, %v425_v48  ;;  %v427_v48 = vld [vmem:[%s6237_s8] sm:$0xff]  ;;  %v428_v49 = vld [vmem:[%s6237_s8 + $0x8] sm:$0xff] }
  0xf5   :  { %v4900_v54 = vpack.c.bf16 %v4381_v52, %v283_v53 }
  0xf7   :  { %v4384_v55 = vpop.f32.mrb[12].mxu0  ;;  %4901 = vmatprep.subr.bf16.mxu1 %v4900_v54 }
  0xf8   :  { %v293_v56 = vpop.f32.mrb[13].mxu0  ;;  %4903 = vmatpush3.bf16.msra.mxu1 %v4900_v54 }
  0xf9   :  { %v4904_v57 = vpack.c.bf16 %v4384_v55, %v293_v56 }
  0xfb   :  { %v4387_v58 = vpop.f32.mrb[14].mxu0  ;;  %4905 = vmatprep.subr.bf16.mxu1 %v4904_v57 }
  0xfc   :  { %v303_v59 = vpop.f32.mrb[15].mxu0  ;;  %4907 = vmatpush3.bf16.msra.mxu1 %v4904_v57 }
  0xfd   :  { %v4908_v60 = vpack.c.bf16 %v4387_v58, %v303_v59 }
  0xff   :  { %4909 = vmatprep.subr.bf16.mxu1 %v4908_v60  ;;  %v510_v62 = vpop.f32.mrb[16].mxu0 }
 0x100   :  { %4911 = vmatpush3.bf16.msra.mxu1 %v4908_v60  ;;  %v4442_v63 = vpop.f32.mrb[17].mxu0 }
 0x101   :  { %4924 = vmatprep.subr.bf16.mxu1 %v5310_v25 }
 0x103   :  { %4421 = vmatmul.mubr.msk.f32.vlgmr.msra.gmra.mrb[0].mxu1 %vm87_vm3, %v5313_v36 }
 0x104   :  { %4926 = vmatpush3.bf16.msra.mxu1 %v5550_v37 }
 0x105   :  { %4927 = vmatprep.subr.bf16.mxu1 %v5310_v25 }
 0x108   :  { %4929 = vmatpush3.bf16.msra.mxu1 %v5556_v39 }
 0x109   :  { %4936 = vmatprep.subr.bf16.mxu1 %v5310_v25 }
 0x1d6   :  { %v5503_v1 = vpop.f32.mrb[0].mxu1 }
 0x1d7   :  { %v384_v2 = vpop.f32.mrb[1].mxu1  ;;  %v390_v60 = vadd.f32 %v5503_v1, %v5501_v0 }
 0x1d8   :  { %v385_v3 = vadd.f32 %v5501_v0, %v384_v2 }
 0x1da   :  { %v514_v5 = vadd.f32 %v510_v62, %v385_v3 }
 0x1dc   :  { %v515_v6 = vmul.f32 %v514_v5, %v5507_v4 }
 0x1de   :  { %v516_v7 = vsub.f32 0.0, %v515_v6  ;;  %v5629_v6 = vld [vmem:[%s6236_s7] ss:$0 sm:$0xff] }
 0x1e0   :  { %v517_v8 = vmul.f32 1.442695, %v516_v7 }
 0x1e2   :  { %5162 = vpow2.f32 %v517_v8 }
 0x1ec   :  { %v5163_v9 = vpop.eup %5162 }
 0x1ed   :  { %v519_v10 = vadd.f32 1.0, %v5163_v9 }
 0x1ef   :  { %5164 = vrcp.f32 %v519_v10 }
 0x1f9   :  { %v5165_v11 = vpop.eup %5164 }
 0x1fa   :  { %v522_v13 = vmul.f32 %v5165_v11, %v5507_v4 }
 0x1fc   :  { %v523_v14 = vadd.f32 %v522_v13, %v5511_v12 }
 0x1fe   :  { %526 = vrot.lane.b32.xlu1 %v523_v14, %s5314_s29  ;;  %v524_v20 = vmul.f32 0.0, %v523_v14 }
 0x270   :  { %v527_v15 = vpop.permute.xlu1 %526 }
 0x271   :  { %v529_v16 = vmul.f32 %v527_v15, %v523_v14 }
 0x273   :  { %531 = vrot.lane.b32.xlu1 %v529_v16, %s5315_s30 }
 0x277   :  { %69 = vperm.xlu1 %5161, %v56_v17  }
 0x27b   :  { %75 = vperm.xlu1 %5161, %v58_v18  }
 0x27f   :  { %81 = vperm.xlu1 %5161, %v60_v19  }
 0x2e5   :  { %v532_v21 = vpop.permute.xlu1 %531 }
 0x2e6   :  { %v5526_v22 = vadd.f32 %v532_v21, %v524_v20 }
 0x2e8   :  { %5166 = vtanh.f32 %v5526_v22 }
 0x2f2   :  { %v5167_v23 = vpop.eup %5166 }
 0x2f3   :  { %537 = vrot.lane.b32.xlu0 %v5167_v23, %s5314_s29 }
 0x2f6   :  { %v70_v26 = vpop.permute.xlu1 %69 }
 0x2f7   :  { %72 = vperm.xlu0 %5160, %v57_v24   ;;  %vm88_vm7 = vcmp.eq.s32.totalorder %v5480_v33, %v70_v26 }
 0x2f8   :  { %4423 = vmatprep.mubr.msk.f32.mxu1 %vm88_vm7, %v5313_v36 }
 0x2fa   :  { %v76_v42 = vpop.permute.xlu1 %75 }
 0x2fb   :  { %78 = vperm.xlu0 %5160, %v59_v27   ;;  %vm90_vm8 = vcmp.eq.s32.totalorder %v5480_v33, %v76_v42 }
 0x2fe   :  { %v82_v44 = vpop.permute.xlu1 %81 }
 0x2ff   :  { %84 = vperm.xlu0 %5160, %v61_v29   ;;  %vm92_vm10 = vcmp.eq.s32.totalorder %v5480_v33, %v82_v44 }
 0x365   :  { %v538_v40 = vpop.permute.xlu0 %537 }
 0x366   :  { %v540_v41 = vmul.f32 %v538_v40, %v523_v14 }
 0x368   :  { %542 = vrot.lane.b32.xlu1 %v540_v41, %s5315_s30 }
 0x376   :  { %v73_v43 = vpop.permute.xlu0 %72 }
 0x377   :  { %vm89_vm9 = vcmp.eq.s32.totalorder %v5480_v33, %v73_v43 }
 0x378   :  { %4424 = vmatmul.mubr.msk.f32.gmra.mrb[2].mxu1 %vm89_vm9, %v5313_v36 }
 0x379   :  { %4426 = vmatprep.mubr.msk.f32.mxu1 %vm90_vm8, %v5313_v36 }
 0x37a   :  { %v79_v45 = vpop.permute.xlu0 %78 }
 0x37b   :  { %vm91_vm11 = vcmp.eq.s32.totalorder %v5480_v33, %v79_v45 }
 0x37c   :  { %4427 = vmatmul.mubr.msk.f32.gmra.mrb[4].mxu1 %vm91_vm11, %v5313_v36 }
 0x37d   :  { %4429 = vmatprep.mubr.msk.f32.mxu1 %vm92_vm10, %v5313_v36 }
 0x37e   :  { %v85_v46 = vpop.permute.xlu0 %84 }
 0x37f   :  { %vm93_vm12 = vcmp.eq.s32.totalorder %v5480_v33, %v85_v46  ;;  %v423_v33 = vld [vmem:[%s6235_s5] sm:$0xff] }
 0x380   :  { %4430 = vmatmul.mubr.msk.f32.gmra.mrb[6].mxu1 %vm93_vm12, %v5313_v36  ;;  %v424_v36 = vld [vmem:[%s6235_s5 + $0x8] sm:$0xff] }
 0x381   :  { %4462 = vmatprep.mubr.msk.f32.mxu1 %vm5311_vm1, %v5312_v34  ;;  %v5587_v47 = vpack.c.bf16 %v424_v36, %v423_v33 }
 0x384   :  { %4463 = vmatmul.mubr.f32.vlgmr.msra.gmra.mrb[8].mxu1 %v5312_v34 }
 0x385   :  { %4938 = vmatpush3.bf16.msra.mxu1 %v5466_v28  ;;  %4484 = vmatprep.mubr.msk.f32.mxu1 %vm5311_vm1, %v5312_v34 }
 0x386   :  { %4939 = vmatprep.subr.bf16.mxu1 %v5310_v25 }
 0x389   :  { %4941 = vmatpush3.bf16.msra.mxu1 %v5476_v31 }
 0x38a   :  { %4948 = vmatprep.subr.bf16.mxu1 %v5310_v25 }
 0x3da   :  { %v543_v50 = vpop.permute.xlu1 %542 }
 0x3db   :  { %4452 = vmatmul.mubr.msk.f32.vlgmr.msra.gmra.mrb[18].mxu0 %vm118_vm0, %v543_v50 }
 0x3dc   :  { %4932 = vmatpush3.bf16.msra.mxu0 %v5587_v47  ;;  %4473 = vmatprep.mubr.msk.f32.mxu0 %vm5311_vm1, %v5312_v34 }
 0x3dd   :  { %4933 = vmatprep.subr.bf16.mxu0 %v5310_v25 }
 0x3e0   :  { %4935 = vmatpush3.bf16.msra.mxu0 %v5597_v51 }
 0x3e1   :  { %4942 = vmatprep.subr.bf16.mxu0 %v5310_v25 }
 0x3e3   :  { %4474 = vmatmul.mubr.msk.f32.vlgmr.msra.gmra.mrb[20].mxu0 %vm118_vm0, %v543_v50  ;;  %v435_v50 = vld [vmem:[%s6238_s9] sm:$0xff] }
 0x3e4   :  { %4944 = vmatpush3.bf16.msra.mxu0 %v5550_v37  ;;  %4495 = vmatprep.mubr.msk.f32.mxu0 %vm5311_vm1, %v5312_v34 }
 0x3e5   :  { %4945 = vmatprep.subr.bf16.mxu0 %v5310_v25 }
 0x3e8   :  { %4947 = vmatpush3.bf16.msra.mxu0 %v5556_v39 }
 0x3e9   :  { %4954 = vmatprep.subr.bf16.mxu0 %v5310_v25 }
 0x44b   :  { %v5611_v52 = vpop.f32.mrb[2].mxu1 }
 0x44c   :  { %v5613_v53 = vpop.f32.mrb[3].mxu1 }
 0x44f   :  { %v5615_v54 = vpop.f32.mrb[4].mxu1 }
 0x450   :  { %v5617_v55 = vpop.f32.mrb[5].mxu1 }
 0x453   :  { %v5619_v56 = vpop.f32.mrb[6].mxu1 }
 0x454   :  { %v5621_v57 = vpop.f32.mrb[7].mxu1 }
 0x457   :  { %v709_v58 = vpop.f32.mrb[8].mxu1 }
 0x458   :  { %v4464_v59 = vpop.f32.mrb[9].mxu1 }
 0x459   :  { %v5670_v59 = vpack.c.bf16 %v428_v49, %v427_v48 }
 0x4ae   :  { %v612_v61 = vpop.f32.mrb[18].mxu0 }
 0x4af   :  { %v616_v62 = vadd.f32 %v612_v61, %v390_v60  ;;  %v4453_v63 = vpop.f32.mrb[19].mxu0  ;;  %v429_v60 = vld [vmem:[%s6237_s8 + $0x10] sm:$0xff]  ;;  %v430_v61 = vld [vmem:[%s6237_s8 + $0x18] sm:$0xff] }
 0x4b0   :  { %v437_v63 = vld [vmem:[%s6238_s9 + $0x10] sm:$0xff] }
 0x4b1   :  { %v617_v2 = vmul.f32 %v616_v62, %v5507_v4 }
 0x4b3   :  { %v618_v3 = vsub.f32 0.0, %v617_v2  ;;  %v438_v2 = vld [vmem:[%s6238_s9 + $0x18] sm:$0xff] }
 0x4b5   :  { %v619_v5 = vmul.f32 1.442695, %v618_v3 }
 0x4b6   :  { %v779_v7 = vpop.f32.mrb[20].mxu0 }
 0x4b7   :  { %5168 = vpow2.f32 %v619_v5  ;;  %v780_v8 = vadd.f32 %v779_v7, %v709_v58  ;;  %v4475_v9 = vpop.f32.mrb[21].mxu0  ;;  %v436_v58 = vld [vmem:[%s6238_s9 + $0x8] sm:$0xff]  ;;  %v5689_v5 = vpack.c.bf16 %v430_v61, %v429_v60  ;;  %v5696_v7 = vpack.c.bf16 %v438_v2, %v437_v63 }
 0x4b8   :  { %v5679_v62 = vpack.c.bf16 %v436_v58, %v435_v50 }
 0x4b9   :  { %v789_v10 = vadd.f32 %v5629_v6, %v780_v8  ;;  %v395_v8 = vadd.f32 %v5501_v0, %v5613_v53 }
 0x4bb   :  { %v790_v1 = vmul.f32 %v789_v10, %v5507_v4 }
 0x4bd   :  { %v791_v11 = vsub.f32 0.0, %v790_v1 }
 0x4bf   :  { %v792_v13 = vmul.f32 1.442695, %v791_v11 }
 0x4c1   :  { %v5169_v14 = vpop.eup %5168  ;;  %5170 = vpow2.f32 %v792_v13 }
 0x4c2   :  { %v621_v15 = vadd.f32 1.0, %v5169_v14 }
 0x4c4   :  { %5172 = vrcp.f32 %v621_v15 }
 0x4cb   :  { %v5171_v16 = vpop.eup %5170 }
 0x4cc   :  { %v794_v17 = vadd.f32 1.0, %v5171_v16 }
 0x4ce   :  { %v5173_v18 = vpop.eup %5172  ;;  %5174 = vrcp.f32 %v794_v17 }
 0x4cf   :  { %v624_v19 = vmul.f32 %v5173_v18, %v5507_v4 }
 0x4d1   :  { %v625_v20 = vadd.f32 %v624_v19, %v5511_v12 }
 0x4d3   :  { %628 = vrot.lane.b32.xlu0 %v625_v20, %s5314_s29  ;;  %v626_v32 = vmul.f32 %v625_v20, %v5526_v22 }
 0x4d8   :  { %v5175_v21 = vpop.eup %5174 }
 0x4d9   :  { %v797_v23 = vmul.f32 %v5175_v21, %v5507_v4 }
 0x4db   :  { %v798_v24 = vadd.f32 %v797_v23, %v5511_v12 }
 0x4dd   :  { %801 = vrot.lane.b32.xlu1 %v798_v24, %s5314_s29  ;;  %v799_v40 = vmul.f32 0.0, %v798_v24 }
 0x545   :  { %v629_v26 = vpop.permute.xlu0 %628 }
 0x546   :  { %v631_v27 = vmul.f32 %v629_v26, %v625_v20  ;;  %v5727_v26 = vld [vmem:[%s6239_s10] ss:$0 sm:$0xff] }
 0x548   :  { %633 = vrot.lane.b32.xlu0 %v631_v27, %s5315_s30 }
 0x54f   :  { %v802_v29 = vpop.permute.xlu1 %801 }
 0x550   :  { %v804_v30 = vmul.f32 %v802_v29, %v798_v24 }
 0x552   :  { %806 = vrot.lane.b32.xlu1 %v804_v30, %s5315_s30 }
 0x5ba   :  { %v634_v35 = vpop.permute.xlu0 %633 }
 0x5bb   :  { %v5642_v38 = vadd.f32 %v634_v35, %v626_v32 }
 0x5bd   :  { %5176 = vtanh.f32 %v5642_v38 }
 0x5c4   :  { %v807_v41 = vpop.permute.xlu1 %806 }
 0x5c5   :  { %v5645_v42 = vadd.f32 %v807_v41, %v799_v40 }
 0x5c7   :  { %v5177_v43 = vpop.eup %5176  ;;  %5178 = vtanh.f32 %v5645_v42 }
 0x5c8   :  { %639 = vrot.lane.b32.xlu0 %v5177_v43, %s5314_s29 }
 0x5d1   :  { %v5179_v44 = vpop.eup %5178 }
 0x5d2   :  { %812 = vrot.lane.b32.xlu1 %v5179_v44, %s5314_s29 }
 0x63a   :  { %v640_v45 = vpop.permute.xlu0 %639 }
 0x63b   :  { %v642_v46 = vmul.f32 %v640_v45, %v625_v20 }
 0x63d   :  { %817 = vrot.lane.b32.xlu0 %v642_v46, %s5315_s30 }
 0x644   :  { %v813_v22 = vpop.permute.xlu1 %812 }
 0x645   :  { %v815_v33 = vmul.f32 %v813_v22, %v798_v24 }
 0x647   :  { %919 = vrot.lane.b32.xlu1 %v815_v33, %s5315_s30 }
 0x6af   :  { %v818_v36 = vpop.permute.xlu0 %817 }
 0x6b0   :  { %4485 = vmatmul.mubr.msk.f32.vlgmr.msra.gmra.mrb[10].mxu1 %vm118_vm0, %v818_v36 }
 0x6b1   :  { %4950 = vmatpush3.bf16.msra.mxu1 %v5587_v47  ;;  %4506 = vmatprep.mubr.msk.f32.mxu1 %vm5311_vm1, %v5312_v34 }
 0x6b2   :  { %4951 = vmatprep.subr.bf16.mxu1 %v5310_v25 }
 0x6b5   :  { %4953 = vmatpush3.bf16.msra.mxu1 %v5597_v51 }
 0x6b6   :  { %4960 = vmatprep.subr.bf16.mxu1 %v5310_v25 }
 0x6b8   :  { %4507 = vmatmul.mubr.msk.f32.vlgmr.msra.gmra.mrb[12].mxu1 %vm118_vm0, %v818_v36 }
 0x6b9   :  { %v920_v3 = vpop.permute.xlu1 %919  ;;  %4962 = vmatpush3.bf16.msra.mxu1 %v5670_v59  ;;  %4528 = vmatprep.mubr.msk.f32.mxu1 %vm5311_vm1, %v5312_v34 }
 0x6ba   :  { %4496 = vmatmul.mubr.msk.f32.vlgmr.msra.gmra.mrb[22].mxu0 %vm118_vm0, %v920_v3  ;;  %4963 = vmatprep.subr.bf16.mxu1 %v5310_v25 }
 0x6bb   :  { %4956 = vmatpush3.bf16.msra.mxu0 %v5679_v62  ;;  %4517 = vmatprep.mubr.msk.f32.mxu0 %vm5311_vm1, %v5312_v34 }
 0x6bc   :  { %4957 = vmatprep.subr.bf16.mxu0 %v5310_v25 }
 0x6bd   :  { %4965 = vmatpush3.bf16.msra.mxu1 %v5689_v5 }
 0x6be   :  { %4972 = vmatprep.subr.bf16.mxu1 %v5310_v25 }
 0x6bf   :  { %4959 = vmatpush3.bf16.msra.mxu0 %v5696_v7 }
 0x6c0   :  { %4529 = vmatmul.mubr.msk.f32.vlgmr.msra.gmra.mrb[14].mxu1 %vm118_vm0, %v920_v3  ;;  %4966 = vmatprep.subr.bf16.mxu0 %v5310_v25 }
 0x6c1   :  { %4974 = vmatpush3.bf16.msra.mxu1 %v5550_v37  ;;  %4550 = vmatprep.mubr.msk.f32.mxu1 %vm5311_vm1, %v5312_v34 }
 0x6c2   :  { %4518 = vmatmul.mubr.f32.vlgmr.msra.gmra.mrb[24].mxu0 %v5312_v34  ;;  %4975 = vmatprep.subr.bf16.mxu1 %v5310_v25 }
 0x6c3   :  { %4968 = vmatpush3.bf16.msra.mxu0 %v5466_v28  ;;  %4539 = vmatprep.mubr.msk.f32.mxu0 %vm5311_vm1, %v5312_v34 }
 0x6c4   :  { %4969 = vmatprep.subr.bf16.mxu0 %v5310_v25 }
 0x6c5   :  { %4977 = vmatpush3.bf16.msra.mxu1 %v5556_v39 }
 0x6c6   :  { %4984 = vmatprep.subr.bf16.mxu1 %v5310_v25 }
 0x6c7   :  { %4971 = vmatpush3.bf16.msra.mxu0 %v5476_v31 }
 0x6c8   :  { %4978 = vmatprep.subr.bf16.mxu0 %v5310_v25 }
 0x783   :  { %v887_v9 = vpop.f32.mrb[10].mxu1 }
 0x784   :  { %v891_v10 = vadd.f32 %v887_v9, %v395_v8  ;;  %v4486_v1 = vpop.f32.mrb[11].mxu1 }
 0x786   :  { %v892_v11 = vmul.f32 %v891_v10, %v5507_v4 }
 0x788   :  { %v893_v13 = vsub.f32 0.0, %v892_v11 }
 0x78a   :  { %v894_v14 = vmul.f32 1.442695, %v893_v13 }
 0x78b   :  { %v1059_v15 = vpop.f32.mrb[12].mxu1 }
 0x78c   :  { %5180 = vpow2.f32 %v894_v14  ;;  %v4508_v16 = vpop.f32.mrb[13].mxu1 }
 0x78d   :  { %v989_v17 = vpop.f32.mrb[22].mxu0 }
 0x78e   :  { %v1060_v18 = vadd.f32 %v1059_v15, %v989_v17  ;;  %v4497_v19 = vpop.f32.mrb[23].mxu0 }
 0x790   :  { %v1063_v20 = vadd.f32 %v5629_v6, %v1060_v18 }
 0x792   :  { %v1064_v21 = vmul.f32 %v1063_v20, %v5507_v4 }
 0x793   :  { %v1226_v23 = vpop.f32.mrb[14].mxu1 }
 0x794   :  { %v1065_v24 = vsub.f32 0.0, %v1064_v21  ;;  %v4530_v53 = vpop.f32.mrb[15].mxu1 }
 0x795   :  { %v1156_v27 = vpop.f32.mrb[24].mxu0 }
 0x796   :  { %v5181_v29 = vpop.eup %5180  ;;  %v1066_v30 = vmul.f32 1.442695, %v1065_v24  ;;  %v1227_v32 = vadd.f32 %v1226_v23, %v1156_v27  ;;  %v4519_v35 = vpop.f32.mrb[25].mxu0 }
 0x797   :  { %v896_v40 = vadd.f32 1.0, %v5181_v29 }
 0x798   :  { %5182 = vpow2.f32 %v1066_v30  ;;  %v1236_v41 = vadd.f32 %v5727_v26, %v1227_v32 }
 0x799   :  { %5184 = vrcp.f32 %v896_v40 }
 0x79a   :  { %v1237_v43 = vmul.f32 %v1236_v41, %v5507_v4 }
 0x79c   :  { %v1238_v44 = vsub.f32 0.0, %v1237_v43 }
 0x79e   :  { %v1239_v45 = vmul.f32 1.442695, %v1238_v44  ;;  %v400_v44 = vadd.f32 %v5611_v52, %v5501_v0 }
 0x7a0   :  { %5186 = vpow2.f32 %v1239_v45 }
 0x7a2   :  { %v5183_v46 = vpop.eup %5182 }
 0x7a3   :  { %v5185_v22 = vpop.eup %5184  ;;  %v1068_v33 = vadd.f32 1.0, %v5183_v46 }
 0x7a4   :  { %v899_v36 = vmul.f32 %v5185_v22, %v5507_v4 }
 0x7a5   :  { %5188 = vrcp.f32 %v1068_v33 }
 0x7a6   :  { %v900_v48 = vadd.f32 %v899_v36, %v5511_v12 }
 0x7a8   :  { %903 = vrot.lane.b32.xlu0 %v900_v48, %s5314_s29  ;;  %v901_v14 = vmul.f32 %v900_v48, %v5642_v38 }
 0x7aa   :  { %v5187_v49 = vpop.eup %5186 }
 0x7ab   :  { %v1241_v50 = vadd.f32 1.0, %v5187_v49 }
 0x7ad   :  { %5190 = vrcp.f32 %v1241_v50 }
 0x7af   :  { %v5189_v58 = vpop.eup %5188 }
 0x7b0   :  { %v1071_v60 = vmul.f32 %v5189_v58, %v5507_v4 }
 0x7b2   :  { %v1072_v61 = vadd.f32 %v1071_v60, %v5511_v12 }
 0x7b4   :  { %1075 = vrot.lane.b32.xlu1 %v1072_v61, %s5314_s29  ;;  %v1073_v17 = vmul.f32 %v1072_v61, %v5645_v42 }
 0x7b7   :  { %v5191_v63 = vpop.eup %5190 }
 0x7b8   :  { %v1244_v2 = vmul.f32 %v5191_v63, %v5507_v4 }
 0x7ba   :  { %v1245_v3 = vadd.f32 %v1244_v2, %v5511_v12 }
 0x7bc   :  { %1248 = vrot.lane.b32.xlu0 %v1245_v3, %s5314_s29  ;;  %v1246_v21 = vmul.f32 0.0, %v1245_v3 }
 0x81a   :  { %v904_v8 = vpop.permute.xlu0 %903 }
 0x81b   :  { %v906_v9 = vmul.f32 %v904_v8, %v900_v48 }
 0x81d   :  { %908 = vrot.lane.b32.xlu1 %v906_v9, %s5315_s30 }
 0x826   :  { %v1076_v10 = vpop.permute.xlu1 %1075 }
 0x827   :  { %v1078_v1 = vmul.f32 %v1076_v10, %v1072_v61 }
 0x829   :  { %1080 = vrot.lane.b32.xlu0 %v1078_v1, %s5315_s30 }
 0x82e   :  { %v1249_v11 = vpop.permute.xlu0 %1248 }
 0x82f   :  { %v1251_v13 = vmul.f32 %v1249_v11, %v1245_v3 }
 0x831   :  { %1253 = vrot.lane.b32.xlu1 %v1251_v13, %s5315_s30 }
 0x88f   :  { %v909_v15 = vpop.permute.xlu1 %908 }
 0x890   :  { %v5744_v16 = vadd.f32 %v909_v15, %v901_v14 }
 0x892   :  { %5192 = vtanh.f32 %v5744_v16 }
 0x89b   :  { %v1081_v18 = vpop.permute.xlu0 %1080 }
 0x89c   :  { %v5193_v19 = vpop.eup %5192  ;;  %v5748_v20 = vadd.f32 %v1081_v18, %v1073_v17 }
 0x89d   :  { %914 = vrot.lane.b32.xlu0 %v5193_v19, %s5314_s29 }
 0x89e   :  { %5194 = vtanh.f32 %v5748_v20 }
 0x8a3   :  { %v1254_v23 = vpop.permute.xlu1 %1253 }
 0x8a4   :  { %v5752_v24 = vadd.f32 %v1254_v23, %v1246_v21 }
 0x8a6   :  { %5196 = vtanh.f32 %v5752_v24 }
 0x8a8   :  { %v5195_v38 = vpop.eup %5194 }
 0x8a9   :  { %1086 = vrot.lane.b32.xlu1 %v5195_v38, %s5314_s29 }
 0x8b0   :  { %v5197_v53 = vpop.eup %5196 }
 0x8b1   :  { %1259 = vrot.lane.b32.xlu0 %v5197_v53, %s5314_s29 }
 0x90f   :  { %v915_v42 = vpop.permute.xlu0 %914 }
 0x910   :  { %v917_v27 = vmul.f32 %v915_v42, %v900_v48 }
 0x912   :  { %1269 = vrot.lane.b32.xlu1 %v917_v27, %s5315_s30 }
 0x91b   :  { %v1087_v29 = vpop.permute.xlu1 %1086 }
 0x91c   :  { %v1089_v30 = vmul.f32 %v1087_v29, %v1072_v61 }
 0x91e   :  { %1371 = vrot.lane.b32.xlu0 %v1089_v30, %s5315_s30 }
 0x923   :  { %v1260_v32 = vpop.permute.xlu0 %1259 }
 0x924   :  { %v1262_v35 = vmul.f32 %v1260_v32, %v1245_v3 }
 0x926   :  { %1264 = vrot.lane.b32.xlu1 %v1262_v35, %s5315_s30 }
 0x984   :  { %v1270_v40 = vpop.permute.xlu1 %1269 }
 0x985   :  { %4540 = vmatmul.mubr.msk.f32.vlgmr.msra.gmra.mrb[26].mxu0 %vm118_vm0, %v1270_v40 }
 0x986   :  { %4980 = vmatpush3.bf16.msra.mxu0 %v5587_v47  ;;  %4561 = vmatprep.mubr.msk.f32.mxu0 %vm5311_vm1, %v5312_v34 }
 0x987   :  { %4981 = vmatprep.subr.bf16.mxu0 %v5310_v25 }
 0x98a   :  { %4983 = vmatpush3.bf16.msra.mxu0 %v5597_v51 }
 0x98b   :  { %4990 = vmatprep.subr.bf16.mxu0 %v5310_v25 }
 0x98d   :  { %4562 = vmatmul.mubr.msk.f32.vlgmr.msra.gmra.mrb[28].mxu0 %vm118_vm0, %v1270_v40 }
 0x98e   :  { %4992 = vmatpush3.bf16.msra.mxu0 %v5670_v59  ;;  %4583 = vmatprep.mubr.msk.f32.mxu0 %vm5311_vm1, %v5312_v34 }
 0x98f   :  { %4993 = vmatprep.subr.bf16.mxu0 %v5310_v25 }
 0x990   :  { %v1372_v41 = vpop.permute.xlu0 %1371 }
 0x991   :  { %4551 = vmatmul.mubr.msk.f32.vlgmr.msra.gmra.mrb[16].mxu1 %vm118_vm0, %v1372_v41 }
 0x992   :  { %4986 = vmatpush3.bf16.msra.mxu1 %v5679_v62  ;;  %4995 = vmatpush3.bf16.msra.mxu0 %v5689_v5 }
 0x993   :  { %4987 = vmatprep.subr.bf16.mxu1 %v5310_v25  ;;  %4572 = vmatprep.mubr.msk.f32.mxu1 %vm5311_vm1, %v5312_v34 }
 0x994   :  { %5002 = vmatprep.subr.bf16.mxu0 %v5310_v25 }
 0x995   :  { %4584 = vmatmul.mubr.msk.f32.vlgmr.msra.gmra.mrb[30].mxu0 %vm118_vm0, %v1372_v41 }
 0x996   :  { %4989 = vmatpush3.bf16.msra.mxu1 %v5696_v7  ;;  %5004 = vmatpush3.bf16.msra.mxu0 %v5550_v37 }
 0x997   :  { %4996 = vmatprep.subr.bf16.mxu1 %v5310_v25  ;;  %5005 = vmatprep.subr.bf16.mxu0 %v5310_v25 }
 0x998   :  { %v1265_v43 = vpop.permute.xlu1 %1264  ;;  %4605 = vmatprep.mubr.msk.f32.mxu0 %vm5311_vm1, %v5312_v34 }
 0x999   :  { %1267 = vst.msk [vmem:[%s6240_s11] sm:$0xff] %vm118_vm0, %v1265_v43  ;;  %4573 = vmatmul.mubr.msk.f32.vlgmr.msra.gmra.mrb[18].mxu1 %vm118_vm0, %v1265_v43 }
 0x99a   :  { %4998 = vmatpush3.bf16.msra.mxu1 %v5466_v28  ;;  %4594 = vmatprep.mubr.msk.f32.mxu1 %vm5311_vm1, %v5312_v34 }
 0x99b   :  { %4999 = vmatprep.subr.bf16.mxu1 %v5310_v25  ;;  %5007 = vmatpush3.bf16.msra.mxu0 %v5556_v39 }
 0x99c   :  { %5014 = vmatprep.subr.bf16.mxu0 %v5310_v25 }
 0x99e   :  { %5001 = vmatpush3.bf16.msra.mxu1 %v5476_v31 }
 0x99f   :  { %5008 = vmatprep.subr.bf16.mxu1 %v5310_v25 }
 0xa58   :  { %v1339_v45 = vpop.f32.mrb[26].mxu0 }
 0xa59   :  { %v1343_v46 = vadd.f32 %v1339_v45, %v400_v44  ;;  %v4541_v22 = vpop.f32.mrb[27].mxu0 }
 0xa5b   :  { %v1344_v33 = vmul.f32 %v1343_v46, %v5507_v4 }
 0xa5d   :  { %v1345_v36 = vsub.f32 0.0, %v1344_v33 }
 0xa5f   :  { %v1346_v48 = vmul.f32 1.442695, %v1345_v36 }
 0xa60   :  { %v1511_v49 = vpop.f32.mrb[28].mxu0 }
 0xa61   :  { %5198 = vpow2.f32 %v1346_v48  ;;  %v4563_v50 = vpop.f32.mrb[29].mxu0 }
 0xa64   :  { %v1441_v58 = vpop.f32.mrb[16].mxu1 }
 0xa65   :  { %v1512_v60 = vadd.f32 %v1511_v49, %v1441_v58  ;;  %v4552_v61 = vpop.f32.mrb[17].mxu1 }
 0xa67   :  { %v1515_v63 = vadd.f32 %v5629_v6, %v1512_v60 }
 0xa68   :  { %v1680_v2 = vpop.f32.mrb[30].mxu0 }
 0xa69   :  { %v1516_v3 = vmul.f32 %v1515_v63, %v5507_v4  ;;  %v4585_v8 = vpop.f32.mrb[31].mxu0 }
 0xa6b   :  { %v5199_v52 = vpop.eup %5198  ;;  %v1517_v9 = vsub.f32 0.0, %v1516_v3 }
 0xa6c   :  { %v1348_v10 = vadd.f32 1.0, %v5199_v52  ;;  %v1610_v1 = vpop.f32.mrb[18].mxu1 }
 0xa6d   :  { %v1518_v11 = vmul.f32 1.442695, %v1517_v9  ;;  %v1681_v13 = vadd.f32 %v1680_v2, %v1610_v1  ;;  %v4574_v14 = vpop.f32.mrb[19].mxu1 }
 0xa6e   :  { %5200 = vrcp.f32 %v1348_v10 }
 0xa6f   :  { %5202 = vpow2.f32 %v1518_v11  ;;  %v1684_v15 = vadd.f32 %v5727_v26, %v1681_v13 }
 0xa71   :  { %v1685_v17 = vmul.f32 %v1684_v15, %v5507_v4 }
 0xa73   :  { %v1686_v18 = vsub.f32 0.0, %v1685_v17  ;;  %v405_v17 = vadd.f32 %v5501_v0, %v5617_v55 }
 0xa75   :  { %v1687_v19 = vmul.f32 1.442695, %v1686_v18 }
 0xa77   :  { %5204 = vpow2.f32 %v1687_v19 }
 0xa78   :  { %v5201_v21 = vpop.eup %5200 }
 0xa79   :  { %v5203_v23 = vpop.eup %5202  ;;  %v1351_v38 = vmul.f32 %v5201_v21, %v5507_v4 }
 0xa7a   :  { %v1520_v53 = vadd.f32 1.0, %v5203_v23 }
 0xa7b   :  { %v1352_v42 = vadd.f32 %v1351_v38, %v5511_v12 }
 0xa7c   :  { %5206 = vrcp.f32 %v1520_v53 }
 0xa7d   :  { %1355 = vrot.lane.b32.xlu0 %v1352_v42, %s5314_s29  ;;  %v1353_v48 = vmul.f32 %v1352_v42, %v5744_v16 }
 0xa81   :  { %v5205_v27 = vpop.eup %5204 }
 0xa82   :  { %v1689_v29 = vadd.f32 1.0, %v5205_v27 }
 0xa84   :  { %5208 = vrcp.f32 %v1689_v29 }
 0xa86   :  { %v5207_v30 = vpop.eup %5206 }
 0xa87   :  { %v1523_v32 = vmul.f32 %v5207_v30, %v5507_v4 }
 0xa89   :  { %v1524_v35 = vadd.f32 %v1523_v32, %v5511_v12 }
 0xa8b   :  { %1527 = vrot.lane.b32.xlu1 %v1524_v35, %s5314_s29  ;;  %v1525_v60 = vmul.f32 %v1524_v35, %v5748_v20 }
 0xa8e   :  { %v5209_v40 = vpop.eup %5208 }
 0xa8f   :  { %v1692_v41 = vmul.f32 %v5209_v40, %v5507_v4 }
 0xa91   :  { %v1693_v43 = vadd.f32 %v1692_v41, %v5511_v12 }
 0xa93   :  { %1696 = vrot.lane.b32.xlu0 %v1693_v43, %s5314_s29  ;;  %v1694_v2 = vmul.f32 %v1693_v43, %v5752_v24 }
 0xaef   :  { %v1356_v44 = vpop.permute.xlu0 %1355 }
 0xaf0   :  { %v1358_v45 = vmul.f32 %v1356_v44, %v1352_v42 }
 0xaf2   :  { %1360 = vrot.lane.b32.xlu1 %v1358_v45, %s5315_s30 }
 0xafd   :  { %v1528_v46 = vpop.permute.xlu1 %1527 }
 0xafe   :  { %v1530_v22 = vmul.f32 %v1528_v46, %v1524_v35 }
 0xb00   :  { %1532 = vrot.lane.b32.xlu0 %v1530_v22, %s5315_s30 }
 0xb05   :  { %v1697_v33 = vpop.permute.xlu0 %1696 }
 0xb06   :  { %v1699_v36 = vmul.f32 %v1697_v33, %v1693_v43 }
 0xb08   :  { %1701 = vrot.lane.b32.xlu1 %v1699_v36, %s5315_s30 }
 0xb64   :  { %v1361_v49 = vpop.permute.xlu1 %1360 }
 0xb65   :  { %v5819_v50 = vadd.f32 %v1361_v49, %v1353_v48 }
 0xb67   :  { %5210 = vtanh.f32 %v5819_v50 }
 0xb71   :  { %v5211_v58 = vpop.eup %5210 }
 0xb72   :  { %v1533_v61 = vpop.permute.xlu0 %1532  ;;  %1366 = vrot.lane.b32.xlu0 %v5211_v58, %s5314_s29 }
 0xb73   :  { %v5824_v63 = vadd.f32 %v1533_v61, %v1525_v60 }
 0xb75   :  { %5212 = vtanh.f32 %v5824_v63 }
 0xb7a   :  { %v1702_v3 = vpop.permute.xlu1 %1701 }
 0xb7b   :  { %v5828_v8 = vadd.f32 %v1702_v3, %v1694_v2 }
 0xb7d   :  { %5214 = vtanh.f32 %v5828_v8 }
 0xb7f   :  { %v5213_v16 = vpop.eup %5212 }
 0xb80   :  { %1538 = vrot.lane.b32.xlu1 %v5213_v16, %s5314_s29 }
 0xb87   :  { %v5215_v52 = vpop.eup %5214 }
 0xb88   :  { %1707 = vrot.lane.b32.xlu0 %v5215_v52, %s5314_s29 }
 0xbe4   :  { %v1367_v20 = vpop.permute.xlu0 %1366 }
 0xbe5   :  { %v1369_v9 = vmul.f32 %v1367_v20, %v1352_v42 }
 0xbe7   :  { %1718 = vrot.lane.b32.xlu1 %v1369_v9, %s5315_s30 }
 0xbf2   :  { %v1539_v10 = vpop.permute.xlu1 %1538 }
 0xbf3   :  { %v1541_v1 = vmul.f32 %v1539_v10, %v1524_v35 }
 0xbf5   :  { %1820 = vrot.lane.b32.xlu0 %v1541_v1, %s5315_s30 }
 0xbfa   :  { %v1708_v24 = vpop.permute.xlu0 %1707 }
 0xbfb   :  { %v5835_v11 = vmul.f32 %v1708_v24, %v1693_v43 }
 0xbfd   :  { %1991 = vrot.lane.b32.xlu1 %v5835_v11, %s5315_s30 }
 0xc59   :  { %v1719_v13 = vpop.permute.xlu1 %1718 }
 0xc5a   :  { %4595 = vmatmul.mubr.msk.f32.vlgmr.msra.gmra.mrb[20].mxu1 %vm118_vm0, %v1719_v13 }
 0xc5b   :  { %5010 = vmatpush3.bf16.msra.mxu1 %v5587_v47  ;;  %4616 = vmatprep.mubr.msk.f32.mxu1 %vm5311_vm1, %v5312_v34 }
 0xc5c   :  { %5011 = vmatprep.subr.bf16.mxu1 %v5310_v25 }
 0xc5f   :  { %5013 = vmatpush3.bf16.msra.mxu1 %v5597_v51 }
 0xc60   :  { %5020 = vmatprep.subr.bf16.mxu1 %v5310_v25 }
 0xc62   :  { %4617 = vmatmul.mubr.msk.f32.vlgmr.msra.gmra.mrb[22].mxu1 %vm118_vm0, %v1719_v13 }
 0xc63   :  { %5022 = vmatpush3.bf16.msra.mxu1 %v5670_v59  ;;  %4638 = vmatprep.mubr.msk.f32.mxu1 %vm5311_vm1, %v5312_v34 }
 0xc64   :  { %5023 = vmatprep.subr.bf16.mxu1 %v5310_v25 }
 0xc67   :  { %5025 = vmatpush3.bf16.msra.mxu1 %v5689_v5  ;;  %v1821_v14 = vpop.permute.xlu0 %1820 }
 0xc68   :  { %4606 = vmatmul.mubr.msk.f32.vlgmr.msra.gmra.mrb[32].mxu0 %vm118_vm0, %v1821_v14  ;;  %5032 = vmatprep.subr.bf16.mxu1 %v5310_v25 }
 0xc69   :  { %5016 = vmatpush3.bf16.msra.mxu0 %v5679_v62  ;;  %4627 = vmatprep.mubr.msk.f32.mxu0 %vm5311_vm1, %v5312_v34 }
 0xc6a   :  { %4639 = vmatmul.mubr.msk.f32.vlgmr.msra.gmra.mrb[24].mxu1 %vm118_vm0, %v1821_v14  ;;  %5017 = vmatprep.subr.bf16.mxu0 %v5310_v25 }
 0xc6b   :  { %5034 = vmatpush3.bf16.msra.mxu1 %v5550_v37  ;;  %4660 = vmatprep.mubr.msk.f32.mxu1 %vm5311_vm1, %v5312_v34 }
 0xc6c   :  { %5035 = vmatprep.subr.bf16.mxu1 %v5310_v25 }
 0xc6d   :  { %5019 = vmatpush3.bf16.msra.mxu0 %v5696_v7 }
 0xc6e   :  { %5026 = vmatprep.subr.bf16.mxu0 %v5310_v25 }
 0xc6f   :  { %v1992_v15 = vpop.permute.xlu1 %1991  ;;  %5037 = vmatpush3.bf16.msra.mxu1 %v5556_v39 }
 0xc70   :  { %4628 = vmatmul.mubr.msk.f32.vlgmr.msra.gmra.mrb[34].mxu0 %vm118_vm0, %v1992_v15  ;;  %5044 = vmatprep.subr.bf16.mxu1 %v5310_v25 }
 0xc71   :  { %5028 = vmatpush3.bf16.msra.mxu0 %v5466_v28  ;;  %4649 = vmatprep.mubr.msk.f32.mxu0 %vm5311_vm1, %v5312_v34 }
 0xc72   :  { %5029 = vmatprep.subr.bf16.mxu0 %v5310_v25 }
 0xc75   :  { %5031 = vmatpush3.bf16.msra.mxu0 %v5476_v31 }
 0xc76   :  { %5038 = vmatprep.subr.bf16.mxu0 %v5310_v25 }
 0xd2d   :  { %v1788_v18 = vpop.f32.mrb[20].mxu1 }
 0xd2e   :  { %v1792_v19 = vadd.f32 %v1788_v18, %v405_v17  ;;  %v4596_v21 = vpop.f32.mrb[21].mxu1 }
 0xd30   :  { %v1793_v23 = vmul.f32 %v1792_v19, %v5507_v4 }
 0xd32   :  { %v1794_v38 = vsub.f32 0.0, %v1793_v23 }
 0xd34   :  { %v1795_v53 = vmul.f32 1.442695, %v1794_v38 }
 0xd35   :  { %v1960_v42 = vpop.f32.mrb[22].mxu1 }
 0xd36   :  { %5216 = vpow2.f32 %v1795_v53  ;;  %v4618_v27 = vpop.f32.mrb[23].mxu1 }
 0xd3b   :  { %v1890_v29 = vpop.f32.mrb[32].mxu0 }
 0xd3c   :  { %v1961_v30 = vadd.f32 %v1960_v42, %v1890_v29  ;;  %v4607_v32 = vpop.f32.mrb[33].mxu0 }
 0xd3d   :  { %v2131_v35 = vpop.f32.mrb[24].mxu1 }
 0xd3e   :  { %v1964_v40 = vadd.f32 %v5629_v6, %v1961_v30  ;;  %v4640_v41 = vpop.f32.mrb[25].mxu1 }
 0xd40   :  { %v5217_v43 = vpop.eup %5216  ;;  %v1965_v0 = vmul.f32 %v1964_v40, %v5507_v4 }
 0xd41   :  { %v1797_v55 = vadd.f32 1.0, %v5217_v43 }
 0xd42   :  { %v1966_v44 = vsub.f32 0.0, %v1965_v0 }
 0xd43   :  { %5218 = vrcp.f32 %v1797_v55  ;;  %v2061_v45 = vpop.f32.mrb[34].mxu0 }
 0xd44   :  { %v1967_v46 = vmul.f32 1.442695, %v1966_v44  ;;  %v2132_v22 = vadd.f32 %v2131_v35, %v2061_v45  ;;  %v4629_v33 = vpop.f32.mrb[35].mxu0 }
 0xd46   :  { %5220 = vpow2.f32 %v1967_v46  ;;  %v2135_v36 = vadd.f32 %v5727_v26, %v2132_v22 }
 0xd48   :  { %v2136_v48 = vmul.f32 %v2135_v36, %v5507_v4  ;;  %v5952_v36 = vld [vmem:[%s6233_s4] ss:$0 sm:$0xff] }
 0xd4a   :  { %v2137_v49 = vsub.f32 0.0, %v2136_v48  ;;  %v410_v48 = vadd.f32 %v5952_v36, %v5615_v54 }
 0xd4c   :  { %v2138_v58 = vmul.f32 1.442695, %v2137_v49 }
 0xd4d   :  { %v5219_v60 = vpop.eup %5218 }
 0xd4e   :  { %5222 = vpow2.f32 %v2138_v58  ;;  %v1800_v61 = vmul.f32 %v5219_v60, %v5507_v4 }
 0xd50   :  { %v5221_v2 = vpop.eup %5220  ;;  %v1801_v3 = vadd.f32 %v1800_v61, %v5511_v12 }
 0xd51   :  { %v1969_v16 = vadd.f32 1.0, %v5221_v2 }
 0xd52   :  { %1804 = vrot.lane.b32.xlu0 %v1801_v3, %s5314_s29  ;;  %v1802_v38 = vmul.f32 %v1801_v3, %v5819_v50 }
 0xd53   :  { %5224 = vrcp.f32 %v1969_v16 }
 0xd58   :  { %v5223_v52 = vpop.eup %5222 }
 0xd59   :  { %v2140_v20 = vadd.f32 1.0, %v5223_v52 }
 0xd5b   :  { %5226 = vrcp.f32 %v2140_v20 }
 0xd5d   :  { %v5225_v9 = vpop.eup %5224 }
 0xd5e   :  { %v1972_v10 = vmul.f32 %v5225_v9, %v5507_v4 }
 0xd60   :  { %v1973_v1 = vadd.f32 %v1972_v10, %v5511_v12 }
 0xd62   :  { %1976 = vrot.lane.b32.xlu1 %v1973_v1, %s5314_s29  ;;  %v1974_v29 = vmul.f32 %v1973_v1, %v5824_v63 }
 0xd65   :  { %v5227_v24 = vpop.eup %5226 }
 0xd66   :  { %v2143_v13 = vmul.f32 %v5227_v24, %v5507_v4 }
 0xd68   :  { %v2144_v14 = vadd.f32 %v2143_v13, %v5511_v12 }
 0xd6a   :  { %2147 = vrot.lane.b32.xlu0 %v2144_v14, %s5314_s29  ;;  %v2145_v35 = vmul.f32 %v2144_v14, %v5828_v8 }
 0xdc4   :  { %v1805_v15 = vpop.permute.xlu0 %1804 }
 0xdc5   :  { %v1807_v17 = vmul.f32 %v1805_v15, %v1801_v3 }
 0xdc7   :  { %1809 = vrot.lane.b32.xlu1 %v1807_v17, %s5315_s30 }
 0xdd4   :  { %v1977_v18 = vpop.permute.xlu1 %1976 }
 0xdd5   :  { %v1979_v19 = vmul.f32 %v1977_v18, %v1973_v1 }
 0xdd7   :  { %1981 = vrot.lane.b32.xlu0 %v1979_v19, %s5315_s30 }
 0xddc   :  { %v2148_v21 = vpop.permute.xlu0 %2147 }
 0xddd   :  { %v2150_v23 = vmul.f32 %v2148_v21, %v2144_v14 }
 0xddf   :  { %2152 = vrot.lane.b32.xlu1 %v2150_v23, %s5315_s30 }
 0xe39   :  { %v1810_v53 = vpop.permute.xlu1 %1809 }
 0xe3a   :  { %v5894_v42 = vadd.f32 %v1810_v53, %v1802_v38 }
 0xe3c   :  { %5228 = vtanh.f32 %v5894_v42 }
 0xe46   :  { %v5229_v27 = vpop.eup %5228 }
 0xe47   :  { %1815 = vrot.lane.b32.xlu0 %v5229_v27, %s5314_s29 }
 0xe49   :  { %v1982_v30 = vpop.permute.xlu0 %1981 }
 0xe4a   :  { %v5899_v32 = vadd.f32 %v1982_v30, %v1974_v29 }
 0xe4c   :  { %5230 = vtanh.f32 %v5899_v32 }
 0xe51   :  { %v2153_v40 = vpop.permute.xlu1 %2152 }
 0xe52   :  { %v5903_v41 = vadd.f32 %v2153_v40, %v2145_v35 }
 0xe54   :  { %5232 = vtanh.f32 %v5903_v41 }
 0xe56   :  { %v5231_v50 = vpop.eup %5230 }
 0xe57   :  { %1987 = vrot.lane.b32.xlu1 %v5231_v50, %s5314_s29 }
 0xe5e   :  { %v5233_v43 = vpop.eup %5232 }
 0xe5f   :  { %2158 = vrot.lane.b32.xlu0 %v5233_v43, %s5314_s29 }
 0xeb9   :  { %v1816_v0 = vpop.permute.xlu0 %1815 }
 0xeba   :  { %v1818_v63 = vmul.f32 %v1816_v0, %v1801_v3 }
 0xebc   :  { %2169 = vrot.lane.b32.xlu1 %v1818_v63, %s5315_s30 }
 0xec9   :  { %v1988_v55 = vpop.permute.xlu1 %1987 }
 0xeca   :  { %v1990_v44 = vmul.f32 %v1988_v55, %v1973_v1 }
 0xecc   :  { %2271 = vrot.lane.b32.xlu0 %v1990_v44, %s5315_s30 }
 0xed1   :  { %v2159_v8 = vpop.permute.xlu0 %2158 }
 0xed2   :  { %v5910_v45 = vmul.f32 %v2159_v8, %v2144_v14 }
 0xed4   :  { %2442 = vrot.lane.b32.xlu1 %v5910_v45, %s5315_s30 }
 0xf2e   :  { %v2170_v46 = vpop.permute.xlu1 %2169 }
 0xf2f   :  { %4650 = vmatmul.mubr.msk.f32.vlgmr.msra.gmra.mrb[36].mxu0 %vm118_vm0, %v2170_v46 }
 0xf30   :  { %5040 = vmatpush3.bf16.msra.mxu0 %v5587_v47  ;;  %4671 = vmatprep.mubr.msk.f32.mxu0 %vm5311_vm1, %v5312_v34 }
 0xf31   :  { %5041 = vmatprep.subr.bf16.mxu0 %v5310_v25 }
 0xf34   :  { %5043 = vmatpush3.bf16.msra.mxu0 %v5597_v51 }
 0xf35   :  { %5050 = vmatprep.subr.bf16.mxu0 %v5310_v25 }
 0xf37   :  { %4672 = vmatmul.mubr.msk.f32.vlgmr.msra.gmra.mrb[38].mxu0 %vm118_vm0, %v2170_v46 }
 0xf38   :  { %5052 = vmatpush3.bf16.msra.mxu0 %v5670_v59  ;;  %4693 = vmatprep.mubr.msk.f32.mxu0 %vm5311_vm1, %v5312_v34 }
 0xf39   :  { %5053 = vmatprep.subr.bf16.mxu0 %v5310_v25 }
 0xf3c   :  { %5055 = vmatpush3.bf16.msra.mxu0 %v5689_v5 }
 0xf3d   :  { %5062 = vmatprep.subr.bf16.mxu0 %v5310_v25 }
 0xf3e   :  { %v2272_v22 = vpop.permute.xlu0 %2271 }
 0xf3f   :  { %4661 = vmatmul.mubr.msk.f32.vlgmr.msra.gmra.mrb[26].mxu1 %vm118_vm0, %v2272_v22  ;;  %4694 = vmatmul.mubr.msk.f32.vlgmr.msra.gmra.mrb[40].mxu0 %vm118_vm0, %v2272_v22 }
 0xf40   :  { %5046 = vmatpush3.bf16.msra.mxu1 %v5679_v62  ;;  %4682 = vmatprep.mubr.msk.f32.mxu1 %vm5311_vm1, %v5312_v34 }
 0xf41   :  { %5047 = vmatprep.subr.bf16.mxu1 %v5310_v25  ;;  %5064 = vmatpush3.bf16.msra.mxu0 %v5550_v37 }
 0xf42   :  { %5065 = vmatprep.subr.bf16.mxu0 %v5310_v25  ;;  %4715 = vmatprep.mubr.msk.f32.mxu0 %vm5311_vm1, %v5312_v34 }
 0xf44   :  { %5049 = vmatpush3.bf16.msra.mxu1 %v5696_v7 }
 0xf45   :  { %5056 = vmatprep.subr.bf16.mxu1 %v5310_v25  ;;  %5067 = vmatpush3.bf16.msra.mxu0 %v5556_v39 }
 0xf46   :  { %v2443_v33 = vpop.permute.xlu1 %2442  ;;  %5074 = vmatprep.subr.bf16.mxu0 %v5310_v25 }
 0xf47   :  { %4683 = vmatmul.mubr.msk.f32.vlgmr.msra.gmra.mrb[28].mxu1 %vm118_vm0, %v2443_v33 }
 0xf48   :  { %5058 = vmatpush3.bf16.msra.mxu1 %v5466_v28  ;;  %4704 = vmatprep.mubr.msk.f32.mxu1 %vm5311_vm1, %v5312_v34 }
 0xf49   :  { %5059 = vmatprep.subr.bf16.mxu1 %v5310_v25 }
 0xf4c   :  { %5061 = vmatpush3.bf16.msra.mxu1 %v5476_v31 }
 0xf4d   :  { %5068 = vmatprep.subr.bf16.mxu1 %v5310_v25 }
0x1002   :  { %v2239_v49 = vpop.f32.mrb[36].mxu0 }
0x1003   :  { %v2243_v58 = vadd.f32 %v2239_v49, %v410_v48  ;;  %v4651_v60 = vpop.f32.mrb[37].mxu0 }
0x1005   :  { %v2244_v61 = vmul.f32 %v2243_v58, %v5507_v4 }
0x1007   :  { %v2245_v2 = vsub.f32 0.0, %v2244_v61 }
0x1009   :  { %v2246_v3 = vmul.f32 1.442695, %v2245_v2 }
0x100a   :  { %v2411_v16 = vpop.f32.mrb[38].mxu0 }
0x100b   :  { %5234 = vpow2.f32 %v2246_v3  ;;  %v4673_v52 = vpop.f32.mrb[39].mxu0 }
0x1012   :  { %v2341_v20 = vpop.f32.mrb[26].mxu1  ;;  %v2582_v9 = vpop.f32.mrb[40].mxu0 }
0x1013   :  { %v2412_v10 = vadd.f32 %v2411_v16, %v2341_v20  ;;  %v4662_v1 = vpop.f32.mrb[27].mxu1  ;;  %v4695_v24 = vpop.f32.mrb[41].mxu0 }
0x1015   :  { %v5235_v13 = vpop.eup %5234  ;;  %v2415_v14 = vadd.f32 %v5629_v6, %v2412_v10 }
0x1016   :  { %v2248_v15 = vadd.f32 1.0, %v5235_v13 }
0x1017   :  { %v2416_v54 = vmul.f32 %v2415_v14, %v5507_v4 }
0x1018   :  { %5236 = vrcp.f32 %v2248_v15 }
0x1019   :  { %v2417_v17 = vsub.f32 0.0, %v2416_v54 }
0x101a   :  { %v2512_v18 = vpop.f32.mrb[28].mxu1 }
0x101b   :  { %v2418_v19 = vmul.f32 1.442695, %v2417_v17  ;;  %v2583_v21 = vadd.f32 %v2582_v9, %v2512_v18  ;;  %v4684_v23 = vpop.f32.mrb[29].mxu1 }
0x101d   :  { %5238 = vpow2.f32 %v2418_v19  ;;  %v2586_v38 = vadd.f32 %v5727_v26, %v2583_v21 }
0x101f   :  { %v2587_v53 = vmul.f32 %v2586_v38, %v5507_v4  ;;  %v415_v38 = vadd.f32 %v5952_v36, %v5621_v57  ;;  %v6035_v57 = vld [vmem:[%s6236_s7] ss:$0 sm:$0xff] }
0x1021   :  { %v2588_v27 = vsub.f32 0.0, %v2587_v53 }
0x1022   :  { %v5237_v29 = vpop.eup %5236 }
0x1023   :  { %v2589_v30 = vmul.f32 1.442695, %v2588_v27  ;;  %v2251_v35 = vmul.f32 %v5237_v29, %v5507_v4 }
0x1025   :  { %5240 = vpow2.f32 %v2589_v30  ;;  %v2252_v6 = vadd.f32 %v2251_v35, %v5511_v12 }
0x1027   :  { %v5239_v40 = vpop.eup %5238  ;;  %2255 = vrot.lane.b32.xlu0 %v2252_v6, %s5314_s29  ;;  %v2253_v2 = vmul.f32 %v2252_v6, %v5894_v42 }
0x1028   :  { %v2420_v50 = vadd.f32 1.0, %v5239_v40 }
0x102a   :  { %5242 = vrcp.f32 %v2420_v50 }
0x102f   :  { %v5241_v43 = vpop.eup %5240 }
0x1030   :  { %v2591_v0 = vadd.f32 1.0, %v5241_v43 }
0x1032   :  { %5244 = vrcp.f32 %v2591_v0 }
0x1034   :  { %v5243_v63 = vpop.eup %5242 }
0x1035   :  { %v2423_v55 = vmul.f32 %v5243_v63, %v5507_v4 }
0x1037   :  { %v2424_v44 = vadd.f32 %v2423_v55, %v5511_v12 }
0x1039   :  { %2427 = vrot.lane.b32.xlu1 %v2424_v44, %s5314_s29  ;;  %v2425_v20 = vmul.f32 %v2424_v44, %v5899_v32 }
0x103c   :  { %v5245_v8 = vpop.eup %5244 }
0x103d   :  { %v2594_v46 = vmul.f32 %v5245_v8, %v5507_v4 }
0x103f   :  { %v2595_v22 = vadd.f32 %v2594_v46, %v5511_v12 }
0x1041   :  { %2598 = vrot.lane.b32.xlu0 %v2595_v22, %s5314_s29  ;;  %v2596_v1 = vmul.f32 %v2595_v22, %v5903_v41 }
0x1099   :  { %v2256_v33 = vpop.permute.xlu0 %2255 }
0x109a   :  { %v2258_v48 = vmul.f32 %v2256_v33, %v2252_v6 }
0x109c   :  { %2260 = vrot.lane.b32.xlu1 %v2258_v48, %s5315_s30 }
0x10ab   :  { %v2428_v49 = vpop.permute.xlu1 %2427 }
0x10ac   :  { %v2430_v58 = vmul.f32 %v2428_v49, %v2424_v44 }
0x10ae   :  { %2432 = vrot.lane.b32.xlu0 %v2430_v58, %s5315_s30 }
0x10b3   :  { %v2599_v60 = vpop.permute.xlu0 %2598 }
0x10b4   :  { %v2601_v61 = vmul.f32 %v2599_v60, %v2595_v22 }
0x10b6   :  { %2603 = vrot.lane.b32.xlu1 %v2601_v61, %s5315_s30 }
0x110e   :  { %v2261_v3 = vpop.permute.xlu1 %2260 }
0x110f   :  { %v5974_v16 = vadd.f32 %v2261_v3, %v2253_v2 }
0x1111   :  { %5246 = vtanh.f32 %v5974_v16 }
0x111b   :  { %v5247_v52 = vpop.eup %5246 }
0x111c   :  { %2266 = vrot.lane.b32.xlu0 %v5247_v52, %s5314_s29 }
0x1120   :  { %v2433_v9 = vpop.permute.xlu0 %2432 }
0x1121   :  { %v5979_v10 = vadd.f32 %v2433_v9, %v2425_v20 }
0x1123   :  { %5248 = vtanh.f32 %v5979_v10 }
0x1128   :  { %v2604_v24 = vpop.permute.xlu1 %2603 }
0x1129   :  { %v5983_v13 = vadd.f32 %v2604_v24, %v2596_v1 }
0x112b   :  { %5250 = vtanh.f32 %v5983_v13 }
0x112d   :  { %v5249_v42 = vpop.eup %5248 }
0x112e   :  { %2438 = vrot.lane.b32.xlu1 %v5249_v42, %s5314_s29 }
0x1135   :  { %v5251_v14 = vpop.eup %5250 }
0x1136   :  { %2609 = vrot.lane.b32.xlu0 %v5251_v14, %s5314_s29 }
0x118e   :  { %v2267_v15 = vpop.permute.xlu0 %2266 }
0x118f   :  { %v2269_v32 = vmul.f32 %v2267_v15, %v2252_v6 }
0x1191   :  { %2616 = vrot.lane.b32.xlu1 %v2269_v32, %s5315_s30 }
0x11a0   :  { %v2439_v54 = vpop.permute.xlu1 %2438 }
0x11a1   :  { %v2441_v17 = vmul.f32 %v2439_v54, %v2424_v44 }
0x11a3   :  { %2718 = vrot.lane.b32.xlu0 %v2441_v17, %s5315_s30 }
0x11a8   :  { %v2610_v41 = vpop.permute.xlu0 %2609 }
0x11a9   :  { %v5990_v18 = vmul.f32 %v2610_v41, %v2595_v22 }
0x11ab   :  { %2890 = vrot.lane.b32.xlu1 %v5990_v18, %s5315_s30 }
0x1203   :  { %v2617_v19 = vpop.permute.xlu1 %2616 }
0x1204   :  { %4705 = vmatmul.mubr.msk.f32.vlgmr.msra.gmra.mrb[30].mxu1 %vm118_vm0, %v2617_v19 }
0x1205   :  { %5070 = vmatpush3.bf16.msra.mxu1 %v5587_v47  ;;  %4726 = vmatprep.mubr.msk.f32.mxu1 %vm5311_vm1, %v5312_v34 }
0x1206   :  { %5071 = vmatprep.subr.bf16.mxu1 %v5310_v25 }
0x1209   :  { %5073 = vmatpush3.bf16.msra.mxu1 %v5597_v51 }
0x120a   :  { %5080 = vmatprep.subr.bf16.mxu1 %v5310_v25 }
0x120c   :  { %4727 = vmatmul.mubr.msk.f32.vlgmr.msra.gmra.mrb[32].mxu1 %vm118_vm0, %v2617_v19 }
0x120d   :  { %5082 = vmatpush3.bf16.msra.mxu1 %v5670_v59  ;;  %4748 = vmatprep.mubr.msk.f32.mxu1 %vm5311_vm1, %v5312_v34 }
0x120e   :  { %5083 = vmatprep.subr.bf16.mxu1 %v5310_v25 }
0x1211   :  { %5085 = vmatpush3.bf16.msra.mxu1 %v5689_v5 }
0x1212   :  { %5092 = vmatprep.subr.bf16.mxu1 %v5310_v25 }
0x1215   :  { %v2719_v21 = vpop.permute.xlu0 %2718 }
0x1216   :  { %4716 = vmatmul.mubr.msk.f32.vlgmr.msra.gmra.mrb[42].mxu0 %vm118_vm0, %v2719_v21  ;;  %4749 = vmatmul.mubr.msk.f32.vlgmr.msra.gmra.mrb[34].mxu1 %vm118_vm0, %v2719_v21 }
0x1217   :  { %5076 = vmatpush3.bf16.msra.mxu0 %v5679_v62  ;;  %4737 = vmatprep.mubr.msk.f32.mxu0 %vm5311_vm1, %v5312_v34 }
0x1218   :  { %5077 = vmatprep.subr.bf16.mxu0 %v5310_v25  ;;  %5094 = vmatpush3.bf16.msra.mxu1 %v5550_v37 }
0x1219   :  { %5095 = vmatprep.subr.bf16.mxu1 %v5310_v25  ;;  %4770 = vmatprep.mubr.msk.f32.mxu1 %vm5311_vm1, %v5312_v34 }
0x121b   :  { %5079 = vmatpush3.bf16.msra.mxu0 %v5696_v7 }
0x121c   :  { %5086 = vmatprep.subr.bf16.mxu0 %v5310_v25  ;;  %5097 = vmatpush3.bf16.msra.mxu1 %v5556_v39 }
0x121d   :  { %v2891_v23 = vpop.permute.xlu1 %2890  ;;  %5104 = vmatprep.subr.bf16.mxu1 %v5310_v25 }
0x121e   :  { %4738 = vmatmul.mubr.msk.f32.vlgmr.msra.gmra.mrb[44].mxu0 %vm118_vm0, %v2891_v23 }
0x121f   :  { %5088 = vmatpush3.bf16.msra.mxu0 %v5466_v28  ;;  %4759 = vmatprep.mubr.msk.f32.mxu0 %vm5311_vm1, %v5312_v34 }
0x1220   :  { %5089 = vmatprep.subr.bf16.mxu0 %v5310_v25 }
0x1223   :  { %5091 = vmatpush3.bf16.msra.mxu0 %v5476_v31 }
0x1224   :  { %5098 = vmatprep.subr.bf16.mxu0 %v5310_v25 }
0x12d7   :  { %v2686_v53 = vpop.f32.mrb[30].mxu1 }
0x12d8   :  { %v2690_v27 = vadd.f32 %v2686_v53, %v415_v38  ;;  %v4706_v29 = vpop.f32.mrb[31].mxu1 }
0x12da   :  { %v2691_v30 = vmul.f32 %v2690_v27, %v5507_v4 }
0x12dc   :  { %v2692_v35 = vsub.f32 0.0, %v2691_v30 }
0x12de   :  { %v2693_v6 = vmul.f32 1.442695, %v2692_v35 }
0x12df   :  { %v2858_v28 = vpop.f32.mrb[32].mxu1 }
0x12e0   :  { %5252 = vpow2.f32 %v2693_v6  ;;  %v4728_v40 = vpop.f32.mrb[33].mxu1 }
0x12e9   :  { %v2788_v50 = vpop.f32.mrb[42].mxu0  ;;  %v3030_v43 = vpop.f32.mrb[34].mxu1 }
0x12ea   :  { %v5253_v0 = vpop.eup %5252  ;;  %v2859_v63 = vadd.f32 %v2858_v28, %v2788_v50  ;;  %v4717_v31 = vpop.f32.mrb[43].mxu0 }
0x12eb   :  { %v4750_v55 = vpop.f32.mrb[35].mxu1  ;;  %v2695_v44 = vadd.f32 1.0, %v5253_v0 }
0x12ec   :  { %v2862_v8 = vadd.f32 %v6035_v57, %v2859_v63 }
0x12ed   :  { %5254 = vrcp.f32 %v2695_v44 }
0x12ee   :  { %v2863_v46 = vmul.f32 %v2862_v8, %v5507_v4 }
0x12f0   :  { %v2864_v22 = vsub.f32 0.0, %v2863_v46 }
0x12f1   :  { %v2960_v33 = vpop.f32.mrb[44].mxu0 }
0x12f2   :  { %v2865_v48 = vmul.f32 1.442695, %v2864_v22  ;;  %v3031_v49 = vadd.f32 %v3030_v43, %v2960_v33  ;;  %v4739_v58 = vpop.f32.mrb[45].mxu0 }
0x12f4   :  { %5256 = vpow2.f32 %v2865_v48  ;;  %v3034_v60 = vadd.f32 %v5727_v26, %v3031_v49 }
0x12f6   :  { %v3035_v61 = vmul.f32 %v3034_v60, %v5507_v4 }
0x12f7   :  { %v5255_v2 = vpop.eup %5254 }
0x12f8   :  { %v3036_v3 = vsub.f32 0.0, %v3035_v61  ;;  %v2698_v52 = vmul.f32 %v5255_v2, %v5507_v4 }
0x12fa   :  { %v3037_v20 = vmul.f32 1.442695, %v3036_v3  ;;  %v2699_v9 = vadd.f32 %v2698_v52, %v5511_v12 }
0x12fc   :  { %5258 = vpow2.f32 %v3037_v20  ;;  %2702 = vrot.lane.b32.xlu0 %v2699_v9, %s5314_s29  ;;  %v2700_v29 = vmul.f32 %v2699_v9, %v5974_v16 }
0x12fe   :  { %v5257_v1 = vpop.eup %5256 }
0x12ff   :  { %v2867_v24 = vadd.f32 1.0, %v5257_v1 }
0x1301   :  { %5260 = vrcp.f32 %v2867_v24 }
0x1306   :  { %v5259_v42 = vpop.eup %5258 }
0x1307   :  { %v3039_v14 = vadd.f32 1.0, %v5259_v42 }
0x1309   :  { %5262 = vrcp.f32 %v3039_v14 }
0x130b   :  { %v5261_v15 = vpop.eup %5260 }
0x130c   :  { %v2870_v26 = vmul.f32 %v5261_v15, %v5507_v4 }
0x130e   :  { %v2871_v32 = vadd.f32 %v2870_v26, %v5511_v12 }
0x1310   :  { %2874 = vrot.lane.b32.xlu1 %v2871_v32, %s5314_s29  ;;  %v2872_v28 = vmul.f32 %v2871_v32, %v5979_v10 }
0x1313   :  { %v5263_v54 = vpop.eup %5262 }
0x1314   :  { %v3042_v17 = vmul.f32 %v5263_v54, %v5507_v4 }
0x1316   :  { %v3043_v41 = vadd.f32 %v3042_v17, %v5511_v12  ;;  %v6118_v17 = vld [vmem:[%s6239_s10] ss:$0 sm:$0xff] }
0x1318   :  { %3046 = vrot.lane.b32.xlu0 %v3043_v41, %s5314_s29  ;;  %v3044_v43 = vmul.f32 %v3043_v41, %v5983_v13 }
0x136e   :  { %v2703_v19 = vpop.permute.xlu0 %2702 }
0x136f   :  { %v2705_v21 = vmul.f32 %v2703_v19, %v2699_v9 }
0x1371   :  { %2707 = vrot.lane.b32.xlu1 %v2705_v21, %s5315_s30 }
0x1382   :  { %v2875_v23 = vpop.permute.xlu1 %2874 }
0x1383   :  { %v2877_v38 = vmul.f32 %v2875_v23, %v2871_v32 }
0x1385   :  { %2879 = vrot.lane.b32.xlu0 %v2877_v38, %s5315_s30 }
0x138a   :  { %v3047_v53 = vpop.permute.xlu0 %3046 }
0x138b   :  { %v3049_v27 = vmul.f32 %v3047_v53, %v3043_v41 }
0x138d   :  { %3051 = vrot.lane.b32.xlu1 %v3049_v27, %s5315_s30 }
0x13e3   :  { %v2708_v30 = vpop.permute.xlu1 %2707 }
0x13e4   :  { %v6054_v35 = vadd.f32 %v2708_v30, %v2700_v29 }
0x13e6   :  { %5264 = vtanh.f32 %v6054_v35 }
0x13f0   :  { %v5265_v6 = vpop.eup %5264 }
0x13f1   :  { %2713 = vrot.lane.b32.xlu0 %v5265_v6, %s5314_s29 }
0x13f7   :  { %v2880_v40 = vpop.permute.xlu0 %2879 }
0x13f8   :  { %v6059_v50 = vadd.f32 %v2880_v40, %v2872_v28 }
0x13fa   :  { %5266 = vtanh.f32 %v6059_v50 }
0x13ff   :  { %v3052_v0 = vpop.permute.xlu1 %3051 }
0x1400   :  { %v6063_v63 = vadd.f32 %v3052_v0, %v3044_v43 }
0x1402   :  { %5268 = vtanh.f32 %v6063_v63 }
0x1404   :  { %v5267_v16 = vpop.eup %5266 }
0x1405   :  { %2885 = vrot.lane.b32.xlu1 %v5267_v16, %s5314_s29 }
0x140c   :  { %v5269_v31 = vpop.eup %5268 }
0x140d   :  { %3057 = vrot.lane.b32.xlu0 %v5269_v31, %s5314_s29 }
0x1463   :  { %v2714_v55 = vpop.permute.xlu0 %2713 }
0x1464   :  { %v2716_v10 = vmul.f32 %v2714_v55, %v2699_v9 }
0x1466   :  { %3067 = vrot.lane.b32.xlu1 %v2716_v10, %s5315_s30 }
0x1477   :  { %v2886_v44 = vpop.permute.xlu1 %2885 }
0x1478   :  { %v2888_v8 = vmul.f32 %v2886_v44, %v2871_v32 }
0x147a   :  { %3169 = vrot.lane.b32.xlu0 %v2888_v8, %s5315_s30 }
0x147f   :  { %v3058_v13 = vpop.permute.xlu0 %3057 }
0x1480   :  { %v3060_v46 = vmul.f32 %v3058_v13, %v3043_v41 }
0x1482   :  { %3062 = vrot.lane.b32.xlu1 %v3060_v46, %s5315_s30 }
0x14d8   :  { %v3068_v22 = vpop.permute.xlu1 %3067 }
0x14d9   :  { %4760 = vmatmul.mubr.msk.f32.vlgmr.msra.gmra.mrb[46].mxu0 %vm118_vm0, %v3068_v22 }
0x14da   :  { %5100 = vmatpush3.bf16.msra.mxu0 %v5587_v47  ;;  %4781 = vmatprep.mubr.msk.f32.mxu0 %vm5311_vm1, %v5312_v34 }
0x14db   :  { %5101 = vmatprep.subr.bf16.mxu0 %v5310_v25 }
0x14de   :  { %5103 = vmatpush3.bf16.msra.mxu0 %v5597_v51 }
0x14df   :  { %5110 = vmatprep.subr.bf16.mxu0 %v5310_v25 }
0x14e1   :  { %4782 = vmatmul.mubr.msk.f32.vlgmr.msra.gmra.mrb[48].mxu0 %vm118_vm0, %v3068_v22 }
0x14e2   :  { %5112 = vmatpush3.bf16.msra.mxu0 %v5670_v59  ;;  %4803 = vmatprep.mubr.msk.f32.mxu0 %vm5311_vm1, %v5312_v34 }
0x14e3   :  { %5113 = vmatprep.subr.bf16.mxu0 %v5310_v25 }
0x14e6   :  { %5115 = vmatpush3.bf16.msra.mxu0 %v5689_v5 }
0x14e7   :  { %5122 = vmatprep.subr.bf16.mxu0 %v5310_v25 }
0x14ec   :  { %v3170_v33 = vpop.permute.xlu0 %3169 }
0x14ed   :  { %4771 = vmatmul.mubr.msk.f32.vlgmr.msra.gmra.mrb[36].mxu1 %vm118_vm0, %v3170_v33  ;;  %4804 = vmatmul.mubr.msk.f32.vlgmr.msra.gmra.mrb[50].mxu0 %vm118_vm0, %v3170_v33 }
0x14ee   :  { %5106 = vmatpush3.bf16.msra.mxu1 %v5679_v62  ;;  %4792 = vmatprep.mubr.msk.f32.mxu1 %vm5311_vm1, %v5312_v34 }
0x14ef   :  { %5107 = vmatprep.subr.bf16.mxu1 %v5310_v25  ;;  %5124 = vmatpush3.bf16.msra.mxu0 %v5587_v47  ;;  %v420_v47 = vadd.f32 %v5952_v36, %v5619_v56 }
0x14f0   :  { %5125 = vmatprep.subr.bf16.mxu0 %v5310_v25  ;;  %4825 = vmatprep.mubr.msk.f32.mxu0 %vm5311_vm1, %v5312_v34 }
0x14f2   :  { %5109 = vmatpush3.bf16.msra.mxu1 %v5696_v7 }
0x14f3   :  { %5127 = vmatpush3.bf16.msra.mxu0 %v5597_v51  ;;  %5116 = vmatprep.subr.bf16.mxu1 %v5310_v25 }
0x14f4   :  { %v3063_v48 = vpop.permute.xlu1 %3062  ;;  %5134 = vmatprep.subr.bf16.mxu0 %v5310_v25 }
0x14f5   :  { %3065 = vst.msk [vmem:[%s6240_s11 + $0x8] sm:$0xff] %vm118_vm0, %v3063_v48  ;;  %4793 = vmatmul.mubr.msk.f32.vlgmr.msra.gmra.mrb[38].mxu1 %vm118_vm0, %v3063_v48 }
0x14f6   :  { %5118 = vmatpush3.bf16.msra.mxu1 %v5550_v37  ;;  %4814 = vmatprep.mubr.msk.f32.mxu1 %vm5311_vm1, %v5312_v34 }
0x14f7   :  { %5119 = vmatprep.subr.bf16.mxu1 %v5310_v25 }
0x14fa   :  { %5121 = vmatpush3.bf16.msra.mxu1 %v5556_v39 }
0x14fb   :  { %5128 = vmatprep.subr.bf16.mxu1 %v5310_v25 }
0x15ac   :  { %v3137_v51 = vpop.f32.mrb[46].mxu0 }
0x15ad   :  { %v3141_v49 = vadd.f32 %v3137_v51, %v420_v47  ;;  %v4761_v58 = vpop.f32.mrb[47].mxu0 }
0x15af   :  { %v3142_v60 = vmul.f32 %v3141_v49, %v5507_v4 }
0x15b1   :  { %v3143_v61 = vsub.f32 0.0, %v3142_v60 }
0x15b3   :  { %v3144_v2 = vmul.f32 1.442695, %v3143_v61 }
0x15b4   :  { %v3309_v37 = vpop.f32.mrb[48].mxu0 }
0x15b5   :  { %5270 = vpow2.f32 %v3144_v2  ;;  %v4783_v3 = vpop.f32.mrb[49].mxu0 }
0x15bf   :  { %v5271_v52 = vpop.eup %5270 }
0x15c0   :  { %v3146_v20 = vadd.f32 1.0, %v5271_v52  ;;  %v3239_v9 = vpop.f32.mrb[36].mxu1  ;;  %v3478_v1 = vpop.f32.mrb[50].mxu0 }
0x15c1   :  { %v3310_v39 = vadd.f32 %v3309_v37, %v3239_v9  ;;  %v4772_v24 = vpop.f32.mrb[37].mxu1  ;;  %v4805_v42 = vpop.f32.mrb[51].mxu0 }
0x15c2   :  { %5272 = vrcp.f32 %v3146_v20 }
0x15c3   :  { %v3313_v56 = vadd.f32 %v6035_v57, %v3310_v39 }
0x15c5   :  { %v3314_v36 = vmul.f32 %v3313_v56, %v5507_v4 }
0x15c7   :  { %v3315_v14 = vsub.f32 0.0, %v3314_v36 }
0x15c8   :  { %v3408_v15 = vpop.f32.mrb[38].mxu1 }
0x15c9   :  { %v3316_v26 = vmul.f32 1.442695, %v3315_v14  ;;  %v3479_v32 = vadd.f32 %v3478_v1, %v3408_v15  ;;  %v4794_v54 = vpop.f32.mrb[39].mxu1 }
0x15cb   :  { %5274 = vpow2.f32 %v3316_v26  ;;  %v3482_v41 = vadd.f32 %v6118_v17, %v3479_v32 }
0x15cc   :  { %v5273_v19 = vpop.eup %5272 }
0x15cd   :  { %v3483_v21 = vmul.f32 %v3482_v41, %v5507_v4  ;;  %v3149_v23 = vmul.f32 %v5273_v19, %v5507_v4 }
0x15cf   :  { %v3484_v38 = vsub.f32 0.0, %v3483_v21  ;;  %v3150_v53 = vadd.f32 %v3149_v23, %v5511_v12 }
0x15d1   :  { %v3485_v27 = vmul.f32 1.442695, %v3484_v38  ;;  %3153 = vrot.lane.b32.xlu0 %v3150_v53, %s5314_s29  ;;  %v3151_v33 = vmul.f32 %v3150_v53, %v6054_v35 }
0x15d3   :  { %5276 = vpow2.f32 %v3485_v27 }
0x15d5   :  { %v5275_v29 = vpop.eup %5274 }
0x15d6   :  { %v3318_v30 = vadd.f32 1.0, %v5275_v29 }
0x15d8   :  { %5278 = vrcp.f32 %v3318_v30 }
0x15dd   :  { %v5277_v6 = vpop.eup %5276 }
0x15de   :  { %v3487_v28 = vadd.f32 1.0, %v5277_v6 }
0x15e0   :  { %5280 = vrcp.f32 %v3487_v28 }
0x15e2   :  { %v5279_v40 = vpop.eup %5278 }
0x15e3   :  { %v3321_v43 = vmul.f32 %v5279_v40, %v5507_v4 }
0x15e5   :  { %v3322_v0 = vadd.f32 %v3321_v43, %v5511_v12 }
0x15e7   :  { %3325 = vrot.lane.b32.xlu1 %v3322_v0, %s5314_s29  ;;  %v3323_v49 = vmul.f32 %v3322_v0, %v6059_v50 }
0x15ea   :  { %v5281_v16 = vpop.eup %5280 }
0x15eb   :  { %v3490_v31 = vmul.f32 %v5281_v16, %v5507_v4 }
0x15ed   :  { %v3491_v55 = vadd.f32 %v3490_v31, %v5511_v12 }
0x15ef   :  { %3494 = vrot.lane.b32.xlu0 %v3491_v55, %s5314_s29  ;;  %v3492_v61 = vmul.f32 %v3491_v55, %v6063_v63 }
0x1643   :  { %v3154_v10 = vpop.permute.xlu0 %3153 }
0x1644   :  { %v3156_v44 = vmul.f32 %v3154_v10, %v3150_v53 }
0x1646   :  { %3158 = vrot.lane.b32.xlu1 %v3156_v44, %s5315_s30 }
0x1659   :  { %v3326_v8 = vpop.permute.xlu1 %3325 }
0x165a   :  { %v3328_v13 = vmul.f32 %v3326_v8, %v3322_v0 }
0x165c   :  { %3330 = vrot.lane.b32.xlu0 %v3328_v13, %s5315_s30 }
0x1661   :  { %v3495_v46 = vpop.permute.xlu0 %3494 }
0x1662   :  { %v3497_v22 = vmul.f32 %v3495_v46, %v3491_v55 }
0x1664   :  { %3499 = vrot.lane.b32.xlu1 %v3497_v22, %s5315_s30 }
0x16b8   :  { %v3159_v48 = vpop.permute.xlu1 %3158 }
0x16b9   :  { %v3161_v47 = vadd.f32 %v3159_v48, %v3151_v33 }
0x16bb   :  { %5282 = vtanh.f32 %v3161_v47 }
0x16c5   :  { %v5283_v51 = vpop.eup %5282 }
0x16c6   :  { %3164 = vrot.lane.b32.xlu0 %v5283_v51, %s5314_s29 }
0x16ce   :  { %v3331_v58 = vpop.permute.xlu0 %3330 }
0x16cf   :  { %v6137_v60 = vadd.f32 %v3331_v58, %v3323_v49 }
0x16d1   :  { %5284 = vtanh.f32 %v6137_v60 }
0x16d6   :  { %v3500_v2 = vpop.permute.xlu1 %3499 }
0x16d7   :  { %v6141_v37 = vadd.f32 %v3500_v2, %v3492_v61 }
0x16d9   :  { %5286 = vtanh.f32 %v6141_v37 }
0x16db   :  { %v5285_v35 = vpop.eup %5284 }
0x16dc   :  { %3336 = vrot.lane.b32.xlu1 %v5285_v35, %s5314_s29 }
0x16e3   :  { %v5287_v3 = vpop.eup %5286 }
0x16e4   :  { %3505 = vrot.lane.b32.xlu0 %v5287_v3, %s5314_s29 }
0x1738   :  { %v3165_v52 = vpop.permute.xlu0 %3164 }
0x1739   :  { %v3167_v50 = vmul.f32 %v3165_v52, %v3150_v53 }
0x173b   :  { %3590 = vrot.lane.b32.xlu0 %v3167_v50, %s5315_s30 }
0x174e   :  { %v3337_v20 = vpop.permute.xlu1 %3336 }
0x174f   :  { %v3339_v9 = vmul.f32 %v3337_v20, %v3322_v0 }
0x1751   :  { %3515 = vrot.lane.b32.xlu1 %v3339_v9, %s5315_s30 }
0x1756   :  { %v3506_v63 = vpop.permute.xlu0 %3505 }
0x1757   :  { %v6148_v1 = vmul.f32 %v3506_v63, %v3491_v55 }
0x1759   :  { %3691 = vrot.lane.b32.xlu1 %v6148_v1, %s5315_s30 }
0x17ad   :  { %v3591_v39 = vpop.permute.xlu0 %3590 }
0x17ae   :  { %4826 = vmatmul.mubr.msk.f32.vlgmr.msra.gmra.mrb[52].mxu0 %vm118_vm0, %v3591_v39 }
0x17af   :  { %5136 = vmatpush3.bf16.msra.mxu0 %v5670_v59  ;;  %4847 = vmatprep.mubr.msk.f32.mxu0 %vm5311_vm1, %v5312_v34 }
0x17b0   :  { %5137 = vmatprep.subr.bf16.mxu0 %v5310_v25 }
0x17b3   :  { %5139 = vmatpush3.bf16.msra.mxu0 %v5689_v5 }
0x17b4   :  { %5146 = vmatprep.subr.bf16.mxu0 %v5310_v25 }
0x17c3   :  { %v3516_v24 = vpop.permute.xlu1 %3515 }
0x17c4   :  { %4815 = vmatmul.mubr.msk.f32.vlgmr.msra.gmra.mrb[40].mxu1 %vm118_vm0, %v3516_v24  ;;  %4848 = vmatmul.mubr.msk.f32.vlgmr.msra.gmra.mrb[54].mxu0 %vm118_vm0, %v3516_v24 }
0x17c5   :  { %5130 = vmatpush3.bf16.msra.mxu1 %v5679_v62  ;;  %4836 = vmatprep.mubr.msk.f32.mxu1 %vm5311_vm1, %v5312_v34 }
0x17c6   :  { %5131 = vmatprep.subr.bf16.mxu1 %v5310_v25  ;;  %5148 = vmatpush3.bf16.msra.mxu0 %v5670_v59 }
0x17c7   :  { %5149 = vmatprep.subr.bf16.mxu0 %v5310_v25  ;;  %4869 = vmatprep.mubr.msk.f32.mxu0 %vm5311_vm1, %v5312_v34 }
0x17c9   :  { %5133 = vmatpush3.bf16.msra.mxu1 %v5696_v7 }
0x17ca   :  { %5151 = vmatpush3.bf16.msra.mxu0 %v5689_v5  ;;  %5140 = vmatprep.subr.bf16.mxu1 %v5310_v25 }
0x17cb   :  { %v3692_v42 = vpop.permute.xlu1 %3691 }
0x17cc   :  { %4837 = vmatmul.mubr.msk.f32.vlgmr.msra.gmra.mrb[42].mxu1 %vm118_vm0, %v3692_v42 }
0x17cd   :  { %5142 = vmatpush3.bf16.msra.mxu1 %v5679_v62  ;;  %4858 = vmatprep.mubr.msk.f32.mxu1 %vm5311_vm1, %v5312_v34 }
0x17ce   :  { %5143 = vmatprep.subr.bf16.mxu1 %v5310_v25 }
0x17d1   :  { %5145 = vmatpush3.bf16.msra.mxu1 %v5696_v7 }
0x1881   :  { %v3660_v59 = vpop.f32.mrb[52].mxu0 }
0x1882   :  { %v4827_v56 = vpop.f32.mrb[53].mxu0 }
0x1897   :  { %v3585_v36 = vpop.f32.mrb[40].mxu1  ;;  %v3831_v14 = vpop.f32.mrb[54].mxu0 }
0x1898   :  { %v3661_v15 = vadd.f32 %v3660_v59, %v3585_v36  ;;  %v4816_v5 = vpop.f32.mrb[41].mxu1  ;;  %v4849_v26 = vpop.f32.mrb[55].mxu0 }
0x189a   :  { %v3664_v32 = vadd.f32 %v6035_v57, %v3661_v15 }
0x189c   :  { %v3665_v54 = vmul.f32 %v3664_v32, %v5507_v4 }
0x189e   :  { %v3666_v41 = vsub.f32 0.0, %v3665_v54 }
0x189f   :  { %v3761_v62 = vpop.f32.mrb[42].mxu1 }
0x18a0   :  { %v3667_v19 = vmul.f32 1.442695, %v3666_v41  ;;  %v3832_v21 = vadd.f32 %v3831_v14, %v3761_v62  ;;  %v4838_v34 = vpop.f32.mrb[43].mxu1 }
0x18a2   :  { %5288 = vpow2.f32 %v3667_v19  ;;  %v3835_v25 = vadd.f32 %v6118_v17, %v3832_v21 }
0x18a4   :  { %v3836_v7 = vmul.f32 %v3835_v25, %v5507_v4 }
0x18a6   :  { %v3837_v23 = vsub.f32 0.0, %v3836_v7 }
0x18a8   :  { %v3838_v38 = vmul.f32 1.442695, %v3837_v23 }
0x18aa   :  { %5290 = vpow2.f32 %v3838_v38 }
0x18ac   :  { %v5289_v53 = vpop.eup %5288 }
0x18ad   :  { %v3669_v27 = vadd.f32 1.0, %v5289_v53 }
0x18af   :  { %5292 = vrcp.f32 %v3669_v27 }
0x18b4   :  { %v5291_v29 = vpop.eup %5290 }
0x18b5   :  { %v3840_v57 = vadd.f32 1.0, %v5291_v29 }
0x18b7   :  { %5294 = vrcp.f32 %v3840_v57 }
0x18b9   :  { %v5293_v30 = vpop.eup %5292 }
0x18ba   :  { %v3672_v6 = vmul.f32 %v5293_v30, %v5507_v4 }
0x18bc   :  { %v3673_v28 = vadd.f32 %v3672_v6, %v5511_v12 }
0x18be   :  { %3676 = vrot.lane.b32.xlu0 %v3673_v28, %s5314_s29  ;;  %v3674_v44 = vmul.f32 %v3673_v28, %v6137_v60 }
0x18c1   :  { %v5295_v40 = vpop.eup %5294 }
0x18c2   :  { %v3843_v43 = vmul.f32 %v5295_v40, %v5507_v4 }
0x18c4   :  { %v3844_v0 = vadd.f32 %v3843_v43, %v5511_v12 }
0x18c6   :  { %3847 = vrot.lane.b32.xlu1 %v3844_v0, %s5314_s29  ;;  %v3845_v46 = vmul.f32 %v3844_v0, %v6141_v37 }
0x1930   :  { %v3677_v16 = vpop.permute.xlu0 %3676 }
0x1931   :  { %v3679_v31 = vmul.f32 %v3677_v16, %v3673_v28 }
0x1933   :  { %3681 = vrot.lane.b32.xlu0 %v3679_v31, %s5315_s30 }
0x1938   :  { %v3848_v55 = vpop.permute.xlu1 %3847 }
0x1939   :  { %v3850_v10 = vmul.f32 %v3848_v55, %v3844_v0 }
0x193b   :  { %3852 = vrot.lane.b32.xlu1 %v3850_v10, %s5315_s30 }
0x19a5   :  { %v3682_v8 = vpop.permute.xlu0 %3681 }
0x19a6   :  { %v3684_v13 = vadd.f32 %v3682_v8, %v3674_v44 }
0x19a8   :  { %5296 = vtanh.f32 %v3684_v13 }
0x19ad   :  { %v3853_v22 = vpop.permute.xlu1 %3852 }
0x19ae   :  { %v3855_v33 = vadd.f32 %v3853_v22, %v3845_v46 }
0x19b0   :  { %5298 = vtanh.f32 %v3855_v33 }
0x19b2   :  { %v5297_v48 = vpop.eup %5296 }
0x19b3   :  { %3687 = vrot.lane.b32.xlu0 %v5297_v48, %s5314_s29 }
0x19ba   :  { %v5299_v47 = vpop.eup %5298 }
0x19bb   :  { %3858 = vrot.lane.b32.xlu1 %v5299_v47, %s5314_s29 }
0x1a25   :  { %v3688_v51 = vpop.permute.xlu0 %3687 }
0x1a26   :  { %v3690_v49 = vmul.f32 %v3688_v51, %v3673_v28 }
0x1a28   :  { %3942 = vrot.lane.b32.xlu1 %v3690_v49, %s5315_s30 }
0x1a2d   :  { %v3859_v58 = vpop.permute.xlu1 %3858 }
0x1a2e   :  { %v3861_v60 = vmul.f32 %v3859_v58, %v3844_v0 }
0x1a30   :  { %3867 = vrot.lane.b32.xlu0 %v3861_v60, %s5315_s30 }
0x1a9a   :  { %v3943_v61 = vpop.permute.xlu1 %3942 }
0x1a9b   :  { %4870 = vmatmul.mubr.msk.f32.vlgmr.msra.gmra.mrb[56].mxu0 %vm118_vm0, %v3943_v61 }
0x1aa2   :  { %v3868_v2 = vpop.permute.xlu0 %3867 }
0x1aa3   :  { %4859 = vmatmul.mubr.msk.f32.vlgmr.msra.gmra.mrb[44].mxu1 %vm118_vm0, %v3868_v2 }
0x1b6e   :  { %v4012_v37 = vpop.f32.mrb[56].mxu0 }
0x1b6f   :  { %v4871_v35 = vpop.f32.mrb[57].mxu0 }
0x1b76   :  { %v3937_v3 = vpop.f32.mrb[44].mxu1 }
0x1b77   :  { %v4013_v52 = vadd.f32 %v4012_v37, %v3937_v3  ;;  %v4860_v50 = vpop.f32.mrb[45].mxu1 }
0x1b79   :  { %v4016_v20 = vadd.f32 %v6118_v17, %v4013_v52 }
0x1b7b   :  { %v4017_v9 = vmul.f32 %v4016_v20, %v5507_v4 }
0x1b7d   :  { %v4018_v63 = vsub.f32 0.0, %v4017_v9 }
0x1b7f   :  { %v4019_v39 = vmul.f32 1.442695, %v4018_v63 }
0x1b81   :  { %5300 = vpow2.f32 %v4019_v39 }
0x1b8b   :  { %v5301_v24 = vpop.eup %5300 }
0x1b8c   :  { %v4021_v42 = vadd.f32 1.0, %v5301_v24 }
0x1b8e   :  { %5302 = vrcp.f32 %v4021_v42 }
0x1b98   :  { %v5303_v59 = vpop.eup %5302 }
0x1b99   :  { %v4024_v56 = vmul.f32 %v5303_v59, %v5507_v4 }
0x1b9b   :  { %v4025_v36 = vadd.f32 %v4024_v56, %v5511_v12 }
0x1b9d   :  { %4028 = vrot.lane.b32.xlu0 %v4025_v36, %s5314_s29  ;;  %v4026_v4 = vmul.f32 %v4025_v36, %v3855_v33 }
0x1ba1   :  { %1712 = vrot.lane.b32.xlu0 %v5835_v11, %s5314_s29 }
0x1c0f   :  { %v4029_v14 = vpop.permute.xlu0 %4028 }
0x1c10   :  { %v4031_v17 = vmul.f32 %v4029_v14, %v4025_v36 }
0x1c12   :  { %4033 = vrot.lane.b32.xlu1 %v4031_v17, %s5315_s30 }
0x1c13   :  { %v1713_v15 = vpop.permute.xlu0 %1712 }
0x1c14   :  { %1716 = vst.msk [vmem:[%s6240_s11] sm:$0xff] %vm1715_vm13, %v1713_v15 }
0x1c16   :  { %3510 = vrot.lane.b32.xlu1 %v6148_v1, %s5314_s29 }
0x1c1a   :  { %2163 = vrot.lane.b32.xlu1 %v5910_v45, %s5316_s20 }
0x1c84   :  { %v4034_v12 = vpop.permute.xlu1 %4033 }
0x1c85   :  { %v4036_v5 = vadd.f32 %v4034_v12, %v4026_v4 }
0x1c87   :  { %5304 = vtanh.f32 %v4036_v5 }
0x1c88   :  { %v3511_v11 = vpop.permute.xlu1 %3510 }
0x1c89   :  { %3513 = vst.msk [vmem:[%s6240_s11 + $0x8] sm:$0xff] %vm1715_vm13, %v3511_v11 }
0x1c8c   :  { %v2164_v26 = vpop.permute.xlu1 %2163 }
0x1c8d   :  { %2167 = vst.msk [vmem:[%s6240_s11] sm:$0xff] %vm2166_vm14, %v2164_v26 }
0x1c8e   :  { %2614 = vst.msk [vmem:[%s6240_s11] sm:$0xff] %vm2613_vm15, %v5990_v18 }
0x1c91   :  { %v5305_v45 = vpop.eup %5304 }
0x1c92   :  { %4039 = vrot.lane.b32.xlu0 %v5305_v45, %s5314_s29 }
0x1c96   :  { %3863 = vrot.lane.b32.xlu0 %v3861_v60, %s5316_s20 }
0x1d04   :  { %v4040_v1 = vpop.permute.xlu0 %4039 }
0x1d05   :  { %v4042_v32 = vmul.f32 %v4040_v1, %v4025_v36 }
0x1d08   :  { %v3864_v54 = vpop.permute.xlu0 %3863 }
0x1d09   :  { %3866 = vst.msk [vmem:[%s6240_s11 + $0x8] sm:$0xff] %vm2166_vm14, %v3864_v54 }
0x1d0a   :  { %4043 = vst.msk [vmem:[%s6240_s11 + $0x8] sm:$0xff] %vm2613_vm15, %v4042_v32 }

</bundles_post_ra>
